<compile_context>
chip_gen: v5e
topology: v5e:2x2
jax: 0.10.0
libtpu: 0.0.40
codegen_flags: <defaults>
</compile_context>

<pallas_src>
import functools

import jax
import jax.numpy as jnp
from jax.experimental import pallas as pl
from jax.experimental.pallas import tpu as pltpu


def fused_conv_kernel(x_ref, w_ref, b_ref, o_ref, *bufs, n, width):
    """All n applications of the shared 3x3 valid conv for ONE image.

    x_ref:  (C, H*W)      VMEM  input image, channel planes flattened (lane-dense)
    w_ref:  (Cout*C*9,)   SMEM  conv weight flattened in (co, ci, dy, dx) order
    b_ref:  (Cout,)       SMEM  bias
    o_ref:  (Cout, H*W)   VMEM  output slab (valid region = top-left (H-2n, W-2n))
    bufs:   0..2 x (C, H*W) f32 VMEM ping-pong scratch for intermediate layers
    """
    C, HW = x_ref.shape
    Cout = b_ref.shape[0]

    # ---- hoisted once: identical for all n layers -------------------------
    # 81 SMEM scalars (kept as scalars; splatted only at the FMA).
    wgt = [[[w_ref[(co * C + ci) * 9 + k] for k in range(9)]
            for ci in range(C)]
           for co in range(Cout)]
    # Bias splats built once (Cout x (1, HW) f32).
    bias_row = [jnp.full((1, HW), b_ref[co], dtype=jnp.float32)
                for co in range(Cout)]
    # Flattened-lane shift of tap (dy, dx): out[p] needs in[p + dy*W + dx].
    shifts = [dy * width + dx for dy in range(3) for dx in range(3)]

    # Fixed-shape layer loop (ping-pong through VMEM scratch, last layer -> o_ref).
    for layer in range(n):
        src = x_ref if layer == 0 else bufs[(layer - 1) % 2]
        dst = o_ref if layer == n - 1 else bufs[layer % 2]

        acc = [bias_row[co] for co in range(Cout)]  # (1, HW) f32 each
        for ci in range(C):
            plane = src[ci:ci + 1, :].astype(jnp.float32)        # (1, HW), lane-dense
            for k, s in enumerate(shifts):
                # Left-rotate by s: shifted[p] = plane[(p + s) % HW]  (XLU slot).
                shifted = plane if s == 0 else pltpu.roll(plane, shift=HW - s, axis=1)
                for co in range(Cout):
                    acc[co] = acc[co] + wgt[co][ci][k] * shifted  # VPU FMA
        for co in range(Cout):
            dst[co:co + 1, :] = acc[co].astype(dst.dtype)         # unmasked lane-dense store


def model_forward(x_nchw, weight_oihw, bias, n):
    """Equivalent of Model(n).forward(x): apply the same conv n times (fused)."""
    if n == 0:
        return x_nchw

    N, C, H, W = x_nchw.shape
    Cout = weight_oihw.shape[0]
    HW = H * W
    Ho, Wo = H - 2 * n, W - 2 * n
    assert Ho >= 1 and Wo >= 1, "spatial dims exhausted by repeated valid convs"

    x_flat = x_nchw.reshape(N, C, HW)          # lane-dense per-channel planes
    w_flat = weight_oihw.reshape(-1)           # (Cout*C*9,), (co, ci, dy, dx) order

    kernel = functools.partial(fused_conv_kernel, n=n, width=W)

    num_bufs = min(n - 1, 2)                   # 0 for n==1, 1 for n==2, else 2
    scratch = [pltpu.VMEM((C, HW), jnp.float32) for _ in range(num_bufs)]

    out_flat = pl.pallas_call(
        kernel,
        out_shape=jax.ShapeDtypeStruct((N, Cout, HW), x_nchw.dtype),
        grid=(N,),
        in_specs=[
            pl.BlockSpec((None, C, HW), lambda i: (i, 0, 0)),               # x: one image per step
            pl.BlockSpec(memory_space=pltpu.MemorySpace.SMEM),              # weights (scalars)
            pl.BlockSpec(memory_space=pltpu.MemorySpace.SMEM),              # bias (scalars)
        ],
        out_specs=pl.BlockSpec((None, Cout, HW), lambda i: (i, 0, 0)),
        scratch_shapes=scratch,
        compiler_params=pltpu.CompilerParams(
            dimension_semantics=("parallel",),        # batch axis -> both TCs on v7x
            vmem_limit_bytes=32 * 1024 * 1024,
        ),
    )(x_flat, w_flat, bias)

    # Layout plumbing only: lane-dense slab -> NCHW, slice off the invalid border.
    return out_flat.reshape(N, Cout, H, W)[:, :, :Ho, :Wo]


def reference_forward(x_nchw, weight_oihw, bias, n):
    """Pure-JAX reference (lax conv) for a correctness check."""
    x = x_nchw
    for _ in range(n):
        x = jax.lax.conv_general_dilated(
            x, weight_oihw, window_strides=(1, 1), padding="VALID",
            dimension_numbers=("NCHW", "OIHW", "NCHW"))
        x = x + bias[None, :, None, None]
    return x


if __name__ == "__main__":
    key = jax.random.PRNGKey(0)
    k_x, k_w, k_b = jax.random.split(key, 3)

    n_iters = 3
    N, C, H, W = 2, 3, 16, 16          # Conv2d(3, 3, 3) fixes C=3

    x = jax.random.normal(k_x, (N, C, H, W), dtype=jnp.float32)

    # Deterministic init mimicking PyTorch Conv2d default (uniform in +-1/sqrt(fan_in)).
    fan_in = C * 3 * 3
    bound = 1.0 / (fan_in ** 0.5)
    weight = jax.random.uniform(k_w, (3, 3, 3, 3), jnp.float32, -bound, bound)  # OIHW
    bias = jax.random.uniform(k_b, (3,), jnp.float32, -bound, bound)

    out = model_forward(x, weight, bias, n_iters)
    out = jax.block_until_ready(out)

    ref = reference_forward(x, weight, bias, n_iters)
    assert out.shape == (N, C, H - 2 * n_iters, W - 2 * n_iters), out.shape
    assert jnp.allclose(out, ref, rtol=1e-4, atol=1e-4), "mismatch vs lax.conv reference"

    print("KERNEL_OK")
</pallas_src>

<mosaic_0001>
module attributes {stable_mosaic.version = 11 : i64} {
  func.func @fused_conv_kernel(%arg0: i32, %arg1: memref<1x3x256xf32, #tpu.memory_space<vmem>>, %arg2: memref<81xf32, #tpu.memory_space<smem>>, %arg3: memref<3xf32, #tpu.memory_space<smem>>, %arg4: memref<1x3x256xf32, #tpu.memory_space<vmem>>, %arg5: memref<3x256xf32, #tpu.memory_space<vmem>>, %arg6: memref<3x256xf32, #tpu.memory_space<vmem>>) attributes {dimension_semantics = [#tpu.dimension_semantics<parallel>], iteration_bounds = array<i64: 2>, scalar_prefetch = 0 : i64, scratch_operands = 2 : i64, tpu.core_type = #tpu.core_type<tc>, window_params = [{transform_indices = @transform_0, window_bounds = array<i64: 1, 3, 256>}, {transform_indices = @transform_1, window_bounds = array<i64: 81>}, {transform_indices = @transform_2, window_bounds = array<i64: 3>}, {transform_indices = @transform_3, window_bounds = array<i64: 1, 3, 256>}]} {
    %c0 = arith.constant 0 : index
    %0 = memref.load %arg2[%c0] : memref<81xf32, #tpu.memory_space<smem>>
    %c1 = arith.constant 1 : index
    %1 = memref.load %arg2[%c1] : memref<81xf32, #tpu.memory_space<smem>>
    %c2 = arith.constant 2 : index
    %2 = memref.load %arg2[%c2] : memref<81xf32, #tpu.memory_space<smem>>
    %c3 = arith.constant 3 : index
    %3 = memref.load %arg2[%c3] : memref<81xf32, #tpu.memory_space<smem>>
    %c4 = arith.constant 4 : index
    %4 = memref.load %arg2[%c4] : memref<81xf32, #tpu.memory_space<smem>>
    %c5 = arith.constant 5 : index
    %5 = memref.load %arg2[%c5] : memref<81xf32, #tpu.memory_space<smem>>
    %c6 = arith.constant 6 : index
    %6 = memref.load %arg2[%c6] : memref<81xf32, #tpu.memory_space<smem>>
    %c7 = arith.constant 7 : index
    %7 = memref.load %arg2[%c7] : memref<81xf32, #tpu.memory_space<smem>>
    %c8 = arith.constant 8 : index
    %8 = memref.load %arg2[%c8] : memref<81xf32, #tpu.memory_space<smem>>
    %c9 = arith.constant 9 : index
    %9 = memref.load %arg2[%c9] : memref<81xf32, #tpu.memory_space<smem>>
    %c10 = arith.constant 10 : index
    %10 = memref.load %arg2[%c10] : memref<81xf32, #tpu.memory_space<smem>>
    %c11 = arith.constant 11 : index
    %11 = memref.load %arg2[%c11] : memref<81xf32, #tpu.memory_space<smem>>
    %c12 = arith.constant 12 : index
    %12 = memref.load %arg2[%c12] : memref<81xf32, #tpu.memory_space<smem>>
    %c13 = arith.constant 13 : index
    %13 = memref.load %arg2[%c13] : memref<81xf32, #tpu.memory_space<smem>>
    %c14 = arith.constant 14 : index
    %14 = memref.load %arg2[%c14] : memref<81xf32, #tpu.memory_space<smem>>
    %c15 = arith.constant 15 : index
    %15 = memref.load %arg2[%c15] : memref<81xf32, #tpu.memory_space<smem>>
    %c16 = arith.constant 16 : index
    %16 = memref.load %arg2[%c16] : memref<81xf32, #tpu.memory_space<smem>>
    %c17 = arith.constant 17 : index
    %17 = memref.load %arg2[%c17] : memref<81xf32, #tpu.memory_space<smem>>
    %c18 = arith.constant 18 : index
    %18 = memref.load %arg2[%c18] : memref<81xf32, #tpu.memory_space<smem>>
    %c19 = arith.constant 19 : index
    %19 = memref.load %arg2[%c19] : memref<81xf32, #tpu.memory_space<smem>>
    %c20 = arith.constant 20 : index
    %20 = memref.load %arg2[%c20] : memref<81xf32, #tpu.memory_space<smem>>
    %c21 = arith.constant 21 : index
    %21 = memref.load %arg2[%c21] : memref<81xf32, #tpu.memory_space<smem>>
    %c22 = arith.constant 22 : index
    %22 = memref.load %arg2[%c22] : memref<81xf32, #tpu.memory_space<smem>>
    %c23 = arith.constant 23 : index
    %23 = memref.load %arg2[%c23] : memref<81xf32, #tpu.memory_space<smem>>
    %c24 = arith.constant 24 : index
    %24 = memref.load %arg2[%c24] : memref<81xf32, #tpu.memory_space<smem>>
    %c25 = arith.constant 25 : index
    %25 = memref.load %arg2[%c25] : memref<81xf32, #tpu.memory_space<smem>>
    %c26 = arith.constant 26 : index
    %26 = memref.load %arg2[%c26] : memref<81xf32, #tpu.memory_space<smem>>
    %c27 = arith.constant 27 : index
    %27 = memref.load %arg2[%c27] : memref<81xf32, #tpu.memory_space<smem>>
    %c28 = arith.constant 28 : index
    %28 = memref.load %arg2[%c28] : memref<81xf32, #tpu.memory_space<smem>>
    %c29 = arith.constant 29 : index
    %29 = memref.load %arg2[%c29] : memref<81xf32, #tpu.memory_space<smem>>
    %c30 = arith.constant 30 : index
    %30 = memref.load %arg2[%c30] : memref<81xf32, #tpu.memory_space<smem>>
    %c31 = arith.constant 31 : index
    %31 = memref.load %arg2[%c31] : memref<81xf32, #tpu.memory_space<smem>>
    %c32 = arith.constant 32 : index
    %32 = memref.load %arg2[%c32] : memref<81xf32, #tpu.memory_space<smem>>
    %c33 = arith.constant 33 : index
    %33 = memref.load %arg2[%c33] : memref<81xf32, #tpu.memory_space<smem>>
    %c34 = arith.constant 34 : index
    %34 = memref.load %arg2[%c34] : memref<81xf32, #tpu.memory_space<smem>>
    %c35 = arith.constant 35 : index
    %35 = memref.load %arg2[%c35] : memref<81xf32, #tpu.memory_space<smem>>
    %c36 = arith.constant 36 : index
    %36 = memref.load %arg2[%c36] : memref<81xf32, #tpu.memory_space<smem>>
    %c37 = arith.constant 37 : index
    %37 = memref.load %arg2[%c37] : memref<81xf32, #tpu.memory_space<smem>>
    %c38 = arith.constant 38 : index
    %38 = memref.load %arg2[%c38] : memref<81xf32, #tpu.memory_space<smem>>
    %c39 = arith.constant 39 : index
    %39 = memref.load %arg2[%c39] : memref<81xf32, #tpu.memory_space<smem>>
    %c40 = arith.constant 40 : index
    %40 = memref.load %arg2[%c40] : memref<81xf32, #tpu.memory_space<smem>>
    %c41 = arith.constant 41 : index
    %41 = memref.load %arg2[%c41] : memref<81xf32, #tpu.memory_space<smem>>
    %c42 = arith.constant 42 : index
    %42 = memref.load %arg2[%c42] : memref<81xf32, #tpu.memory_space<smem>>
    %c43 = arith.constant 43 : index
    %43 = memref.load %arg2[%c43] : memref<81xf32, #tpu.memory_space<smem>>
    %c44 = arith.constant 44 : index
    %44 = memref.load %arg2[%c44] : memref<81xf32, #tpu.memory_space<smem>>
    %c45 = arith.constant 45 : index
    %45 = memref.load %arg2[%c45] : memref<81xf32, #tpu.memory_space<smem>>
    %c46 = arith.constant 46 : index
    %46 = memref.load %arg2[%c46] : memref<81xf32, #tpu.memory_space<smem>>
    %c47 = arith.constant 47 : index
    %47 = memref.load %arg2[%c47] : memref<81xf32, #tpu.memory_space<smem>>
    %c48 = arith.constant 48 : index
    %48 = memref.load %arg2[%c48] : memref<81xf32, #tpu.memory_space<smem>>
    %c49 = arith.constant 49 : index
    %49 = memref.load %arg2[%c49] : memref<81xf32, #tpu.memory_space<smem>>
    %c50 = arith.constant 50 : index
    %50 = memref.load %arg2[%c50] : memref<81xf32, #tpu.memory_space<smem>>
    %c51 = arith.constant 51 : index
    %51 = memref.load %arg2[%c51] : memref<81xf32, #tpu.memory_space<smem>>
    %c52 = arith.constant 52 : index
    %52 = memref.load %arg2[%c52] : memref<81xf32, #tpu.memory_space<smem>>
    %c53 = arith.constant 53 : index
    %53 = memref.load %arg2[%c53] : memref<81xf32, #tpu.memory_space<smem>>
    %c54 = arith.constant 54 : index
    %54 = memref.load %arg2[%c54] : memref<81xf32, #tpu.memory_space<smem>>
    %c55 = arith.constant 55 : index
    %55 = memref.load %arg2[%c55] : memref<81xf32, #tpu.memory_space<smem>>
    %c56 = arith.constant 56 : index
    %56 = memref.load %arg2[%c56] : memref<81xf32, #tpu.memory_space<smem>>
    %c57 = arith.constant 57 : index
    %57 = memref.load %arg2[%c57] : memref<81xf32, #tpu.memory_space<smem>>
    %c58 = arith.constant 58 : index
    %58 = memref.load %arg2[%c58] : memref<81xf32, #tpu.memory_space<smem>>
    %c59 = arith.constant 59 : index
    %59 = memref.load %arg2[%c59] : memref<81xf32, #tpu.memory_space<smem>>
    %c60 = arith.constant 60 : index
    %60 = memref.load %arg2[%c60] : memref<81xf32, #tpu.memory_space<smem>>
    %c61 = arith.constant 61 : index
    %61 = memref.load %arg2[%c61] : memref<81xf32, #tpu.memory_space<smem>>
    %c62 = arith.constant 62 : index
    %62 = memref.load %arg2[%c62] : memref<81xf32, #tpu.memory_space<smem>>
    %c63 = arith.constant 63 : index
    %63 = memref.load %arg2[%c63] : memref<81xf32, #tpu.memory_space<smem>>
    %c64 = arith.constant 64 : index
    %64 = memref.load %arg2[%c64] : memref<81xf32, #tpu.memory_space<smem>>
    %c65 = arith.constant 65 : index
    %65 = memref.load %arg2[%c65] : memref<81xf32, #tpu.memory_space<smem>>
    %c66 = arith.constant 66 : index
    %66 = memref.load %arg2[%c66] : memref<81xf32, #tpu.memory_space<smem>>
    %c67 = arith.constant 67 : index
    %67 = memref.load %arg2[%c67] : memref<81xf32, #tpu.memory_space<smem>>
    %c68 = arith.constant 68 : index
    %68 = memref.load %arg2[%c68] : memref<81xf32, #tpu.memory_space<smem>>
    %c69 = arith.constant 69 : index
    %69 = memref.load %arg2[%c69] : memref<81xf32, #tpu.memory_space<smem>>
    %c70 = arith.constant 70 : index
    %70 = memref.load %arg2[%c70] : memref<81xf32, #tpu.memory_space<smem>>
    %c71 = arith.constant 71 : index
    %71 = memref.load %arg2[%c71] : memref<81xf32, #tpu.memory_space<smem>>
    %c72 = arith.constant 72 : index
    %72 = memref.load %arg2[%c72] : memref<81xf32, #tpu.memory_space<smem>>
    %c73 = arith.constant 73 : index
    %73 = memref.load %arg2[%c73] : memref<81xf32, #tpu.memory_space<smem>>
    %c74 = arith.constant 74 : index
    %74 = memref.load %arg2[%c74] : memref<81xf32, #tpu.memory_space<smem>>
    %c75 = arith.constant 75 : index
    %75 = memref.load %arg2[%c75] : memref<81xf32, #tpu.memory_space<smem>>
    %c76 = arith.constant 76 : index
    %76 = memref.load %arg2[%c76] : memref<81xf32, #tpu.memory_space<smem>>
    %c77 = arith.constant 77 : index
    %77 = memref.load %arg2[%c77] : memref<81xf32, #tpu.memory_space<smem>>
    %c78 = arith.constant 78 : index
    %78 = memref.load %arg2[%c78] : memref<81xf32, #tpu.memory_space<smem>>
    %c79 = arith.constant 79 : index
    %79 = memref.load %arg2[%c79] : memref<81xf32, #tpu.memory_space<smem>>
    %c80 = arith.constant 80 : index
    %80 = memref.load %arg2[%c80] : memref<81xf32, #tpu.memory_space<smem>>
    %c0_0 = arith.constant 0 : index
    %81 = memref.load %arg3[%c0_0] : memref<3xf32, #tpu.memory_space<smem>>
    %82 = vector.broadcast %81 : f32 to vector<1x256xf32>
    %c1_1 = arith.constant 1 : index
    %83 = memref.load %arg3[%c1_1] : memref<3xf32, #tpu.memory_space<smem>>
    %84 = vector.broadcast %83 : f32 to vector<1x256xf32>
    %c2_2 = arith.constant 2 : index
    %85 = memref.load %arg3[%c2_2] : memref<3xf32, #tpu.memory_space<smem>>
    %86 = vector.broadcast %85 : f32 to vector<1x256xf32>
    %c0_3 = arith.constant 0 : index
    %c0_4 = arith.constant 0 : index
    %c0_5 = arith.constant 0 : index
    %87 = vector.load %arg1[%c0_3, %c0_4, %c0_5] : memref<1x3x256xf32, #tpu.memory_space<vmem>>, vector<1x1x256xf32>
    %88 = vector.shape_cast %87 : vector<1x1x256xf32> to vector<1x256xf32>
    %89 = vector.broadcast %0 : f32 to vector<1x256xf32>
    %90 = arith.mulf %89, %88 : vector<1x256xf32>
    %91 = arith.addf %82, %90 : vector<1x256xf32>
    %92 = vector.broadcast %27 : f32 to vector<1x256xf32>
    %93 = arith.mulf %92, %88 : vector<1x256xf32>
    %94 = arith.addf %84, %93 : vector<1x256xf32>
    %95 = vector.broadcast %54 : f32 to vector<1x256xf32>
    %96 = arith.mulf %95, %88 : vector<1x256xf32>
    %97 = arith.addf %86, %96 : vector<1x256xf32>
    %c255_i32 = arith.constant 255 : i32
    %98 = tpu.dynamic_rotate %88 by %c255_i32 dim 1 : vector<1x256xf32>, i32 -> vector<1x256xf32>
    %99 = vector.broadcast %1 : f32 to vector<1x256xf32>
    %100 = arith.mulf %99, %98 : vector<1x256xf32>
    %101 = arith.addf %91, %100 : vector<1x256xf32>
    %102 = vector.broadcast %28 : f32 to vector<1x256xf32>
    %103 = arith.mulf %102, %98 : vector<1x256xf32>
    %104 = arith.addf %94, %103 : vector<1x256xf32>
    %105 = vector.broadcast %55 : f32 to vector<1x256xf32>
    %106 = arith.mulf %105, %98 : vector<1x256xf32>
    %107 = arith.addf %97, %106 : vector<1x256xf32>
    %c254_i32 = arith.constant 254 : i32
    %108 = tpu.dynamic_rotate %88 by %c254_i32 dim 1 : vector<1x256xf32>, i32 -> vector<1x256xf32>
    %109 = vector.broadcast %2 : f32 to vector<1x256xf32>
    %110 = arith.mulf %109, %108 : vector<1x256xf32>
    %111 = arith.addf %101, %110 : vector<1x256xf32>
    %112 = vector.broadcast %29 : f32 to vector<1x256xf32>
    %113 = arith.mulf %112, %108 : vector<1x256xf32>
    %114 = arith.addf %104, %113 : vector<1x256xf32>
    %115 = vector.broadcast %56 : f32 to vector<1x256xf32>
    %116 = arith.mulf %115, %108 : vector<1x256xf32>
    %117 = arith.addf %107, %116 : vector<1x256xf32>
    %c240_i32 = arith.constant 240 : i32
    %118 = tpu.dynamic_rotate %88 by %c240_i32 dim 1 : vector<1x256xf32>, i32 -> vector<1x256xf32>
    %119 = vector.broadcast %3 : f32 to vector<1x256xf32>
    %120 = arith.mulf %119, %118 : vector<1x256xf32>
    %121 = arith.addf %111, %120 : vector<1x256xf32>
    %122 = vector.broadcast %30 : f32 to vector<1x256xf32>
    %123 = arith.mulf %122, %118 : vector<1x256xf32>
    %124 = arith.addf %114, %123 : vector<1x256xf32>
    %125 = vector.broadcast %57 : f32 to vector<1x256xf32>
    %126 = arith.mulf %125, %118 : vector<1x256xf32>
    %127 = arith.addf %117, %126 : vector<1x256xf32>
    %c239_i32 = arith.constant 239 : i32
    %128 = tpu.dynamic_rotate %88 by %c239_i32 dim 1 : vector<1x256xf32>, i32 -> vector<1x256xf32>
    %129 = vector.broadcast %4 : f32 to vector<1x256xf32>
    %130 = arith.mulf %129, %128 : vector<1x256xf32>
    %131 = arith.addf %121, %130 : vector<1x256xf32>
    %132 = vector.broadcast %31 : f32 to vector<1x256xf32>
    %133 = arith.mulf %132, %128 : vector<1x256xf32>
    %134 = arith.addf %124, %133 : vector<1x256xf32>
    %135 = vector.broadcast %58 : f32 to vector<1x256xf32>
    %136 = arith.mulf %135, %128 : vector<1x256xf32>
    %137 = arith.addf %127, %136 : vector<1x256xf32>
    %c238_i32 = arith.constant 238 : i32
    %138 = tpu.dynamic_rotate %88 by %c238_i32 dim 1 : vector<1x256xf32>, i32 -> vector<1x256xf32>
    %139 = vector.broadcast %5 : f32 to vector<1x256xf32>
    %140 = arith.mulf %139, %138 : vector<1x256xf32>
    %141 = arith.addf %131, %140 : vector<1x256xf32>
    %142 = vector.broadcast %32 : f32 to vector<1x256xf32>
    %143 = arith.mulf %142, %138 : vector<1x256xf32>
    %144 = arith.addf %134, %143 : vector<1x256xf32>
    %145 = vector.broadcast %59 : f32 to vector<1x256xf32>
    %146 = arith.mulf %145, %138 : vector<1x256xf32>
    %147 = arith.addf %137, %146 : vector<1x256xf32>
    %c224_i32 = arith.constant 224 : i32
    %148 = tpu.dynamic_rotate %88 by %c224_i32 dim 1 : vector<1x256xf32>, i32 -> vector<1x256xf32>
    %149 = vector.broadcast %6 : f32 to vector<1x256xf32>
    %150 = arith.mulf %149, %148 : vector<1x256xf32>
    %151 = arith.addf %141, %150 : vector<1x256xf32>
    %152 = vector.broadcast %33 : f32 to vector<1x256xf32>
    %153 = arith.mulf %152, %148 : vector<1x256xf32>
    %154 = arith.addf %144, %153 : vector<1x256xf32>
    %155 = vector.broadcast %60 : f32 to vector<1x256xf32>
    %156 = arith.mulf %155, %148 : vector<1x256xf32>
    %157 = arith.addf %147, %156 : vector<1x256xf32>
    %c223_i32 = arith.constant 223 : i32
    %158 = tpu.dynamic_rotate %88 by %c223_i32 dim 1 : vector<1x256xf32>, i32 -> vector<1x256xf32>
    %159 = vector.broadcast %7 : f32 to vector<1x256xf32>
    %160 = arith.mulf %159, %158 : vector<1x256xf32>
    %161 = arith.addf %151, %160 : vector<1x256xf32>
    %162 = vector.broadcast %34 : f32 to vector<1x256xf32>
    %163 = arith.mulf %162, %158 : vector<1x256xf32>
    %164 = arith.addf %154, %163 : vector<1x256xf32>
    %165 = vector.broadcast %61 : f32 to vector<1x256xf32>
    %166 = arith.mulf %165, %158 : vector<1x256xf32>
    %167 = arith.addf %157, %166 : vector<1x256xf32>
    %c222_i32 = arith.constant 222 : i32
    %168 = tpu.dynamic_rotate %88 by %c222_i32 dim 1 : vector<1x256xf32>, i32 -> vector<1x256xf32>
    %169 = vector.broadcast %8 : f32 to vector<1x256xf32>
    %170 = arith.mulf %169, %168 : vector<1x256xf32>
    %171 = arith.addf %161, %170 : vector<1x256xf32>
    %172 = vector.broadcast %35 : f32 to vector<1x256xf32>
    %173 = arith.mulf %172, %168 : vector<1x256xf32>
    %174 = arith.addf %164, %173 : vector<1x256xf32>
    %175 = vector.broadcast %62 : f32 to vector<1x256xf32>
    %176 = arith.mulf %175, %168 : vector<1x256xf32>
    %177 = arith.addf %167, %176 : vector<1x256xf32>
    %c0_6 = arith.constant 0 : index
    %c1_7 = arith.constant 1 : index
    %c0_8 = arith.constant 0 : index
    %178 = vector.load %arg1[%c0_6, %c1_7, %c0_8] : memref<1x3x256xf32, #tpu.memory_space<vmem>>, vector<1x1x256xf32>
    %179 = vector.shape_cast %178 : vector<1x1x256xf32> to vector<1x256xf32>
    %180 = vector.broadcast %9 : f32 to vector<1x256xf32>
    %181 = arith.mulf %180, %179 : vector<1x256xf32>
    %182 = arith.addf %171, %181 : vector<1x256xf32>
    %183 = vector.broadcast %36 : f32 to vector<1x256xf32>
    %184 = arith.mulf %183, %179 : vector<1x256xf32>
    %185 = arith.addf %174, %184 : vector<1x256xf32>
    %186 = vector.broadcast %63 : f32 to vector<1x256xf32>
    %187 = arith.mulf %186, %179 : vector<1x256xf32>
    %188 = arith.addf %177, %187 : vector<1x256xf32>
    %c255_i32_9 = arith.constant 255 : i32
    %189 = tpu.dynamic_rotate %179 by %c255_i32_9 dim 1 : vector<1x256xf32>, i32 -> vector<1x256xf32>
    %190 = vector.broadcast %10 : f32 to vector<1x256xf32>
    %191 = arith.mulf %190, %189 : vector<1x256xf32>
    %192 = arith.addf %182, %191 : vector<1x256xf32>
    %193 = vector.broadcast %37 : f32 to vector<1x256xf32>
    %194 = arith.mulf %193, %189 : vector<1x256xf32>
    %195 = arith.addf %185, %194 : vector<1x256xf32>
    %196 = vector.broadcast %64 : f32 to vector<1x256xf32>
    %197 = arith.mulf %196, %189 : vector<1x256xf32>
    %198 = arith.addf %188, %197 : vector<1x256xf32>
    %c254_i32_10 = arith.constant 254 : i32
    %199 = tpu.dynamic_rotate %179 by %c254_i32_10 dim 1 : vector<1x256xf32>, i32 -> vector<1x256xf32>
    %200 = vector.broadcast %11 : f32 to vector<1x256xf32>
    %201 = arith.mulf %200, %199 : vector<1x256xf32>
    %202 = arith.addf %192, %201 : vector<1x256xf32>
    %203 = vector.broadcast %38 : f32 to vector<1x256xf32>
    %204 = arith.mulf %203, %199 : vector<1x256xf32>
    %205 = arith.addf %195, %204 : vector<1x256xf32>
    %206 = vector.broadcast %65 : f32 to vector<1x256xf32>
    %207 = arith.mulf %206, %199 : vector<1x256xf32>
    %208 = arith.addf %198, %207 : vector<1x256xf32>
    %c240_i32_11 = arith.constant 240 : i32
    %209 = tpu.dynamic_rotate %179 by %c240_i32_11 dim 1 : vector<1x256xf32>, i32 -> vector<1x256xf32>
    %210 = vector.broadcast %12 : f32 to vector<1x256xf32>
    %211 = arith.mulf %210, %209 : vector<1x256xf32>
    %212 = arith.addf %202, %211 : vector<1x256xf32>
    %213 = vector.broadcast %39 : f32 to vector<1x256xf32>
    %214 = arith.mulf %213, %209 : vector<1x256xf32>
    %215 = arith.addf %205, %214 : vector<1x256xf32>
    %216 = vector.broadcast %66 : f32 to vector<1x256xf32>
    %217 = arith.mulf %216, %209 : vector<1x256xf32>
    %218 = arith.addf %208, %217 : vector<1x256xf32>
    %c239_i32_12 = arith.constant 239 : i32
    %219 = tpu.dynamic_rotate %179 by %c239_i32_12 dim 1 : vector<1x256xf32>, i32 -> vector<1x256xf32>
    %220 = vector.broadcast %13 : f32 to vector<1x256xf32>
    %221 = arith.mulf %220, %219 : vector<1x256xf32>
    %222 = arith.addf %212, %221 : vector<1x256xf32>
    %223 = vector.broadcast %40 : f32 to vector<1x256xf32>
    %224 = arith.mulf %223, %219 : vector<1x256xf32>
    %225 = arith.addf %215, %224 : vector<1x256xf32>
    %226 = vector.broadcast %67 : f32 to vector<1x256xf32>
    %227 = arith.mulf %226, %219 : vector<1x256xf32>
    %228 = arith.addf %218, %227 : vector<1x256xf32>
    %c238_i32_13 = arith.constant 238 : i32
    %229 = tpu.dynamic_rotate %179 by %c238_i32_13 dim 1 : vector<1x256xf32>, i32 -> vector<1x256xf32>
    %230 = vector.broadcast %14 : f32 to vector<1x256xf32>
    %231 = arith.mulf %230, %229 : vector<1x256xf32>
    %232 = arith.addf %222, %231 : vector<1x256xf32>
    %233 = vector.broadcast %41 : f32 to vector<1x256xf32>
    %234 = arith.mulf %233, %229 : vector<1x256xf32>
    %235 = arith.addf %225, %234 : vector<1x256xf32>
    %236 = vector.broadcast %68 : f32 to vector<1x256xf32>
    %237 = arith.mulf %236, %229 : vector<1x256xf32>
    %238 = arith.addf %228, %237 : vector<1x256xf32>
    %c224_i32_14 = arith.constant 224 : i32
    %239 = tpu.dynamic_rotate %179 by %c224_i32_14 dim 1 : vector<1x256xf32>, i32 -> vector<1x256xf32>
    %240 = vector.broadcast %15 : f32 to vector<1x256xf32>
    %241 = arith.mulf %240, %239 : vector<1x256xf32>
    %242 = arith.addf %232, %241 : vector<1x256xf32>
    %243 = vector.broadcast %42 : f32 to vector<1x256xf32>
    %244 = arith.mulf %243, %239 : vector<1x256xf32>
    %245 = arith.addf %235, %244 : vector<1x256xf32>
    %246 = vector.broadcast %69 : f32 to vector<1x256xf32>
    %247 = arith.mulf %246, %239 : vector<1x256xf32>
    %248 = arith.addf %238, %247 : vector<1x256xf32>
    %c223_i32_15 = arith.constant 223 : i32
    %249 = tpu.dynamic_rotate %179 by %c223_i32_15 dim 1 : vector<1x256xf32>, i32 -> vector<1x256xf32>
    %250 = vector.broadcast %16 : f32 to vector<1x256xf32>
    %251 = arith.mulf %250, %249 : vector<1x256xf32>
    %252 = arith.addf %242, %251 : vector<1x256xf32>
    %253 = vector.broadcast %43 : f32 to vector<1x256xf32>
    %254 = arith.mulf %253, %249 : vector<1x256xf32>
    %255 = arith.addf %245, %254 : vector<1x256xf32>
    %256 = vector.broadcast %70 : f32 to vector<1x256xf32>
    %257 = arith.mulf %256, %249 : vector<1x256xf32>
    %258 = arith.addf %248, %257 : vector<1x256xf32>
    %c222_i32_16 = arith.constant 222 : i32
    %259 = tpu.dynamic_rotate %179 by %c222_i32_16 dim 1 : vector<1x256xf32>, i32 -> vector<1x256xf32>
    %260 = vector.broadcast %17 : f32 to vector<1x256xf32>
    %261 = arith.mulf %260, %259 : vector<1x256xf32>
    %262 = arith.addf %252, %261 : vector<1x256xf32>
    %263 = vector.broadcast %44 : f32 to vector<1x256xf32>
    %264 = arith.mulf %263, %259 : vector<1x256xf32>
    %265 = arith.addf %255, %264 : vector<1x256xf32>
    %266 = vector.broadcast %71 : f32 to vector<1x256xf32>
    %267 = arith.mulf %266, %259 : vector<1x256xf32>
    %268 = arith.addf %258, %267 : vector<1x256xf32>
    %c0_17 = arith.constant 0 : index
    %c2_18 = arith.constant 2 : index
    %c0_19 = arith.constant 0 : index
    %269 = vector.load %arg1[%c0_17, %c2_18, %c0_19] : memref<1x3x256xf32, #tpu.memory_space<vmem>>, vector<1x1x256xf32>
    %270 = vector.shape_cast %269 : vector<1x1x256xf32> to vector<1x256xf32>
    %271 = vector.broadcast %18 : f32 to vector<1x256xf32>
    %272 = arith.mulf %271, %270 : vector<1x256xf32>
    %273 = arith.addf %262, %272 : vector<1x256xf32>
    %274 = vector.broadcast %45 : f32 to vector<1x256xf32>
    %275 = arith.mulf %274, %270 : vector<1x256xf32>
    %276 = arith.addf %265, %275 : vector<1x256xf32>
    %277 = vector.broadcast %72 : f32 to vector<1x256xf32>
    %278 = arith.mulf %277, %270 : vector<1x256xf32>
    %279 = arith.addf %268, %278 : vector<1x256xf32>
    %c255_i32_20 = arith.constant 255 : i32
    %280 = tpu.dynamic_rotate %270 by %c255_i32_20 dim 1 : vector<1x256xf32>, i32 -> vector<1x256xf32>
    %281 = vector.broadcast %19 : f32 to vector<1x256xf32>
    %282 = arith.mulf %281, %280 : vector<1x256xf32>
    %283 = arith.addf %273, %282 : vector<1x256xf32>
    %284 = vector.broadcast %46 : f32 to vector<1x256xf32>
    %285 = arith.mulf %284, %280 : vector<1x256xf32>
    %286 = arith.addf %276, %285 : vector<1x256xf32>
    %287 = vector.broadcast %73 : f32 to vector<1x256xf32>
    %288 = arith.mulf %287, %280 : vector<1x256xf32>
    %289 = arith.addf %279, %288 : vector<1x256xf32>
    %c254_i32_21 = arith.constant 254 : i32
    %290 = tpu.dynamic_rotate %270 by %c254_i32_21 dim 1 : vector<1x256xf32>, i32 -> vector<1x256xf32>
    %291 = vector.broadcast %20 : f32 to vector<1x256xf32>
    %292 = arith.mulf %291, %290 : vector<1x256xf32>
    %293 = arith.addf %283, %292 : vector<1x256xf32>
    %294 = vector.broadcast %47 : f32 to vector<1x256xf32>
    %295 = arith.mulf %294, %290 : vector<1x256xf32>
    %296 = arith.addf %286, %295 : vector<1x256xf32>
    %297 = vector.broadcast %74 : f32 to vector<1x256xf32>
    %298 = arith.mulf %297, %290 : vector<1x256xf32>
    %299 = arith.addf %289, %298 : vector<1x256xf32>
    %c240_i32_22 = arith.constant 240 : i32
    %300 = tpu.dynamic_rotate %270 by %c240_i32_22 dim 1 : vector<1x256xf32>, i32 -> vector<1x256xf32>
    %301 = vector.broadcast %21 : f32 to vector<1x256xf32>
    %302 = arith.mulf %301, %300 : vector<1x256xf32>
    %303 = arith.addf %293, %302 : vector<1x256xf32>
    %304 = vector.broadcast %48 : f32 to vector<1x256xf32>
    %305 = arith.mulf %304, %300 : vector<1x256xf32>
    %306 = arith.addf %296, %305 : vector<1x256xf32>
    %307 = vector.broadcast %75 : f32 to vector<1x256xf32>
    %308 = arith.mulf %307, %300 : vector<1x256xf32>
    %309 = arith.addf %299, %308 : vector<1x256xf32>
    %c239_i32_23 = arith.constant 239 : i32
    %310 = tpu.dynamic_rotate %270 by %c239_i32_23 dim 1 : vector<1x256xf32>, i32 -> vector<1x256xf32>
    %311 = vector.broadcast %22 : f32 to vector<1x256xf32>
    %312 = arith.mulf %311, %310 : vector<1x256xf32>
    %313 = arith.addf %303, %312 : vector<1x256xf32>
    %314 = vector.broadcast %49 : f32 to vector<1x256xf32>
    %315 = arith.mulf %314, %310 : vector<1x256xf32>
    %316 = arith.addf %306, %315 : vector<1x256xf32>
    %317 = vector.broadcast %76 : f32 to vector<1x256xf32>
    %318 = arith.mulf %317, %310 : vector<1x256xf32>
    %319 = arith.addf %309, %318 : vector<1x256xf32>
    %c238_i32_24 = arith.constant 238 : i32
    %320 = tpu.dynamic_rotate %270 by %c238_i32_24 dim 1 : vector<1x256xf32>, i32 -> vector<1x256xf32>
    %321 = vector.broadcast %23 : f32 to vector<1x256xf32>
    %322 = arith.mulf %321, %320 : vector<1x256xf32>
    %323 = arith.addf %313, %322 : vector<1x256xf32>
    %324 = vector.broadcast %50 : f32 to vector<1x256xf32>
    %325 = arith.mulf %324, %320 : vector<1x256xf32>
    %326 = arith.addf %316, %325 : vector<1x256xf32>
    %327 = vector.broadcast %77 : f32 to vector<1x256xf32>
    %328 = arith.mulf %327, %320 : vector<1x256xf32>
    %329 = arith.addf %319, %328 : vector<1x256xf32>
    %c224_i32_25 = arith.constant 224 : i32
    %330 = tpu.dynamic_rotate %270 by %c224_i32_25 dim 1 : vector<1x256xf32>, i32 -> vector<1x256xf32>
    %331 = vector.broadcast %24 : f32 to vector<1x256xf32>
    %332 = arith.mulf %331, %330 : vector<1x256xf32>
    %333 = arith.addf %323, %332 : vector<1x256xf32>
    %334 = vector.broadcast %51 : f32 to vector<1x256xf32>
    %335 = arith.mulf %334, %330 : vector<1x256xf32>
    %336 = arith.addf %326, %335 : vector<1x256xf32>
    %337 = vector.broadcast %78 : f32 to vector<1x256xf32>
    %338 = arith.mulf %337, %330 : vector<1x256xf32>
    %339 = arith.addf %329, %338 : vector<1x256xf32>
    %c223_i32_26 = arith.constant 223 : i32
    %340 = tpu.dynamic_rotate %270 by %c223_i32_26 dim 1 : vector<1x256xf32>, i32 -> vector<1x256xf32>
    %341 = vector.broadcast %25 : f32 to vector<1x256xf32>
    %342 = arith.mulf %341, %340 : vector<1x256xf32>
    %343 = arith.addf %333, %342 : vector<1x256xf32>
    %344 = vector.broadcast %52 : f32 to vector<1x256xf32>
    %345 = arith.mulf %344, %340 : vector<1x256xf32>
    %346 = arith.addf %336, %345 : vector<1x256xf32>
    %347 = vector.broadcast %79 : f32 to vector<1x256xf32>
    %348 = arith.mulf %347, %340 : vector<1x256xf32>
    %349 = arith.addf %339, %348 : vector<1x256xf32>
    %c222_i32_27 = arith.constant 222 : i32
    %350 = tpu.dynamic_rotate %270 by %c222_i32_27 dim 1 : vector<1x256xf32>, i32 -> vector<1x256xf32>
    %351 = vector.broadcast %26 : f32 to vector<1x256xf32>
    %352 = arith.mulf %351, %350 : vector<1x256xf32>
    %353 = arith.addf %343, %352 : vector<1x256xf32>
    %354 = vector.broadcast %53 : f32 to vector<1x256xf32>
    %355 = arith.mulf %354, %350 : vector<1x256xf32>
    %356 = arith.addf %346, %355 : vector<1x256xf32>
    %357 = vector.broadcast %80 : f32 to vector<1x256xf32>
    %358 = arith.mulf %357, %350 : vector<1x256xf32>
    %359 = arith.addf %349, %358 : vector<1x256xf32>
    %c0_28 = arith.constant 0 : index
    %c0_29 = arith.constant 0 : index
    %360 = vector.load %arg5[%c0_28, %c0_29] : memref<3x256xf32, #tpu.memory_space<vmem>>, vector<1x256xf32>
    tpu.vector_store %arg5[%c0_28, %c0_29], %353 {strides = array<i32>} : memref<3x256xf32, #tpu.memory_space<vmem>>, vector<1x256xf32>,
    %c1_30 = arith.constant 1 : index
    %c0_31 = arith.constant 0 : index
    %361 = vector.load %arg5[%c1_30, %c0_31] : memref<3x256xf32, #tpu.memory_space<vmem>>, vector<1x256xf32>
    tpu.vector_store %arg5[%c1_30, %c0_31], %356 {strides = array<i32>} : memref<3x256xf32, #tpu.memory_space<vmem>>, vector<1x256xf32>,
    %c2_32 = arith.constant 2 : index
    %c0_33 = arith.constant 0 : index
    %362 = vector.load %arg5[%c2_32, %c0_33] : memref<3x256xf32, #tpu.memory_space<vmem>>, vector<1x256xf32>
    tpu.vector_store %arg5[%c2_32, %c0_33], %359 {strides = array<i32>} : memref<3x256xf32, #tpu.memory_space<vmem>>, vector<1x256xf32>,
    %c0_34 = arith.constant 0 : index
    %c0_35 = arith.constant 0 : index
    %363 = vector.load %arg5[%c0_34, %c0_35] : memref<3x256xf32, #tpu.memory_space<vmem>>, vector<1x256xf32>
    %364 = vector.broadcast %0 : f32 to vector<1x256xf32>
    %365 = arith.mulf %364, %363 : vector<1x256xf32>
    %366 = arith.addf %82, %365 : vector<1x256xf32>
    %367 = vector.broadcast %27 : f32 to vector<1x256xf32>
    %368 = arith.mulf %367, %363 : vector<1x256xf32>
    %369 = arith.addf %84, %368 : vector<1x256xf32>
    %370 = vector.broadcast %54 : f32 to vector<1x256xf32>
    %371 = arith.mulf %370, %363 : vector<1x256xf32>
    %372 = arith.addf %86, %371 : vector<1x256xf32>
    %c255_i32_36 = arith.constant 255 : i32
    %373 = tpu.dynamic_rotate %363 by %c255_i32_36 dim 1 : vector<1x256xf32>, i32 -> vector<1x256xf32>
    %374 = vector.broadcast %1 : f32 to vector<1x256xf32>
    %375 = arith.mulf %374, %373 : vector<1x256xf32>
    %376 = arith.addf %366, %375 : vector<1x256xf32>
    %377 = vector.broadcast %28 : f32 to vector<1x256xf32>
    %378 = arith.mulf %377, %373 : vector<1x256xf32>
    %379 = arith.addf %369, %378 : vector<1x256xf32>
    %380 = vector.broadcast %55 : f32 to vector<1x256xf32>
    %381 = arith.mulf %380, %373 : vector<1x256xf32>
    %382 = arith.addf %372, %381 : vector<1x256xf32>
    %c254_i32_37 = arith.constant 254 : i32
    %383 = tpu.dynamic_rotate %363 by %c254_i32_37 dim 1 : vector<1x256xf32>, i32 -> vector<1x256xf32>
    %384 = vector.broadcast %2 : f32 to vector<1x256xf32>
    %385 = arith.mulf %384, %383 : vector<1x256xf32>
    %386 = arith.addf %376, %385 : vector<1x256xf32>
    %387 = vector.broadcast %29 : f32 to vector<1x256xf32>
    %388 = arith.mulf %387, %383 : vector<1x256xf32>
    %389 = arith.addf %379, %388 : vector<1x256xf32>
    %390 = vector.broadcast %56 : f32 to vector<1x256xf32>
    %391 = arith.mulf %390, %383 : vector<1x256xf32>
    %392 = arith.addf %382, %391 : vector<1x256xf32>
    %c240_i32_38 = arith.constant 240 : i32
    %393 = tpu.dynamic_rotate %363 by %c240_i32_38 dim 1 : vector<1x256xf32>, i32 -> vector<1x256xf32>
    %394 = vector.broadcast %3 : f32 to vector<1x256xf32>
    %395 = arith.mulf %394, %393 : vector<1x256xf32>
    %396 = arith.addf %386, %395 : vector<1x256xf32>
    %397 = vector.broadcast %30 : f32 to vector<1x256xf32>
    %398 = arith.mulf %397, %393 : vector<1x256xf32>
    %399 = arith.addf %389, %398 : vector<1x256xf32>
    %400 = vector.broadcast %57 : f32 to vector<1x256xf32>
    %401 = arith.mulf %400, %393 : vector<1x256xf32>
    %402 = arith.addf %392, %401 : vector<1x256xf32>
    %c239_i32_39 = arith.constant 239 : i32
    %403 = tpu.dynamic_rotate %363 by %c239_i32_39 dim 1 : vector<1x256xf32>, i32 -> vector<1x256xf32>
    %404 = vector.broadcast %4 : f32 to vector<1x256xf32>
    %405 = arith.mulf %404, %403 : vector<1x256xf32>
    %406 = arith.addf %396, %405 : vector<1x256xf32>
    %407 = vector.broadcast %31 : f32 to vector<1x256xf32>
    %408 = arith.mulf %407, %403 : vector<1x256xf32>
    %409 = arith.addf %399, %408 : vector<1x256xf32>
    %410 = vector.broadcast %58 : f32 to vector<1x256xf32>
    %411 = arith.mulf %410, %403 : vector<1x256xf32>
    %412 = arith.addf %402, %411 : vector<1x256xf32>
    %c238_i32_40 = arith.constant 238 : i32
    %413 = tpu.dynamic_rotate %363 by %c238_i32_40 dim 1 : vector<1x256xf32>, i32 -> vector<1x256xf32>
    %414 = vector.broadcast %5 : f32 to vector<1x256xf32>
    %415 = arith.mulf %414, %413 : vector<1x256xf32>
    %416 = arith.addf %406, %415 : vector<1x256xf32>
    %417 = vector.broadcast %32 : f32 to vector<1x256xf32>
    %418 = arith.mulf %417, %413 : vector<1x256xf32>
    %419 = arith.addf %409, %418 : vector<1x256xf32>
    %420 = vector.broadcast %59 : f32 to vector<1x256xf32>
    %421 = arith.mulf %420, %413 : vector<1x256xf32>
    %422 = arith.addf %412, %421 : vector<1x256xf32>
    %c224_i32_41 = arith.constant 224 : i32
    %423 = tpu.dynamic_rotate %363 by %c224_i32_41 dim 1 : vector<1x256xf32>, i32 -> vector<1x256xf32>
    %424 = vector.broadcast %6 : f32 to vector<1x256xf32>
    %425 = arith.mulf %424, %423 : vector<1x256xf32>
    %426 = arith.addf %416, %425 : vector<1x256xf32>
    %427 = vector.broadcast %33 : f32 to vector<1x256xf32>
    %428 = arith.mulf %427, %423 : vector<1x256xf32>
    %429 = arith.addf %419, %428 : vector<1x256xf32>
    %430 = vector.broadcast %60 : f32 to vector<1x256xf32>
    %431 = arith.mulf %430, %423 : vector<1x256xf32>
    %432 = arith.addf %422, %431 : vector<1x256xf32>
    %c223_i32_42 = arith.constant 223 : i32
    %433 = tpu.dynamic_rotate %363 by %c223_i32_42 dim 1 : vector<1x256xf32>, i32 -> vector<1x256xf32>
    %434 = vector.broadcast %7 : f32 to vector<1x256xf32>
    %435 = arith.mulf %434, %433 : vector<1x256xf32>
    %436 = arith.addf %426, %435 : vector<1x256xf32>
    %437 = vector.broadcast %34 : f32 to vector<1x256xf32>
    %438 = arith.mulf %437, %433 : vector<1x256xf32>
    %439 = arith.addf %429, %438 : vector<1x256xf32>
    %440 = vector.broadcast %61 : f32 to vector<1x256xf32>
    %441 = arith.mulf %440, %433 : vector<1x256xf32>
    %442 = arith.addf %432, %441 : vector<1x256xf32>
    %c222_i32_43 = arith.constant 222 : i32
    %443 = tpu.dynamic_rotate %363 by %c222_i32_43 dim 1 : vector<1x256xf32>, i32 -> vector<1x256xf32>
    %444 = vector.broadcast %8 : f32 to vector<1x256xf32>
    %445 = arith.mulf %444, %443 : vector<1x256xf32>
    %446 = arith.addf %436, %445 : vector<1x256xf32>
    %447 = vector.broadcast %35 : f32 to vector<1x256xf32>
    %448 = arith.mulf %447, %443 : vector<1x256xf32>
    %449 = arith.addf %439, %448 : vector<1x256xf32>
    %450 = vector.broadcast %62 : f32 to vector<1x256xf32>
    %451 = arith.mulf %450, %443 : vector<1x256xf32>
    %452 = arith.addf %442, %451 : vector<1x256xf32>
    %c1_44 = arith.constant 1 : index
    %c0_45 = arith.constant 0 : index
    %453 = vector.load %arg5[%c1_44, %c0_45] : memref<3x256xf32, #tpu.memory_space<vmem>>, vector<1x256xf32>
    %454 = vector.broadcast %9 : f32 to vector<1x256xf32>
    %455 = arith.mulf %454, %453 : vector<1x256xf32>
    %456 = arith.addf %446, %455 : vector<1x256xf32>
    %457 = vector.broadcast %36 : f32 to vector<1x256xf32>
    %458 = arith.mulf %457, %453 : vector<1x256xf32>
    %459 = arith.addf %449, %458 : vector<1x256xf32>
    %460 = vector.broadcast %63 : f32 to vector<1x256xf32>
    %461 = arith.mulf %460, %453 : vector<1x256xf32>
    %462 = arith.addf %452, %461 : vector<1x256xf32>
    %c255_i32_46 = arith.constant 255 : i32
    %463 = tpu.dynamic_rotate %453 by %c255_i32_46 dim 1 : vector<1x256xf32>, i32 -> vector<1x256xf32>
    %464 = vector.broadcast %10 : f32 to vector<1x256xf32>
    %465 = arith.mulf %464, %463 : vector<1x256xf32>
    %466 = arith.addf %456, %465 : vector<1x256xf32>
    %467 = vector.broadcast %37 : f32 to vector<1x256xf32>
    %468 = arith.mulf %467, %463 : vector<1x256xf32>
    %469 = arith.addf %459, %468 : vector<1x256xf32>
    %470 = vector.broadcast %64 : f32 to vector<1x256xf32>
    %471 = arith.mulf %470, %463 : vector<1x256xf32>
    %472 = arith.addf %462, %471 : vector<1x256xf32>
    %c254_i32_47 = arith.constant 254 : i32
    %473 = tpu.dynamic_rotate %453 by %c254_i32_47 dim 1 : vector<1x256xf32>, i32 -> vector<1x256xf32>
    %474 = vector.broadcast %11 : f32 to vector<1x256xf32>
    %475 = arith.mulf %474, %473 : vector<1x256xf32>
    %476 = arith.addf %466, %475 : vector<1x256xf32>
    %477 = vector.broadcast %38 : f32 to vector<1x256xf32>
    %478 = arith.mulf %477, %473 : vector<1x256xf32>
    %479 = arith.addf %469, %478 : vector<1x256xf32>
    %480 = vector.broadcast %65 : f32 to vector<1x256xf32>
    %481 = arith.mulf %480, %473 : vector<1x256xf32>
    %482 = arith.addf %472, %481 : vector<1x256xf32>
    %c240_i32_48 = arith.constant 240 : i32
    %483 = tpu.dynamic_rotate %453 by %c240_i32_48 dim 1 : vector<1x256xf32>, i32 -> vector<1x256xf32>
    %484 = vector.broadcast %12 : f32 to vector<1x256xf32>
    %485 = arith.mulf %484, %483 : vector<1x256xf32>
    %486 = arith.addf %476, %485 : vector<1x256xf32>
    %487 = vector.broadcast %39 : f32 to vector<1x256xf32>
    %488 = arith.mulf %487, %483 : vector<1x256xf32>
    %489 = arith.addf %479, %488 : vector<1x256xf32>
    %490 = vector.broadcast %66 : f32 to vector<1x256xf32>
    %491 = arith.mulf %490, %483 : vector<1x256xf32>
    %492 = arith.addf %482, %491 : vector<1x256xf32>
    %c239_i32_49 = arith.constant 239 : i32
    %493 = tpu.dynamic_rotate %453 by %c239_i32_49 dim 1 : vector<1x256xf32>, i32 -> vector<1x256xf32>
    %494 = vector.broadcast %13 : f32 to vector<1x256xf32>
    %495 = arith.mulf %494, %493 : vector<1x256xf32>
    %496 = arith.addf %486, %495 : vector<1x256xf32>
    %497 = vector.broadcast %40 : f32 to vector<1x256xf32>
    %498 = arith.mulf %497, %493 : vector<1x256xf32>
    %499 = arith.addf %489, %498 : vector<1x256xf32>
    %500 = vector.broadcast %67 : f32 to vector<1x256xf32>
    %501 = arith.mulf %500, %493 : vector<1x256xf32>
    %502 = arith.addf %492, %501 : vector<1x256xf32>
    %c238_i32_50 = arith.constant 238 : i32
    %503 = tpu.dynamic_rotate %453 by %c238_i32_50 dim 1 : vector<1x256xf32>, i32 -> vector<1x256xf32>
    %504 = vector.broadcast %14 : f32 to vector<1x256xf32>
    %505 = arith.mulf %504, %503 : vector<1x256xf32>
    %506 = arith.addf %496, %505 : vector<1x256xf32>
    %507 = vector.broadcast %41 : f32 to vector<1x256xf32>
    %508 = arith.mulf %507, %503 : vector<1x256xf32>
    %509 = arith.addf %499, %508 : vector<1x256xf32>
    %510 = vector.broadcast %68 : f32 to vector<1x256xf32>
    %511 = arith.mulf %510, %503 : vector<1x256xf32>
    %512 = arith.addf %502, %511 : vector<1x256xf32>
    %c224_i32_51 = arith.constant 224 : i32
    %513 = tpu.dynamic_rotate %453 by %c224_i32_51 dim 1 : vector<1x256xf32>, i32 -> vector<1x256xf32>
    %514 = vector.broadcast %15 : f32 to vector<1x256xf32>
    %515 = arith.mulf %514, %513 : vector<1x256xf32>
    %516 = arith.addf %506, %515 : vector<1x256xf32>
    %517 = vector.broadcast %42 : f32 to vector<1x256xf32>
    %518 = arith.mulf %517, %513 : vector<1x256xf32>
    %519 = arith.addf %509, %518 : vector<1x256xf32>
    %520 = vector.broadcast %69 : f32 to vector<1x256xf32>
    %521 = arith.mulf %520, %513 : vector<1x256xf32>
    %522 = arith.addf %512, %521 : vector<1x256xf32>
    %c223_i32_52 = arith.constant 223 : i32
    %523 = tpu.dynamic_rotate %453 by %c223_i32_52 dim 1 : vector<1x256xf32>, i32 -> vector<1x256xf32>
    %524 = vector.broadcast %16 : f32 to vector<1x256xf32>
    %525 = arith.mulf %524, %523 : vector<1x256xf32>
    %526 = arith.addf %516, %525 : vector<1x256xf32>
    %527 = vector.broadcast %43 : f32 to vector<1x256xf32>
    %528 = arith.mulf %527, %523 : vector<1x256xf32>
    %529 = arith.addf %519, %528 : vector<1x256xf32>
    %530 = vector.broadcast %70 : f32 to vector<1x256xf32>
    %531 = arith.mulf %530, %523 : vector<1x256xf32>
    %532 = arith.addf %522, %531 : vector<1x256xf32>
    %c222_i32_53 = arith.constant 222 : i32
    %533 = tpu.dynamic_rotate %453 by %c222_i32_53 dim 1 : vector<1x256xf32>, i32 -> vector<1x256xf32>
    %534 = vector.broadcast %17 : f32 to vector<1x256xf32>
    %535 = arith.mulf %534, %533 : vector<1x256xf32>
    %536 = arith.addf %526, %535 : vector<1x256xf32>
    %537 = vector.broadcast %44 : f32 to vector<1x256xf32>
    %538 = arith.mulf %537, %533 : vector<1x256xf32>
    %539 = arith.addf %529, %538 : vector<1x256xf32>
    %540 = vector.broadcast %71 : f32 to vector<1x256xf32>
    %541 = arith.mulf %540, %533 : vector<1x256xf32>
    %542 = arith.addf %532, %541 : vector<1x256xf32>
    %c2_54 = arith.constant 2 : index
    %c0_55 = arith.constant 0 : index
    %543 = vector.load %arg5[%c2_54, %c0_55] : memref<3x256xf32, #tpu.memory_space<vmem>>, vector<1x256xf32>
    %544 = vector.broadcast %18 : f32 to vector<1x256xf32>
    %545 = arith.mulf %544, %543 : vector<1x256xf32>
    %546 = arith.addf %536, %545 : vector<1x256xf32>
    %547 = vector.broadcast %45 : f32 to vector<1x256xf32>
    %548 = arith.mulf %547, %543 : vector<1x256xf32>
    %549 = arith.addf %539, %548 : vector<1x256xf32>
    %550 = vector.broadcast %72 : f32 to vector<1x256xf32>
    %551 = arith.mulf %550, %543 : vector<1x256xf32>
    %552 = arith.addf %542, %551 : vector<1x256xf32>
    %c255_i32_56 = arith.constant 255 : i32
    %553 = tpu.dynamic_rotate %543 by %c255_i32_56 dim 1 : vector<1x256xf32>, i32 -> vector<1x256xf32>
    %554 = vector.broadcast %19 : f32 to vector<1x256xf32>
    %555 = arith.mulf %554, %553 : vector<1x256xf32>
    %556 = arith.addf %546, %555 : vector<1x256xf32>
    %557 = vector.broadcast %46 : f32 to vector<1x256xf32>
    %558 = arith.mulf %557, %553 : vector<1x256xf32>
    %559 = arith.addf %549, %558 : vector<1x256xf32>
    %560 = vector.broadcast %73 : f32 to vector<1x256xf32>
    %561 = arith.mulf %560, %553 : vector<1x256xf32>
    %562 = arith.addf %552, %561 : vector<1x256xf32>
    %c254_i32_57 = arith.constant 254 : i32
    %563 = tpu.dynamic_rotate %543 by %c254_i32_57 dim 1 : vector<1x256xf32>, i32 -> vector<1x256xf32>
    %564 = vector.broadcast %20 : f32 to vector<1x256xf32>
    %565 = arith.mulf %564, %563 : vector<1x256xf32>
    %566 = arith.addf %556, %565 : vector<1x256xf32>
    %567 = vector.broadcast %47 : f32 to vector<1x256xf32>
    %568 = arith.mulf %567, %563 : vector<1x256xf32>
    %569 = arith.addf %559, %568 : vector<1x256xf32>
    %570 = vector.broadcast %74 : f32 to vector<1x256xf32>
    %571 = arith.mulf %570, %563 : vector<1x256xf32>
    %572 = arith.addf %562, %571 : vector<1x256xf32>
    %c240_i32_58 = arith.constant 240 : i32
    %573 = tpu.dynamic_rotate %543 by %c240_i32_58 dim 1 : vector<1x256xf32>, i32 -> vector<1x256xf32>
    %574 = vector.broadcast %21 : f32 to vector<1x256xf32>
    %575 = arith.mulf %574, %573 : vector<1x256xf32>
    %576 = arith.addf %566, %575 : vector<1x256xf32>
    %577 = vector.broadcast %48 : f32 to vector<1x256xf32>
    %578 = arith.mulf %577, %573 : vector<1x256xf32>
    %579 = arith.addf %569, %578 : vector<1x256xf32>
    %580 = vector.broadcast %75 : f32 to vector<1x256xf32>
    %581 = arith.mulf %580, %573 : vector<1x256xf32>
    %582 = arith.addf %572, %581 : vector<1x256xf32>
    %c239_i32_59 = arith.constant 239 : i32
    %583 = tpu.dynamic_rotate %543 by %c239_i32_59 dim 1 : vector<1x256xf32>, i32 -> vector<1x256xf32>
    %584 = vector.broadcast %22 : f32 to vector<1x256xf32>
    %585 = arith.mulf %584, %583 : vector<1x256xf32>
    %586 = arith.addf %576, %585 : vector<1x256xf32>
    %587 = vector.broadcast %49 : f32 to vector<1x256xf32>
    %588 = arith.mulf %587, %583 : vector<1x256xf32>
    %589 = arith.addf %579, %588 : vector<1x256xf32>
    %590 = vector.broadcast %76 : f32 to vector<1x256xf32>
    %591 = arith.mulf %590, %583 : vector<1x256xf32>
    %592 = arith.addf %582, %591 : vector<1x256xf32>
    %c238_i32_60 = arith.constant 238 : i32
    %593 = tpu.dynamic_rotate %543 by %c238_i32_60 dim 1 : vector<1x256xf32>, i32 -> vector<1x256xf32>
    %594 = vector.broadcast %23 : f32 to vector<1x256xf32>
    %595 = arith.mulf %594, %593 : vector<1x256xf32>
    %596 = arith.addf %586, %595 : vector<1x256xf32>
    %597 = vector.broadcast %50 : f32 to vector<1x256xf32>
    %598 = arith.mulf %597, %593 : vector<1x256xf32>
    %599 = arith.addf %589, %598 : vector<1x256xf32>
    %600 = vector.broadcast %77 : f32 to vector<1x256xf32>
    %601 = arith.mulf %600, %593 : vector<1x256xf32>
    %602 = arith.addf %592, %601 : vector<1x256xf32>
    %c224_i32_61 = arith.constant 224 : i32
    %603 = tpu.dynamic_rotate %543 by %c224_i32_61 dim 1 : vector<1x256xf32>, i32 -> vector<1x256xf32>
    %604 = vector.broadcast %24 : f32 to vector<1x256xf32>
    %605 = arith.mulf %604, %603 : vector<1x256xf32>
    %606 = arith.addf %596, %605 : vector<1x256xf32>
    %607 = vector.broadcast %51 : f32 to vector<1x256xf32>
    %608 = arith.mulf %607, %603 : vector<1x256xf32>
    %609 = arith.addf %599, %608 : vector<1x256xf32>
    %610 = vector.broadcast %78 : f32 to vector<1x256xf32>
    %611 = arith.mulf %610, %603 : vector<1x256xf32>
    %612 = arith.addf %602, %611 : vector<1x256xf32>
    %c223_i32_62 = arith.constant 223 : i32
    %613 = tpu.dynamic_rotate %543 by %c223_i32_62 dim 1 : vector<1x256xf32>, i32 -> vector<1x256xf32>
    %614 = vector.broadcast %25 : f32 to vector<1x256xf32>
    %615 = arith.mulf %614, %613 : vector<1x256xf32>
    %616 = arith.addf %606, %615 : vector<1x256xf32>
    %617 = vector.broadcast %52 : f32 to vector<1x256xf32>
    %618 = arith.mulf %617, %613 : vector<1x256xf32>
    %619 = arith.addf %609, %618 : vector<1x256xf32>
    %620 = vector.broadcast %79 : f32 to vector<1x256xf32>
    %621 = arith.mulf %620, %613 : vector<1x256xf32>
    %622 = arith.addf %612, %621 : vector<1x256xf32>
    %c222_i32_63 = arith.constant 222 : i32
    %623 = tpu.dynamic_rotate %543 by %c222_i32_63 dim 1 : vector<1x256xf32>, i32 -> vector<1x256xf32>
    %624 = vector.broadcast %26 : f32 to vector<1x256xf32>
    %625 = arith.mulf %624, %623 : vector<1x256xf32>
    %626 = arith.addf %616, %625 : vector<1x256xf32>
    %627 = vector.broadcast %53 : f32 to vector<1x256xf32>
    %628 = arith.mulf %627, %623 : vector<1x256xf32>
    %629 = arith.addf %619, %628 : vector<1x256xf32>
    %630 = vector.broadcast %80 : f32 to vector<1x256xf32>
    %631 = arith.mulf %630, %623 : vector<1x256xf32>
    %632 = arith.addf %622, %631 : vector<1x256xf32>
    %c0_64 = arith.constant 0 : index
    %c0_65 = arith.constant 0 : index
    %633 = vector.load %arg6[%c0_64, %c0_65] : memref<3x256xf32, #tpu.memory_space<vmem>>, vector<1x256xf32>
    tpu.vector_store %arg6[%c0_64, %c0_65], %626 {strides = array<i32>} : memref<3x256xf32, #tpu.memory_space<vmem>>, vector<1x256xf32>,
    %c1_66 = arith.constant 1 : index
    %c0_67 = arith.constant 0 : index
    %634 = vector.load %arg6[%c1_66, %c0_67] : memref<3x256xf32, #tpu.memory_space<vmem>>, vector<1x256xf32>
    tpu.vector_store %arg6[%c1_66, %c0_67], %629 {strides = array<i32>} : memref<3x256xf32, #tpu.memory_space<vmem>>, vector<1x256xf32>,
    %c2_68 = arith.constant 2 : index
    %c0_69 = arith.constant 0 : index
    %635 = vector.load %arg6[%c2_68, %c0_69] : memref<3x256xf32, #tpu.memory_space<vmem>>, vector<1x256xf32>
    tpu.vector_store %arg6[%c2_68, %c0_69], %632 {strides = array<i32>} : memref<3x256xf32, #tpu.memory_space<vmem>>, vector<1x256xf32>,
    %c0_70 = arith.constant 0 : index
    %c0_71 = arith.constant 0 : index
    %636 = vector.load %arg6[%c0_70, %c0_71] : memref<3x256xf32, #tpu.memory_space<vmem>>, vector<1x256xf32>
    %637 = vector.broadcast %0 : f32 to vector<1x256xf32>
    %638 = arith.mulf %637, %636 : vector<1x256xf32>
    %639 = arith.addf %82, %638 : vector<1x256xf32>
    %640 = vector.broadcast %27 : f32 to vector<1x256xf32>
    %641 = arith.mulf %640, %636 : vector<1x256xf32>
    %642 = arith.addf %84, %641 : vector<1x256xf32>
    %643 = vector.broadcast %54 : f32 to vector<1x256xf32>
    %644 = arith.mulf %643, %636 : vector<1x256xf32>
    %645 = arith.addf %86, %644 : vector<1x256xf32>
    %c255_i32_72 = arith.constant 255 : i32
    %646 = tpu.dynamic_rotate %636 by %c255_i32_72 dim 1 : vector<1x256xf32>, i32 -> vector<1x256xf32>
    %647 = vector.broadcast %1 : f32 to vector<1x256xf32>
    %648 = arith.mulf %647, %646 : vector<1x256xf32>
    %649 = arith.addf %639, %648 : vector<1x256xf32>
    %650 = vector.broadcast %28 : f32 to vector<1x256xf32>
    %651 = arith.mulf %650, %646 : vector<1x256xf32>
    %652 = arith.addf %642, %651 : vector<1x256xf32>
    %653 = vector.broadcast %55 : f32 to vector<1x256xf32>
    %654 = arith.mulf %653, %646 : vector<1x256xf32>
    %655 = arith.addf %645, %654 : vector<1x256xf32>
    %c254_i32_73 = arith.constant 254 : i32
    %656 = tpu.dynamic_rotate %636 by %c254_i32_73 dim 1 : vector<1x256xf32>, i32 -> vector<1x256xf32>
    %657 = vector.broadcast %2 : f32 to vector<1x256xf32>
    %658 = arith.mulf %657, %656 : vector<1x256xf32>
    %659 = arith.addf %649, %658 : vector<1x256xf32>
    %660 = vector.broadcast %29 : f32 to vector<1x256xf32>
    %661 = arith.mulf %660, %656 : vector<1x256xf32>
    %662 = arith.addf %652, %661 : vector<1x256xf32>
    %663 = vector.broadcast %56 : f32 to vector<1x256xf32>
    %664 = arith.mulf %663, %656 : vector<1x256xf32>
    %665 = arith.addf %655, %664 : vector<1x256xf32>
    %c240_i32_74 = arith.constant 240 : i32
    %666 = tpu.dynamic_rotate %636 by %c240_i32_74 dim 1 : vector<1x256xf32>, i32 -> vector<1x256xf32>
    %667 = vector.broadcast %3 : f32 to vector<1x256xf32>
    %668 = arith.mulf %667, %666 : vector<1x256xf32>
    %669 = arith.addf %659, %668 : vector<1x256xf32>
    %670 = vector.broadcast %30 : f32 to vector<1x256xf32>
    %671 = arith.mulf %670, %666 : vector<1x256xf32>
    %672 = arith.addf %662, %671 : vector<1x256xf32>
    %673 = vector.broadcast %57 : f32 to vector<1x256xf32>
    %674 = arith.mulf %673, %666 : vector<1x256xf32>
    %675 = arith.addf %665, %674 : vector<1x256xf32>
    %c239_i32_75 = arith.constant 239 : i32
    %676 = tpu.dynamic_rotate %636 by %c239_i32_75 dim 1 : vector<1x256xf32>, i32 -> vector<1x256xf32>
    %677 = vector.broadcast %4 : f32 to vector<1x256xf32>
    %678 = arith.mulf %677, %676 : vector<1x256xf32>
    %679 = arith.addf %669, %678 : vector<1x256xf32>
    %680 = vector.broadcast %31 : f32 to vector<1x256xf32>
    %681 = arith.mulf %680, %676 : vector<1x256xf32>
    %682 = arith.addf %672, %681 : vector<1x256xf32>
    %683 = vector.broadcast %58 : f32 to vector<1x256xf32>
    %684 = arith.mulf %683, %676 : vector<1x256xf32>
    %685 = arith.addf %675, %684 : vector<1x256xf32>
    %c238_i32_76 = arith.constant 238 : i32
    %686 = tpu.dynamic_rotate %636 by %c238_i32_76 dim 1 : vector<1x256xf32>, i32 -> vector<1x256xf32>
    %687 = vector.broadcast %5 : f32 to vector<1x256xf32>
    %688 = arith.mulf %687, %686 : vector<1x256xf32>
    %689 = arith.addf %679, %688 : vector<1x256xf32>
    %690 = vector.broadcast %32 : f32 to vector<1x256xf32>
    %691 = arith.mulf %690, %686 : vector<1x256xf32>
    %692 = arith.addf %682, %691 : vector<1x256xf32>
    %693 = vector.broadcast %59 : f32 to vector<1x256xf32>
    %694 = arith.mulf %693, %686 : vector<1x256xf32>
    %695 = arith.addf %685, %694 : vector<1x256xf32>
    %c224_i32_77 = arith.constant 224 : i32
    %696 = tpu.dynamic_rotate %636 by %c224_i32_77 dim 1 : vector<1x256xf32>, i32 -> vector<1x256xf32>
    %697 = vector.broadcast %6 : f32 to vector<1x256xf32>
    %698 = arith.mulf %697, %696 : vector<1x256xf32>
    %699 = arith.addf %689, %698 : vector<1x256xf32>
    %700 = vector.broadcast %33 : f32 to vector<1x256xf32>
    %701 = arith.mulf %700, %696 : vector<1x256xf32>
    %702 = arith.addf %692, %701 : vector<1x256xf32>
    %703 = vector.broadcast %60 : f32 to vector<1x256xf32>
    %704 = arith.mulf %703, %696 : vector<1x256xf32>
    %705 = arith.addf %695, %704 : vector<1x256xf32>
    %c223_i32_78 = arith.constant 223 : i32
    %706 = tpu.dynamic_rotate %636 by %c223_i32_78 dim 1 : vector<1x256xf32>, i32 -> vector<1x256xf32>
    %707 = vector.broadcast %7 : f32 to vector<1x256xf32>
    %708 = arith.mulf %707, %706 : vector<1x256xf32>
    %709 = arith.addf %699, %708 : vector<1x256xf32>
    %710 = vector.broadcast %34 : f32 to vector<1x256xf32>
    %711 = arith.mulf %710, %706 : vector<1x256xf32>
    %712 = arith.addf %702, %711 : vector<1x256xf32>
    %713 = vector.broadcast %61 : f32 to vector<1x256xf32>
    %714 = arith.mulf %713, %706 : vector<1x256xf32>
    %715 = arith.addf %705, %714 : vector<1x256xf32>
    %c222_i32_79 = arith.constant 222 : i32
    %716 = tpu.dynamic_rotate %636 by %c222_i32_79 dim 1 : vector<1x256xf32>, i32 -> vector<1x256xf32>
    %717 = vector.broadcast %8 : f32 to vector<1x256xf32>
    %718 = arith.mulf %717, %716 : vector<1x256xf32>
    %719 = arith.addf %709, %718 : vector<1x256xf32>
    %720 = vector.broadcast %35 : f32 to vector<1x256xf32>
    %721 = arith.mulf %720, %716 : vector<1x256xf32>
    %722 = arith.addf %712, %721 : vector<1x256xf32>
    %723 = vector.broadcast %62 : f32 to vector<1x256xf32>
    %724 = arith.mulf %723, %716 : vector<1x256xf32>
    %725 = arith.addf %715, %724 : vector<1x256xf32>
    %c1_80 = arith.constant 1 : index
    %c0_81 = arith.constant 0 : index
    %726 = vector.load %arg6[%c1_80, %c0_81] : memref<3x256xf32, #tpu.memory_space<vmem>>, vector<1x256xf32>
    %727 = vector.broadcast %9 : f32 to vector<1x256xf32>
    %728 = arith.mulf %727, %726 : vector<1x256xf32>
    %729 = arith.addf %719, %728 : vector<1x256xf32>
    %730 = vector.broadcast %36 : f32 to vector<1x256xf32>
    %731 = arith.mulf %730, %726 : vector<1x256xf32>
    %732 = arith.addf %722, %731 : vector<1x256xf32>
    %733 = vector.broadcast %63 : f32 to vector<1x256xf32>
    %734 = arith.mulf %733, %726 : vector<1x256xf32>
    %735 = arith.addf %725, %734 : vector<1x256xf32>
    %c255_i32_82 = arith.constant 255 : i32
    %736 = tpu.dynamic_rotate %726 by %c255_i32_82 dim 1 : vector<1x256xf32>, i32 -> vector<1x256xf32>
    %737 = vector.broadcast %10 : f32 to vector<1x256xf32>
    %738 = arith.mulf %737, %736 : vector<1x256xf32>
    %739 = arith.addf %729, %738 : vector<1x256xf32>
    %740 = vector.broadcast %37 : f32 to vector<1x256xf32>
    %741 = arith.mulf %740, %736 : vector<1x256xf32>
    %742 = arith.addf %732, %741 : vector<1x256xf32>
    %743 = vector.broadcast %64 : f32 to vector<1x256xf32>
    %744 = arith.mulf %743, %736 : vector<1x256xf32>
    %745 = arith.addf %735, %744 : vector<1x256xf32>
    %c254_i32_83 = arith.constant 254 : i32
    %746 = tpu.dynamic_rotate %726 by %c254_i32_83 dim 1 : vector<1x256xf32>, i32 -> vector<1x256xf32>
    %747 = vector.broadcast %11 : f32 to vector<1x256xf32>
    %748 = arith.mulf %747, %746 : vector<1x256xf32>
    %749 = arith.addf %739, %748 : vector<1x256xf32>
    %750 = vector.broadcast %38 : f32 to vector<1x256xf32>
    %751 = arith.mulf %750, %746 : vector<1x256xf32>
    %752 = arith.addf %742, %751 : vector<1x256xf32>
    %753 = vector.broadcast %65 : f32 to vector<1x256xf32>
    %754 = arith.mulf %753, %746 : vector<1x256xf32>
    %755 = arith.addf %745, %754 : vector<1x256xf32>
    %c240_i32_84 = arith.constant 240 : i32
    %756 = tpu.dynamic_rotate %726 by %c240_i32_84 dim 1 : vector<1x256xf32>, i32 -> vector<1x256xf32>
    %757 = vector.broadcast %12 : f32 to vector<1x256xf32>
    %758 = arith.mulf %757, %756 : vector<1x256xf32>
    %759 = arith.addf %749, %758 : vector<1x256xf32>
    %760 = vector.broadcast %39 : f32 to vector<1x256xf32>
    %761 = arith.mulf %760, %756 : vector<1x256xf32>
    %762 = arith.addf %752, %761 : vector<1x256xf32>
    %763 = vector.broadcast %66 : f32 to vector<1x256xf32>
    %764 = arith.mulf %763, %756 : vector<1x256xf32>
    %765 = arith.addf %755, %764 : vector<1x256xf32>
    %c239_i32_85 = arith.constant 239 : i32
    %766 = tpu.dynamic_rotate %726 by %c239_i32_85 dim 1 : vector<1x256xf32>, i32 -> vector<1x256xf32>
    %767 = vector.broadcast %13 : f32 to vector<1x256xf32>
    %768 = arith.mulf %767, %766 : vector<1x256xf32>
    %769 = arith.addf %759, %768 : vector<1x256xf32>
    %770 = vector.broadcast %40 : f32 to vector<1x256xf32>
    %771 = arith.mulf %770, %766 : vector<1x256xf32>
    %772 = arith.addf %762, %771 : vector<1x256xf32>
    %773 = vector.broadcast %67 : f32 to vector<1x256xf32>
    %774 = arith.mulf %773, %766 : vector<1x256xf32>
    %775 = arith.addf %765, %774 : vector<1x256xf32>
    %c238_i32_86 = arith.constant 238 : i32
    %776 = tpu.dynamic_rotate %726 by %c238_i32_86 dim 1 : vector<1x256xf32>, i32 -> vector<1x256xf32>
    %777 = vector.broadcast %14 : f32 to vector<1x256xf32>
    %778 = arith.mulf %777, %776 : vector<1x256xf32>
    %779 = arith.addf %769, %778 : vector<1x256xf32>
    %780 = vector.broadcast %41 : f32 to vector<1x256xf32>
    %781 = arith.mulf %780, %776 : vector<1x256xf32>
    %782 = arith.addf %772, %781 : vector<1x256xf32>
    %783 = vector.broadcast %68 : f32 to vector<1x256xf32>
    %784 = arith.mulf %783, %776 : vector<1x256xf32>
    %785 = arith.addf %775, %784 : vector<1x256xf32>
    %c224_i32_87 = arith.constant 224 : i32
    %786 = tpu.dynamic_rotate %726 by %c224_i32_87 dim 1 : vector<1x256xf32>, i32 -> vector<1x256xf32>
    %787 = vector.broadcast %15 : f32 to vector<1x256xf32>
    %788 = arith.mulf %787, %786 : vector<1x256xf32>
    %789 = arith.addf %779, %788 : vector<1x256xf32>
    %790 = vector.broadcast %42 : f32 to vector<1x256xf32>
    %791 = arith.mulf %790, %786 : vector<1x256xf32>
    %792 = arith.addf %782, %791 : vector<1x256xf32>
    %793 = vector.broadcast %69 : f32 to vector<1x256xf32>
    %794 = arith.mulf %793, %786 : vector<1x256xf32>
    %795 = arith.addf %785, %794 : vector<1x256xf32>
    %c223_i32_88 = arith.constant 223 : i32
    %796 = tpu.dynamic_rotate %726 by %c223_i32_88 dim 1 : vector<1x256xf32>, i32 -> vector<1x256xf32>
    %797 = vector.broadcast %16 : f32 to vector<1x256xf32>
    %798 = arith.mulf %797, %796 : vector<1x256xf32>
    %799 = arith.addf %789, %798 : vector<1x256xf32>
    %800 = vector.broadcast %43 : f32 to vector<1x256xf32>
    %801 = arith.mulf %800, %796 : vector<1x256xf32>
    %802 = arith.addf %792, %801 : vector<1x256xf32>
    %803 = vector.broadcast %70 : f32 to vector<1x256xf32>
    %804 = arith.mulf %803, %796 : vector<1x256xf32>
    %805 = arith.addf %795, %804 : vector<1x256xf32>
    %c222_i32_89 = arith.constant 222 : i32
    %806 = tpu.dynamic_rotate %726 by %c222_i32_89 dim 1 : vector<1x256xf32>, i32 -> vector<1x256xf32>
    %807 = vector.broadcast %17 : f32 to vector<1x256xf32>
    %808 = arith.mulf %807, %806 : vector<1x256xf32>
    %809 = arith.addf %799, %808 : vector<1x256xf32>
    %810 = vector.broadcast %44 : f32 to vector<1x256xf32>
    %811 = arith.mulf %810, %806 : vector<1x256xf32>
    %812 = arith.addf %802, %811 : vector<1x256xf32>
    %813 = vector.broadcast %71 : f32 to vector<1x256xf32>
    %814 = arith.mulf %813, %806 : vector<1x256xf32>
    %815 = arith.addf %805, %814 : vector<1x256xf32>
    %c2_90 = arith.constant 2 : index
    %c0_91 = arith.constant 0 : index
    %816 = vector.load %arg6[%c2_90, %c0_91] : memref<3x256xf32, #tpu.memory_space<vmem>>, vector<1x256xf32>
    %817 = vector.broadcast %18 : f32 to vector<1x256xf32>
    %818 = arith.mulf %817, %816 : vector<1x256xf32>
    %819 = arith.addf %809, %818 : vector<1x256xf32>
    %820 = vector.broadcast %45 : f32 to vector<1x256xf32>
    %821 = arith.mulf %820, %816 : vector<1x256xf32>
    %822 = arith.addf %812, %821 : vector<1x256xf32>
    %823 = vector.broadcast %72 : f32 to vector<1x256xf32>
    %824 = arith.mulf %823, %816 : vector<1x256xf32>
    %825 = arith.addf %815, %824 : vector<1x256xf32>
    %c255_i32_92 = arith.constant 255 : i32
    %826 = tpu.dynamic_rotate %816 by %c255_i32_92 dim 1 : vector<1x256xf32>, i32 -> vector<1x256xf32>
    %827 = vector.broadcast %19 : f32 to vector<1x256xf32>
    %828 = arith.mulf %827, %826 : vector<1x256xf32>
    %829 = arith.addf %819, %828 : vector<1x256xf32>
    %830 = vector.broadcast %46 : f32 to vector<1x256xf32>
    %831 = arith.mulf %830, %826 : vector<1x256xf32>
    %832 = arith.addf %822, %831 : vector<1x256xf32>
    %833 = vector.broadcast %73 : f32 to vector<1x256xf32>
    %834 = arith.mulf %833, %826 : vector<1x256xf32>
    %835 = arith.addf %825, %834 : vector<1x256xf32>
    %c254_i32_93 = arith.constant 254 : i32
    %836 = tpu.dynamic_rotate %816 by %c254_i32_93 dim 1 : vector<1x256xf32>, i32 -> vector<1x256xf32>
    %837 = vector.broadcast %20 : f32 to vector<1x256xf32>
    %838 = arith.mulf %837, %836 : vector<1x256xf32>
    %839 = arith.addf %829, %838 : vector<1x256xf32>
    %840 = vector.broadcast %47 : f32 to vector<1x256xf32>
    %841 = arith.mulf %840, %836 : vector<1x256xf32>
    %842 = arith.addf %832, %841 : vector<1x256xf32>
    %843 = vector.broadcast %74 : f32 to vector<1x256xf32>
    %844 = arith.mulf %843, %836 : vector<1x256xf32>
    %845 = arith.addf %835, %844 : vector<1x256xf32>
    %c240_i32_94 = arith.constant 240 : i32
    %846 = tpu.dynamic_rotate %816 by %c240_i32_94 dim 1 : vector<1x256xf32>, i32 -> vector<1x256xf32>
    %847 = vector.broadcast %21 : f32 to vector<1x256xf32>
    %848 = arith.mulf %847, %846 : vector<1x256xf32>
    %849 = arith.addf %839, %848 : vector<1x256xf32>
    %850 = vector.broadcast %48 : f32 to vector<1x256xf32>
    %851 = arith.mulf %850, %846 : vector<1x256xf32>
    %852 = arith.addf %842, %851 : vector<1x256xf32>
    %853 = vector.broadcast %75 : f32 to vector<1x256xf32>
    %854 = arith.mulf %853, %846 : vector<1x256xf32>
    %855 = arith.addf %845, %854 : vector<1x256xf32>
    %c239_i32_95 = arith.constant 239 : i32
    %856 = tpu.dynamic_rotate %816 by %c239_i32_95 dim 1 : vector<1x256xf32>, i32 -> vector<1x256xf32>
    %857 = vector.broadcast %22 : f32 to vector<1x256xf32>
    %858 = arith.mulf %857, %856 : vector<1x256xf32>
    %859 = arith.addf %849, %858 : vector<1x256xf32>
    %860 = vector.broadcast %49 : f32 to vector<1x256xf32>
    %861 = arith.mulf %860, %856 : vector<1x256xf32>
    %862 = arith.addf %852, %861 : vector<1x256xf32>
    %863 = vector.broadcast %76 : f32 to vector<1x256xf32>
    %864 = arith.mulf %863, %856 : vector<1x256xf32>
    %865 = arith.addf %855, %864 : vector<1x256xf32>
    %c238_i32_96 = arith.constant 238 : i32
    %866 = tpu.dynamic_rotate %816 by %c238_i32_96 dim 1 : vector<1x256xf32>, i32 -> vector<1x256xf32>
    %867 = vector.broadcast %23 : f32 to vector<1x256xf32>
    %868 = arith.mulf %867, %866 : vector<1x256xf32>
    %869 = arith.addf %859, %868 : vector<1x256xf32>
    %870 = vector.broadcast %50 : f32 to vector<1x256xf32>
    %871 = arith.mulf %870, %866 : vector<1x256xf32>
    %872 = arith.addf %862, %871 : vector<1x256xf32>
    %873 = vector.broadcast %77 : f32 to vector<1x256xf32>
    %874 = arith.mulf %873, %866 : vector<1x256xf32>
    %875 = arith.addf %865, %874 : vector<1x256xf32>
    %c224_i32_97 = arith.constant 224 : i32
    %876 = tpu.dynamic_rotate %816 by %c224_i32_97 dim 1 : vector<1x256xf32>, i32 -> vector<1x256xf32>
    %877 = vector.broadcast %24 : f32 to vector<1x256xf32>
    %878 = arith.mulf %877, %876 : vector<1x256xf32>
    %879 = arith.addf %869, %878 : vector<1x256xf32>
    %880 = vector.broadcast %51 : f32 to vector<1x256xf32>
    %881 = arith.mulf %880, %876 : vector<1x256xf32>
    %882 = arith.addf %872, %881 : vector<1x256xf32>
    %883 = vector.broadcast %78 : f32 to vector<1x256xf32>
    %884 = arith.mulf %883, %876 : vector<1x256xf32>
    %885 = arith.addf %875, %884 : vector<1x256xf32>
    %c223_i32_98 = arith.constant 223 : i32
    %886 = tpu.dynamic_rotate %816 by %c223_i32_98 dim 1 : vector<1x256xf32>, i32 -> vector<1x256xf32>
    %887 = vector.broadcast %25 : f32 to vector<1x256xf32>
    %888 = arith.mulf %887, %886 : vector<1x256xf32>
    %889 = arith.addf %879, %888 : vector<1x256xf32>
    %890 = vector.broadcast %52 : f32 to vector<1x256xf32>
    %891 = arith.mulf %890, %886 : vector<1x256xf32>
    %892 = arith.addf %882, %891 : vector<1x256xf32>
    %893 = vector.broadcast %79 : f32 to vector<1x256xf32>
    %894 = arith.mulf %893, %886 : vector<1x256xf32>
    %895 = arith.addf %885, %894 : vector<1x256xf32>
    %c222_i32_99 = arith.constant 222 : i32
    %896 = tpu.dynamic_rotate %816 by %c222_i32_99 dim 1 : vector<1x256xf32>, i32 -> vector<1x256xf32>
    %897 = vector.broadcast %26 : f32 to vector<1x256xf32>
    %898 = arith.mulf %897, %896 : vector<1x256xf32>
    %899 = arith.addf %889, %898 : vector<1x256xf32>
    %900 = vector.broadcast %53 : f32 to vector<1x256xf32>
    %901 = arith.mulf %900, %896 : vector<1x256xf32>
    %902 = arith.addf %892, %901 : vector<1x256xf32>
    %903 = vector.broadcast %80 : f32 to vector<1x256xf32>
    %904 = arith.mulf %903, %896 : vector<1x256xf32>
    %905 = arith.addf %895, %904 : vector<1x256xf32>
    %c0_100 = arith.constant 0 : index
    %c0_101 = arith.constant 0 : index
    %c0_102 = arith.constant 0 : index
    %906 = vector.load %arg4[%c0_100, %c0_101, %c0_102] : memref<1x3x256xf32, #tpu.memory_space<vmem>>, vector<1x1x256xf32>
    %907 = vector.shape_cast %906 : vector<1x1x256xf32> to vector<1x256xf32>
    %908 = vector.shape_cast %899 : vector<1x256xf32> to vector<1x1x256xf32>
    tpu.vector_store %arg4[%c0_100, %c0_101, %c0_102], %908 {strides = array<i32>} : memref<1x3x256xf32, #tpu.memory_space<vmem>>, vector<1x1x256xf32>,
    %c0_103 = arith.constant 0 : index
    %c1_104 = arith.constant 1 : index
    %c0_105 = arith.constant 0 : index
    %909 = vector.load %arg4[%c0_103, %c1_104, %c0_105] : memref<1x3x256xf32, #tpu.memory_space<vmem>>, vector<1x1x256xf32>
    %910 = vector.shape_cast %909 : vector<1x1x256xf32> to vector<1x256xf32>
    %911 = vector.shape_cast %902 : vector<1x256xf32> to vector<1x1x256xf32>
    tpu.vector_store %arg4[%c0_103, %c1_104, %c0_105], %911 {strides = array<i32>} : memref<1x3x256xf32, #tpu.memory_space<vmem>>, vector<1x1x256xf32>,
    %c0_106 = arith.constant 0 : index
    %c2_107 = arith.constant 2 : index
    %c0_108 = arith.constant 0 : index
    %912 = vector.load %arg4[%c0_106, %c2_107, %c0_108] : memref<1x3x256xf32, #tpu.memory_space<vmem>>, vector<1x1x256xf32>
    %913 = vector.shape_cast %912 : vector<1x1x256xf32> to vector<1x256xf32>
    %914 = vector.shape_cast %905 : vector<1x256xf32> to vector<1x1x256xf32>
    tpu.vector_store %arg4[%c0_106, %c2_107, %c0_108], %914 {strides = array<i32>} : memref<1x3x256xf32, #tpu.memory_space<vmem>>, vector<1x1x256xf32>,
    return
  }
  func.func @transform_0(%arg0: i32) -> (i32, i32, i32) {
    %c0_i32 = arith.constant 0 : i32
    %c0_i32_0 = arith.constant 0 : i32
    %c0_i32_1 = arith.constant 0 : i32
    return %arg0, %c0_i32, %c0_i32_0 : i32, i32, i32
  }
  func.func @transform_1(%arg0: i32) -> i32 {
    %c0_i32 = arith.constant 0 : i32
    %c0_i32_0 = arith.constant 0 : i32
    return %c0_i32 : i32
  }
  func.func @transform_2(%arg0: i32) -> i32 {
    %c0_i32 = arith.constant 0 : i32
    %c0_i32_0 = arith.constant 0 : i32
    return %c0_i32 : i32
  }
  func.func @transform_3(%arg0: i32) -> (i32, i32, i32) {
    %c0_i32 = arith.constant 0 : i32
    %c0_i32_0 = arith.constant 0 : i32
    %c0_i32_1 = arith.constant 0 : i32
    return %arg0, %c0_i32, %c0_i32_0 : i32, i32, i32
  }
}

</mosaic_0001>

<bundles_post_ra>
// kernel: tpu_custom_call.1
= control target key start
LH: loop header
LB: loop body
LE: loop exit
PB: predicated region body
PF: predicated region fallthrough
CT: control target
= control target key end

     0   :  { %8 = vsyncpa [#allocation5], 0  ;;  %s4784_s0 = inlined_call_operand.vmem [shape: f32[2,3,256], index: 0, kind: input, shape index: {}]   ;;  %s4785_s1 = inlined_call_operand.vmem [shape: f32[81], index: 1, kind: input, shape index: {}]   ;;  %s4786_s2 = inlined_call_operand.vmem [shape: f32[3], index: 2, kind: input, shape index: {}]   ;;  %s4787_s3 = inlined_call_operand.vmem [shape: f32[2,3,256], index: 3, kind: output, shape index: {}]  }
   0x1   :  { %9 = vsyncpa [#allocation7], 0  ;;  %s2959_s12 = smov 0  }
   0x2 LB: > { %s2743_s13 = sadd.s32 4294967295, %s2927_s12   ;;  %p2745_p0 = scmp.ge.s32.totalorder %s2927_s12, 1  ;;  %s2927_s12 = sphi %s2959_s12, %s15_s12  }
   0x3   : > { %p114_p1 = scmp.lt.s32.totalorder %s2927_s12, 3  ;;  %s126_s16 = sshll.u32 %s4785_s1, 4  ;;  %s127_s16 = int_to_ptr.vmem [resolvable:$true] %s126_s16 }
   0x4   : > { %p2861_p3 = scmp.eq.s32.totalorder %s2743_s13, 0  ;;  %s136_s19 = sshll.u32 %s4786_s2, 4  ;;  %s137_s19 = int_to_ptr.vmem [resolvable:$true] %s136_s19 }
   0x5   : > { %p115_p2 = pnand %p2745_p0, %p114_p1  ;;  %s2929_s20 = smov [#allocation4]  }
   0x6   : > { %s2930_s21 = smov [#allocation6]  }
   0x7   : > { %p2854_p4 = pneg %p115_p2 }
   0x8   : > { %157 = sbr.rel (%p115_p2) target bundleno = 789 (0x315), region = 32 }
   0x9   : > { %p2855_p5 = pnand %p2861_p3, %p2854_p4 }
   0xb   : > { %2857 = dma.vmem_to_smem (!%p2855_p5), %s127_s16, 16, %s2929_s20, [#allocation5]  }
   0xc   : > { %2860 = dma.vmem_to_smem (!%p2855_p5), %s137_s19, 16, %s2930_s21, [#allocation7]  }
   0xd   : > { %2918 = dma.done.wait (%p2861_p3), [#allocation5], 16  }
   0xe   : > { %2920 = vsyncadd (%p2861_p3), [#allocation5], 4294967280 }
   0xf   : > { %2922 = dma.done.wait (%p2861_p3), [#allocation7], 16  }
  0x10   : > { %2924 = vsyncadd (%p2861_p3), [#allocation7], 4294967280 }
  0x11   : > { %169 = sfence }
  0x12   : > { %p188_p6 = scmp.lt.s32.totalorder %s2743_s13, 1  ;;  %s2931_s26 = smov 126   ;;  %v4788_v9 = vlaneseq  ;;  %vm315_vm1 = vcmask 1040384  }
  0x13   : > { %s2932_s27 = smov 127   ;;  %s2933_s28 = smov 112  }
  0x14   : > { %s5125_s13 = smov (!%p188_p6, %s2743_s13), 1  ;;  %s2934_s29 = smov 111   ;;  %v3048_v11 = vand.u32 127, %v4788_v9 }
  0x15   : > { %s2844_s22 = sshll.u32 %s5125_s13, 3  ;;  %s2935_s30 = smov 110  }
  0x16   : > { %s2986_s25 = scalar_lea.vmem %s4784_s0, %s2844_s22  ;;  %s2936_s4 = smov 96   ;;  %vm375_vm0 = vcmp.lt.s32.totalorder %v3048_v11, 112  ;;  %vm341_vm2 = vcmp.lt.s32.totalorder %v3048_v11, 126  ;;  %vm306_vm3 = vcmp.lt.s32.totalorder %v3048_v11, 127  ;;  %vm409_vm4 = vcmp.lt.s32.totalorder %v3048_v11, 111 }
  0x17   : > { %v2989_v0 = vld [vmem:[%s2986_s25] ss:$4 sm:$0x3]  ;;  %s2937_s5 = smov 95   ;;  %s2938_s6 = smov 94   ;;  %vm443_vm5 = vcmp.lt.s32.totalorder %v3048_v11, 110 }
  0x18   : > { %v296_v1 = vperm.slane %v2989_v0, 0  ;;  %v297_v2 = vperm.slane %v2989_v0, 1  ;;  %v3008_v3 = vld [vmem:[%s2986_s25 + $0x1] ss:$4 sm:$0x3]  ;;  %s2758_s7 = sld [smem:[#allocation4 + $0x3]] }
  0x19   : > { %v587_v4 = vperm.slane %v3008_v3, 0  ;;  %v588_v5 = vperm.slane %v3008_v3, 1  ;;  %v3029_v6 = vld [vmem:[%s2986_s25 + $0x2] ss:$4 sm:$0x3]  ;;  %s2785_s8 = sld [smem:[#allocation4 + $0x1e]] }
  0x1a   : > { %337 = vrot.lane.b32.xlu1 %v296_v1, %s2931_s26  ;;  %300 = vrot.lane.b32.xlu0 %v296_v1, %s2932_s27  ;;  %v3032_v7 = vperm.slane %v3029_v6, 0  ;;  %v3039_v8 = vperm.slane %v3029_v6, 1  ;;  %s2812_s9 = sld [smem:[#allocation4 + $0x39]]  ;;  %vm477_vm6 = vcmp.lt.s32.totalorder %v3048_v11, 96  ;;  %vm511_vm7 = vcmp.lt.s32.totalorder %v3048_v11, 95 }
  0x1b   : > { %371 = vrot.lane.b32.xlu2 %v296_v1, %s2933_s28  ;;  %s3073_s10 = sld [smem:[#allocation4 + $0x2]]  ;;  %vm545_vm8 = vcmp.lt.s32.totalorder %v3048_v11, 94 }
  0x1c   : > { %s3079_s11 = sld [smem:[#allocation4 + $0x1d]] }
  0x1d   : > { %s198_s14 = sld [smem:[#allocation4]] }
  0x1e   : > { %v3057_v12 = vstv %s2758_s7  ;;  %s2782_s15 = sld [smem:[#allocation4 + $0x1b]] }
  0x1f   : > { %4952 = vst [vmem:[#allocation10_spill] sm:$0xff] %v3057_v12  ;;  %v3059_v13 = vstv %s2785_s8  ;;  %s2809_s16 = sld [smem:[#allocation4 + $0x36]] }
  0x20   : > { %4953 = vst [vmem:[#allocation11_spill] sm:$0xff] %v3059_v13  ;;  %v3061_v14 = vstv %s2812_s9  ;;  %s2811_s17 = sld [smem:[#allocation4 + $0x38]] }
  0x21   : > { %4954 = vst [vmem:[#allocation12_spill] sm:$0xff] %v3061_v14  ;;  %s279_s18 = sld [smem:[#allocation6]]  ;;  %v3128_v43 = vstv %s3073_s10 }
  0x22   : > { %339 = vrot.lane.b32.xlu1 %v297_v2, %s2931_s26  ;;  %302 = vrot.lane.b32.xlu0 %v297_v2, %s2932_s27  ;;  %s2836_s19 = sld [smem:[#allocation6 + $0x1]]  ;;  %4955 = vst [vmem:[#allocation13_spill] sm:$0xff] %v3128_v43  ;;  %v3131_v44 = vstv %s3079_s11 }
  0x23   : > { %373 = vrot.lane.b32.xlu2 %v297_v2, %s2933_s28  ;;  %s2837_s20 = sld [smem:[#allocation6 + $0x2]]  ;;  %v3100_v33 = vstv %s198_s14  ;;  %4956 = vst [vmem:[#allocation14_spill] sm:$0xff] %v3131_v44 }
  0x24   : > { %s2756_s21 = sld [smem:[#allocation4 + $0x1]]  ;;  %v3102_v34 = vstv %s2782_s15  ;;  %v287_v37 = vmul.f32 %v3100_v33, %v2989_v0 }
  0x25   : > { %s2783_s23 = sld [smem:[#allocation4 + $0x1c]]  ;;  %v3104_v35 = vstv %s2809_s16  ;;  %v290_v38 = vmul.f32 %v3102_v34, %v2989_v0 }
  0x26   : > { %s2810_s24 = sld [smem:[#allocation4 + $0x37]]  ;;  %v293_v39 = vmul.f32 %v3104_v35, %v2989_v0  ;;  %v3134_v45 = vstv %s2811_s17 }
  0x27   : > { %s3108_s25 = sld [smem:[#allocation4 + $0x4]]  ;;  %v3116_v40 = vstv %s279_s18  ;;  %4957 = vst [vmem:[#allocation15_spill] sm:$0xff] %v3134_v45 }
  0x28   : > { %v3118_v41 = vstv %s2836_s19  ;;  %s3140_s7 = sld [smem:[#allocation4 + $0x1f]]  ;;  %v288_v51 = vadd.f32 %v287_v37, %v3116_v40 }
  0x29   : > { %v3120_v42 = vstv %s2837_s20  ;;  %v291_v52 = vadd.f32 %v290_v38, %v3118_v41  ;;  %s3149_s8 = sld [smem:[#allocation4 + $0x3a]] }
  0x2a   : > { %407 = vrot.lane.b32.xlu1 %v297_v2, %s2934_s29  ;;  %405 = vrot.lane.b32.xlu0 %v296_v1, %s2934_s29  ;;  %v3136_v46 = vstv %s2756_s21  ;;  %v294_v53 = vadd.f32 %v293_v39, %v3120_v42  ;;  %s3175_s9 = sld [smem:[#allocation4 + $0x6]] }
  0x2b   : > { %439 = vrot.lane.b32.xlu2 %v296_v1, %s2935_s30  ;;  %v3138_v47 = vstv %s2783_s23  ;;  %s3180_s10 = sld [smem:[#allocation4 + $0x21]] }
  0x2c   : > { %v3144_v49 = vstv %s2810_s24  ;;  %s3185_s11 = sld [smem:[#allocation4 + $0x3c]] }
  0x2d   : > { %v3165_v61 = vstv %s3108_s25  ;;  %s3194_s14 = sld [smem:[#allocation4 + $0x5]] }
  0x2e   : > { %4958 = vst [vmem:[#allocation16_spill] sm:$0xff] %v3165_v61  ;;  %s3201_s15 = sld [smem:[#allocation4 + $0x20]] }
  0x2f   : > { %v3192_v37 = vstv %s3149_s8  ;;  %s3206_s16 = sld [smem:[#allocation4 + $0x3b]] }
  0x30   : > { %4960 = vst [vmem:[#allocation18_spill] sm:$0xff] %v3192_v37  ;;  %s3210_s17 = sld [smem:[#allocation4 + $0x7]] }
  0x31   : > { %s3214_s18 = sld [smem:[#allocation4 + $0x22]] }
  0x32   : > { %473 = vrot.lane.b32.xlu1 %v296_v1, %s2936_s4  ;;  %441 = vrot.lane.b32.xlu0 %v297_v2, %s2935_s30  ;;  %s3218_s19 = sld [smem:[#allocation4 + $0x3d]] }
  0x33   : > { %475 = vrot.lane.b32.xlu2 %v297_v2, %s2936_s4  ;;  %s3223_s20 = sld [smem:[#allocation4 + $0xa]] }
  0x34   : > { %s3226_s21 = sld [smem:[#allocation4 + $0x25]] }
  0x35   : > { %s3230_s23 = sld [smem:[#allocation4 + $0x40]] }
  0x36   : > { %s3235_s24 = sld [smem:[#allocation4 + $0x8]] }
  0x37   : > { %s3244_s25 = sld [smem:[#allocation4 + $0x9]] }
  0x38   : > { %s3267_s8 = sld [smem:[#allocation4 + $0x23]] }
  0x3a   : > { %509 = vrot.lane.b32.xlu1 %v297_v2, %s2937_s5  ;;  %507 = vrot.lane.b32.xlu0 %v296_v1, %s2937_s5 }
  0x3b   : > { %541 = vrot.lane.b32.xlu2 %v296_v1, %s2938_s6 }
  0x42   : > { %591 = vrot.lane.b32.xlu1 %v587_v4, %s2932_s27  ;;  %543 = vrot.lane.b32.xlu0 %v297_v2, %s2938_s6 }
  0x43   : > { %593 = vrot.lane.b32.xlu2 %v588_v5, %s2932_s27 }
  0x4a   : > { %626 = vrot.lane.b32.xlu1 %v588_v5, %s2931_s26  ;;  %624 = vrot.lane.b32.xlu0 %v587_v4, %s2931_s26 }
  0x4b   : > { %657 = vrot.lane.b32.xlu2 %v587_v4, %s2933_s28 }
  0x52   : > { %690 = vrot.lane.b32.xlu1 %v587_v4, %s2934_s29  ;;  %659 = vrot.lane.b32.xlu0 %v588_v5, %s2933_s28 }
  0x53   : > { %692 = vrot.lane.b32.xlu2 %v588_v5, %s2934_s29 }
  0x5a   : > { %725 = vrot.lane.b32.xlu1 %v588_v5, %s2935_s30  ;;  %723 = vrot.lane.b32.xlu0 %v587_v4, %s2935_s30 }
  0x5b   : > { %756 = vrot.lane.b32.xlu2 %v587_v4, %s2936_s4 }
  0x62   : > { %789 = vrot.lane.b32.xlu1 %v587_v4, %s2937_s5  ;;  %758 = vrot.lane.b32.xlu0 %v588_v5, %s2936_s4 }
  0x63   : > { %791 = vrot.lane.b32.xlu2 %v588_v5, %s2937_s5 }
  0x6a   : > { %824 = vrot.lane.b32.xlu1 %v588_v5, %s2938_s6  ;;  %822 = vrot.lane.b32.xlu0 %v587_v4, %s2938_s6 }
  0x6b   : > { %871 = vrot.lane.b32.xlu2 %v3032_v7, %s2932_s27 }
  0x72   : > { %904 = vrot.lane.b32.xlu1 %v3032_v7, %s2931_s26  ;;  %873 = vrot.lane.b32.xlu0 %v3039_v8, %s2932_s27 }
  0x73   : > { %906 = vrot.lane.b32.xlu2 %v3039_v8, %s2931_s26 }
  0x75   : > { %v372_v10 = vpop.permute.xlu2 %371 }
  0x7a   : > { %939 = vrot.lane.b32.xlu1 %v3039_v8, %s2933_s28  ;;  %937 = vrot.lane.b32.xlu0 %v3032_v7, %s2933_s28 }
  0x7b   : > { %970 = vrot.lane.b32.xlu2 %v3032_v7, %s2934_s29 }
  0x7d   : > { %v374_v15 = vpop.permute.xlu2 %373 }
  0x7e   : > { %v376_v16 = vsel %vm375_vm0, %v372_v10, %v374_v15  ;;  %v377_v17 = vsel %vm375_vm0, %v374_v15, %v372_v10 }
  0x7f   : > { %v379_v18 = vmul.f32 %v3057_v12, %v376_v16  ;;  %v380_v19 = vmul.f32 %v3057_v12, %v377_v17  ;;  %v388_v20 = vmul.f32 %v3059_v13, %v376_v16  ;;  %v389_v21 = vmul.f32 %v3059_v13, %v377_v17 }
  0x80   : > { %v397_v22 = vmul.f32 %v3061_v14, %v376_v16  ;;  %v398_v23 = vmul.f32 %v3061_v14, %v377_v17 }
  0x81   : > { %v383_v24 = vrot.slane %v380_v19, 7  ;;  %v392_v25 = vrot.slane %v389_v21, 7 }
  0x82   : > { %1003 = vrot.lane.b32.xlu1 %v3032_v7, %s2935_s30  ;;  %972 = vrot.lane.b32.xlu0 %v3039_v8, %s2934_s29  ;;  %v401_v26 = vrot.slane %v398_v23, 7 }
  0x83   : > { %v3082_v27 = vsel %vm315_vm1, %v379_v18, %v383_v24  ;;  %v3085_v28 = vsel %vm315_vm1, %v388_v20, %v392_v25  ;;  %1005 = vrot.lane.b32.xlu2 %v3039_v8, %s2935_s30 }
  0x84   : > { %v3090_v29 = vsel %vm315_vm1, %v397_v22, %v401_v26 }
  0x85   : > { %v3092_v30 = vpop.permute.xlu2 %439 }
  0x8a   : > { %1038 = vrot.lane.b32.xlu1 %v3039_v8, %s2936_s4  ;;  %1036 = vrot.lane.b32.xlu0 %v3032_v7, %s2936_s4 }
  0x8b   : > { %1069 = vrot.lane.b32.xlu2 %v3032_v7, %s2937_s5 }
  0x8c   : > { %v338_v31 = vpop.permute.xlu1 %337  ;;  %v301_v32 = vpop.permute.xlu0 %300 }
  0x8d   : > { %v3106_v36 = vpop.permute.xlu2 %475 }
  0x92   : > { %1102 = vrot.lane.b32.xlu1 %v3032_v7, %s2938_s6  ;;  %1071 = vrot.lane.b32.xlu0 %v3039_v8, %s2937_s5 }
  0x93   : > { %1104 = vrot.lane.b32.xlu2 %v3039_v8, %s2938_s6 }
  0x94   : > { %v340_v48 = vpop.permute.xlu1 %339  ;;  %v303_v50 = vpop.permute.xlu0 %302 }
  0x95   : > { %v342_v54 = vsel %vm341_vm2, %v338_v31, %v340_v48  ;;  %v343_v55 = vsel %vm341_vm2, %v340_v48, %v338_v31  ;;  %v307_v56 = vsel %vm306_vm3, %v301_v32, %v303_v50  ;;  %v308_v57 = vsel %vm306_vm3, %v303_v50, %v301_v32  ;;  %v3159_v58 = vpop.permute.xlu2 %541 }
  0x96   : > { %v346_v59 = vmul.f32 %v3128_v43, %v343_v55  ;;  %v355_v60 = vmul.f32 %v3131_v44, %v343_v55  ;;  %v345_v62 = vmul.f32 %v3128_v43, %v342_v54  ;;  %v354_v63 = vmul.f32 %v3131_v44, %v342_v54 }
  0x97   : > { %v364_v0 = vmul.f32 %v3134_v45, %v343_v55  ;;  %v311_v1 = vmul.f32 %v3136_v46, %v308_v57  ;;  %v363_v5 = vmul.f32 %v3134_v45, %v342_v54  ;;  %v321_v7 = vmul.f32 %v3138_v47, %v308_v57 }
  0x98   : > { %v349_v2 = vrot.slane %v346_v59, 7  ;;  %v358_v4 = vrot.slane %v355_v60, 7  ;;  %v310_v10 = vmul.f32 %v3136_v46, %v307_v56  ;;  %v330_v16 = vmul.f32 %v3144_v49, %v308_v57 }
  0x99   : > { %v367_v8 = vrot.slane %v364_v0, 7  ;;  %v314_v15 = vrot.slane %v311_v1, 7  ;;  %v320_v19 = vmul.f32 %v3138_v47, %v307_v56  ;;  %v324_v20 = vrot.slane %v321_v7, 7 }
  0x9a   : > { %v350_v17 = vsel %vm315_vm1, %v345_v62, %v349_v2  ;;  %v359_v18 = vsel %vm315_vm1, %v354_v63, %v358_v4  ;;  %v329_v23 = vmul.f32 %v3144_v49, %v307_v56  ;;  %v333_v24 = vrot.slane %v330_v16, 7 }
  0x9b   : > { %v368_v21 = vsel %vm315_vm1, %v363_v5, %v367_v8  ;;  %v316_v22 = vsel %vm315_vm1, %v310_v10, %v314_v15  ;;  %v325_v26 = vsel %vm315_vm1, %v320_v19, %v324_v20  ;;  %v3189_v32 = vstv %s3140_s7  ;;  %s3255_s7 = sld [smem:[#allocation4 + $0x24]] }
  0x9c   : > { %v318_v25 = vadd.f32 %v316_v22, %v288_v51  ;;  %v408_v31 = vpop.permute.xlu1 %407  ;;  %4959 = vst [vmem:[#allocation17_spill] sm:$0xff] %v3189_v32  ;;  %v406_v38 = vpop.permute.xlu0 %405  ;;  %v327_v39 = vadd.f32 %v325_v26, %v291_v52  ;;  %v334_v48 = vsel %vm315_vm1, %v329_v23, %v333_v24  ;;  %v3233_v19 = vstv %s3194_s14  ;;  %s3296_s14 = sld [smem:[#allocation4 + $0x26]] }
  0x9d   : > { %v410_v50 = vsel %vm409_vm4, %v406_v38, %v408_v31  ;;  %v411_v54 = vsel %vm409_vm4, %v408_v31, %v406_v38  ;;  %v3203_v51 = vpop.permute.xlu2 %593  ;;  %v336_v55 = vadd.f32 %v334_v48, %v294_v53  ;;  %4961 = vst [vmem:[#allocation19_spill] sm:$0xff] %v3233_v19  ;;  %v3239_v20 = vstv %s3201_s15  ;;  %s3303_s15 = sld [smem:[#allocation4 + $0x41]] }
  0x9e   : > { %v352_v56 = vadd.f32 %v350_v17, %v318_v25  ;;  %v414_v57 = vmul.f32 %v3165_v61, %v411_v54  ;;  %v361_v59 = vadd.f32 %v359_v18, %v327_v39  ;;  %v413_v52 = vmul.f32 %v3165_v61, %v410_v50  ;;  %4962 = vst [vmem:[#allocation20_spill] sm:$0xff] %v3239_v20 }
  0x9f   : > { %v423_v60 = vmul.f32 %v3189_v32, %v411_v54  ;;  %v370_v62 = vadd.f32 %v368_v21, %v336_v55  ;;  %v432_v1 = vmul.f32 %v3192_v37, %v411_v54  ;;  %v422_v2 = vmul.f32 %v3189_v32, %v410_v50 }
  0xa0   : > { %v386_v63 = vadd.f32 %v3082_v27, %v352_v56  ;;  %v417_v0 = vrot.slane %v414_v57, 7  ;;  %v395_v53 = vadd.f32 %v3085_v28, %v361_v59  ;;  %v431_v8 = vmul.f32 %v3192_v37, %v410_v50 }
  0xa1   : > { %v426_v4 = vrot.slane %v423_v60, 7  ;;  %v404_v5 = vadd.f32 %v3090_v29, %v370_v62  ;;  %v435_v27 = vrot.slane %v432_v1, 7  ;;  %v3242_v21 = vstv %s3206_s16  ;;  %s3331_s16 = sld [smem:[#allocation4 + $0xd]] }
  0xa2   : > { %v418_v7 = vsel %vm315_vm1, %v413_v52, %v417_v0  ;;  %4963 = vst [vmem:[#allocation21_spill] sm:$0xff] %v3242_v21  ;;  %v3247_v22 = vstv %s3175_s9  ;;  %v3260_v26 = vstv %s3180_s10  ;;  %v3263_v31 = vstv %s3185_s11  ;;  %s3277_s9 = sld [smem:[#allocation4 + $0x3f]] }
  0xa3   : > { %v420_v10 = vadd.f32 %v418_v7, %v386_v63  ;;  %v427_v28 = vsel %vm315_vm1, %v422_v2, %v426_v4  ;;  %v436_v16 = vsel %vm315_vm1, %v431_v8, %v435_v27  ;;  %4964 = vst [vmem:[#allocation22_spill] sm:$0xff] %v3247_v22  ;;  %v3275_v50 = vstv %s3210_s17  ;;  %s3286_s10 = sld [smem:[#allocation4 + $0x3e]] }
  0xa4   : > { %v429_v15 = vadd.f32 %v427_v28, %v395_v53  ;;  %v474_v17 = vpop.permute.xlu1 %473  ;;  %v442_v29 = vpop.permute.xlu0 %441  ;;  %v438_v18 = vadd.f32 %v436_v16, %v404_v5  ;;  %4965 = vst [vmem:[#allocation23_spill] sm:$0xff] %v3260_v26  ;;  %v3284_v57 = vstv %s3214_s18  ;;  %s3290_s11 = sld [smem:[#allocation4 + $0xb]]  ;;  %v3301_v8 = vstv %s3218_s19 }
  0xa5   : > { %v444_v23 = vsel %vm443_vm5, %v3092_v30, %v442_v29  ;;  %v445_v24 = vsel %vm443_vm5, %v442_v29, %v3092_v30  ;;  %v3257_v25 = vpop.permute.xlu2 %657  ;;  %4966 = vst [vmem:[#allocation24_spill] sm:$0xff] %v3263_v31  ;;  %v479_v39 = vsel %vm477_vm6, %v3106_v36, %v474_v17  ;;  %v478_v54 = vsel %vm477_vm6, %v474_v17, %v3106_v36  ;;  %s3354_s17 = sld [smem:[#allocation4 + $0x28]] }
  0xa6   : > { %v448_v38 = vmul.f32 %v3233_v19, %v445_v24  ;;  %v457_v30 = vmul.f32 %v3239_v20, %v445_v24  ;;  %v466_v48 = vmul.f32 %v3242_v21, %v445_v24  ;;  %4967 = vst [vmem:[#allocation25_spill] sm:$0xff] %v3275_v50  ;;  %v447_v55 = vmul.f32 %v3233_v19, %v444_v23  ;;  %s3363_s18 = sld [smem:[#allocation4 + $0x43]] }
  0xa7   : > { %4968 = vst [vmem:[#allocation26_spill] sm:$0xff] %v3284_v57  ;;  %v456_v59 = vmul.f32 %v3239_v20, %v444_v23  ;;  %v465_v60 = vmul.f32 %v3242_v21, %v444_v23  ;;  %v482_v36 = vmul.f32 %v3247_v22, %v479_v39  ;;  %v491_v63 = vmul.f32 %v3260_v26, %v479_v39  ;;  %s3375_s19 = sld [smem:[#allocation4 + $0xc]] }
  0xa8   : > { %v451_v56 = vrot.slane %v448_v38, 7  ;;  %v460_v52 = vrot.slane %v457_v30, 7  ;;  %v469_v62 = vrot.slane %v466_v48, 7  ;;  %v500_v0 = vmul.f32 %v3263_v31, %v479_v39  ;;  %4969 = vst [vmem:[#allocation27_spill] sm:$0xff] %v3301_v8 }
  0xa9   : > { %v3306_v16 = vstv %s3223_s20  ;;  %v3309_v17 = vstv %s3244_s25  ;;  %v481_v29 = vmul.f32 %v3247_v22, %v478_v54  ;;  %v3316_v24 = vstv %s3255_s7  ;;  %s3378_s20 = sld [smem:[#allocation4 + $0x27]] }
  0xaa   : > { %v452_v1 = vsel %vm315_vm1, %v447_v55, %v451_v56  ;;  %v461_v5 = vsel %vm315_vm1, %v456_v59, %v460_v52  ;;  %v470_v7 = vsel %vm315_vm1, %v465_v60, %v469_v62  ;;  %4970 = vst [vmem:[#allocation28_spill] sm:$0xff] %v3306_v16  ;;  %v485_v38 = vrot.slane %v482_v36, 7  ;;  %s3406_s25 = sld [smem:[#allocation4 + $0x44]] }
  0xab   : > { %v454_v4 = vadd.f32 %v452_v1, %v420_v10  ;;  %v463_v27 = vadd.f32 %v461_v5, %v429_v15  ;;  %v472_v28 = vadd.f32 %v470_v7, %v438_v18  ;;  %4971 = vst [vmem:[#allocation29_spill] sm:$0xff] %v3309_v17  ;;  %v490_v10 = vmul.f32 %v3260_v26, %v478_v54  ;;  %s3415_s7 = sld [smem:[#allocation4 + $0x10]] }
  0xac   : > { %v510_v53 = vpop.permute.xlu1 %509  ;;  %v508_v2 = vpop.permute.xlu0 %507  ;;  %4972 = vst [vmem:[#allocation30_spill] sm:$0xff] %v3316_v24  ;;  %v494_v39 = vrot.slane %v491_v63, 7  ;;  %v499_v15 = vmul.f32 %v3263_v31, %v478_v54  ;;  %v503_v18 = vrot.slane %v500_v0, 7  ;;  %v3320_v30 = vstv %s3226_s21  ;;  %s3387_s21 = sld [smem:[#allocation4 + $0x42]] }
  0xad   : > { %v513_v23 = vsel %vm511_vm7, %v510_v53, %v508_v2  ;;  %4973 = vst [vmem:[#allocation31_spill] sm:$0xff] %v3320_v30  ;;  %v3323_v48 = vstv %s3230_s23  ;;  %v3327_v55 = vstv %s3277_s9  ;;  %v3329_v56 = vpop.permute.xlu2 %692  ;;  %v3336_v60 = vstv %s3235_s24  ;;  %s3394_s23 = sld [smem:[#allocation4 + $0xe]] }
  0xae   : > { %4974 = vst [vmem:[#allocation32_spill] sm:$0xff] %v3323_v48  ;;  %v516_v59 = vmul.f32 %v3275_v50, %v513_v23  ;;  %v525_v52 = vmul.f32 %v3284_v57, %v513_v23  ;;  %v3339_v54 = vstv %s3267_s8  ;;  %v512_v62 = vsel %vm511_vm7, %v508_v2, %v510_v53  ;;  %s3401_s24 = sld [smem:[#allocation4 + $0x29]] }
  0xaf   : > { %4975 = vst [vmem:[#allocation33_spill] sm:$0xff] %v3327_v55  ;;  %v3344_v36 = vstv %s3286_s10  ;;  %v3348_v63 = vmul.f32 %v3008_v3, %v3309_v17  ;;  %v3352_v0 = vmul.f32 %v3008_v3, %v3316_v24  ;;  %v486_v1 = vsel %vm315_vm1, %v481_v29, %v485_v38  ;;  %s3424_s8 = sld [smem:[#allocation4 + $0x2b]] }
  0xb0   : > { %4976 = vst [vmem:[#allocation34_spill] sm:$0xff] %v3336_v60  ;;  %v495_v5 = vsel %vm315_vm1, %v490_v10, %v494_v39  ;;  %v504_v7 = vsel %vm315_vm1, %v499_v15, %v503_v18  ;;  %v3361_v53 = vmul.f32 %v3008_v3, %v3327_v55  ;;  %v534_v17 = vmul.f32 %v3301_v8, %v513_v23  ;;  %s3428_s9 = sld [smem:[#allocation4 + $0x46]] }
  0xb1   : > { %4977 = vst [vmem:[#allocation35_spill] sm:$0xff] %v3339_v54  ;;  %v3367_v24 = vstv %s3290_s11  ;;  %v3370_v31 = vstv %s3296_s14  ;;  %v3373_v26 = vstv %s3303_s15  ;;  %v488_v29 = vadd.f32 %v486_v1, %v454_v4  ;;  %s3433_s10 = sld [smem:[#allocation4 + $0xf]] }
  0xb2   : > { %4978 = vst [vmem:[#allocation36_spill] sm:$0xff] %v3344_v36  ;;  %v515_v10 = vmul.f32 %v3275_v50, %v512_v62  ;;  %v519_v38 = vrot.slane %v516_v59, 7  ;;  %v528_v3 = vrot.slane %v525_v52, 7  ;;  %v497_v39 = vadd.f32 %v495_v5, %v463_v27  ;;  %s3450_s11 = sld [smem:[#allocation4 + $0x2a]] }
  0xb3   : > { %4979 = vst [vmem:[#allocation37_spill] sm:$0xff] %v3367_v24  ;;  %v524_v15 = vmul.f32 %v3284_v57, %v512_v62  ;;  %v506_v4 = vadd.f32 %v504_v7, %v472_v28  ;;  %v533_v59 = vmul.f32 %v3301_v8, %v512_v62  ;;  %v537_v1 = vrot.slane %v534_v17, 7  ;;  %s3463_s14 = sld [smem:[#allocation4 + $0x45]] }
  0xb4   : > { %v592_v9 = vpop.permute.xlu1 %591  ;;  %v544_v2 = vpop.permute.xlu0 %543  ;;  %4980 = vst [vmem:[#allocation38_spill] sm:$0xff] %v3370_v31  ;;  %v3399_v57 = vstv %s3331_s16  ;;  %v520_v28 = vsel %vm315_vm1, %v515_v10, %v519_v38  ;;  %v3422_v22 = vstv %s3363_s18  ;;  %s3496_s15 = sld [smem:[#allocation4 + $0x11]] }
  0xb5   : > { %4981 = vst [vmem:[#allocation39_spill] sm:$0xff] %v3373_v26  ;;  %v596_v23 = vsel %vm306_vm3, %v3203_v51, %v592_v9  ;;  %v547_v18 = vsel %vm545_vm8, %v544_v2, %v3159_v58  ;;  %v546_v52 = vsel %vm545_vm8, %v3159_v58, %v544_v2  ;;  %v529_v62 = vsel %vm315_vm1, %v524_v15, %v528_v3  ;;  %v3413_v50 = vpop.permute.xlu2 %756  ;;  %s3500_s16 = sld [smem:[#allocation4 + $0x2c]] }
  0xb6   : > { %v550_v27 = vmul.f32 %v3336_v60, %v547_v18  ;;  %v559_v5 = vmul.f32 %v3339_v54, %v547_v18  ;;  %v568_v55 = vmul.f32 %v3344_v36, %v547_v18  ;;  %4982 = vst [vmem:[#allocation40_spill] sm:$0xff] %v3399_v57  ;;  %v599_v58 = vmul.f32 %v3306_v16, %v596_v23  ;;  %s3516_s18 = sld [smem:[#allocation4 + $0x12]] }
  0xb7   : > { %v595_v17 = vsel %vm306_vm3, %v592_v9, %v3203_v51  ;;  %v608_v2 = vmul.f32 %v3320_v30, %v596_v23  ;;  %v549_v18 = vmul.f32 %v3336_v60, %v546_v52  ;;  %v617_v10 = vmul.f32 %v3323_v48, %v596_v23  ;;  %4984 = vst [vmem:[#allocation42_spill] sm:$0xff] %v3422_v22 }
  0xb8   : > { %v553_v7 = vrot.slane %v550_v27, 7  ;;  %v562_v8 = vrot.slane %v559_v5, 7  ;;  %v571_v38 = vrot.slane %v568_v55, 7  ;;  %v3419_v27 = vstv %s3354_s17  ;;  %s3507_s17 = sld [smem:[#allocation4 + $0x47]] }
  0xb9   : > { %4983 = vst [vmem:[#allocation41_spill] sm:$0xff] %v3419_v27  ;;  %v522_v9 = vadd.f32 %v520_v28, %v488_v29  ;;  %v531_v51 = vadd.f32 %v529_v62, %v497_v39  ;;  %v558_v5 = vmul.f32 %v3339_v54, %v546_v52  ;;  %v538_v55 = vsel %vm315_vm1, %v533_v59, %v537_v1 }
  0xba   : > { %v554_v60 = vsel %vm315_vm1, %v549_v18, %v553_v7  ;;  %v598_v23 = vmul.f32 %v3306_v16, %v595_v17  ;;  %v602_v21 = vrot.slane %v599_v58, 7  ;;  %v567_v20 = vmul.f32 %v3344_v36, %v546_v52 }
  0xbb   : > { %v607_v29 = vmul.f32 %v3320_v30, %v595_v17  ;;  %v611_v39 = vrot.slane %v608_v2, 7  ;;  %v616_v28 = vmul.f32 %v3323_v48, %v595_v17  ;;  %v563_v62 = vsel %vm315_vm1, %v558_v5, %v562_v8 }
  0xbc   : > { %v627_v3 = vpop.permute.xlu1 %626  ;;  %v625_v15 = vpop.permute.xlu0 %624  ;;  %v620_v7 = vrot.slane %v617_v10, 7  ;;  %v556_v18 = vadd.f32 %v554_v60, %v522_v9  ;;  %v572_v59 = vsel %vm315_vm1, %v567_v20, %v571_v38  ;;  %v540_v58 = vadd.f32 %v538_v55, %v506_v4 }
  0xbd   : > { %v629_v1 = vsel %vm341_vm2, %v627_v3, %v625_v15  ;;  %v3442_v52 = vstv %s3375_s19  ;;  %v3445_v16 = vstv %s3378_s20  ;;  %v3448_v36 = vstv %s3387_s21  ;;  %s3522_s19 = sld [smem:[#allocation4 + $0x14]] }
  0xbe   : > { %4985 = vst [vmem:[#allocation43_spill] sm:$0xff] %v3442_v52  ;;  %v603_v17 = vsel %vm315_vm1, %v598_v23, %v602_v21  ;;  %v565_v8 = vadd.f32 %v563_v62, %v531_v51  ;;  %v3454_v60 = vstv %s3394_s23  ;;  %v3457_v20 = vstv %s3401_s24  ;;  %s3526_s20 = sld [smem:[#allocation4 + $0x2f]] }
  0xbf   : > { %4986 = vst [vmem:[#allocation44_spill] sm:$0xff] %v3445_v16  ;;  %v612_v4 = vsel %vm315_vm1, %v607_v29, %v611_v39  ;;  %v574_v2 = vadd.f32 %v572_v59, %v540_v58  ;;  %v628_v10 = vsel %vm341_vm2, %v625_v15, %v627_v3  ;;  %v632_v38 = vmul.f32 %v3367_v24, %v629_v1  ;;  %v3472_v39 = vpop.permute.xlu2 %791  ;;  %s3532_s21 = sld [smem:[#allocation4 + $0x4a]] }
  0xc0   : > { %4987 = vst [vmem:[#allocation45_spill] sm:$0xff] %v3448_v36  ;;  %v621_v21 = vsel %vm315_vm1, %v616_v28, %v620_v7  ;;  %v579_v9 = vadd.f32 %v3348_v63, %v556_v18  ;;  %v641_v51 = vmul.f32 %v3370_v31, %v629_v1  ;;  %v3469_v23 = vstv %s3406_s25  ;;  %s3538_s23 = sld [smem:[#allocation4 + $0x2d]] }
  0xc1   : > { %4988 = vst [vmem:[#allocation46_spill] sm:$0xff] %v3454_v60  ;;  %v650_v29 = vmul.f32 %v3373_v26, %v629_v1  ;;  %v3475_v3 = vstv %s3415_s7  ;;  %v3478_v15 = vstv %s3424_s8  ;;  %v3481_v62 = vstv %s3428_s9  ;;  %s3547_s24 = sld [smem:[#allocation4 + $0x48]] }
  0xc2   : > { %4989 = vst [vmem:[#allocation47_spill] sm:$0xff] %v3457_v20  ;;  %v582_v28 = vadd.f32 %v3352_v0, %v565_v8  ;;  %v631_v63 = vmul.f32 %v3367_v24, %v628_v10  ;;  %v640_v7 = vmul.f32 %v3370_v31, %v628_v10  ;;  %v3487_v18 = vstv %s3433_s10  ;;  %s3553_s25 = sld [smem:[#allocation4 + $0x13]] }
  0xc3   : > { %4990 = vst [vmem:[#allocation48_spill] sm:$0xff] %v3469_v23  ;;  %v585_v59 = vadd.f32 %v3361_v53, %v574_v2  ;;  %v635_v1 = vrot.slane %v632_v38, 7  ;;  %v605_v0 = vadd.f32 %v603_v17, %v579_v9  ;;  %v644_v8 = vrot.slane %v641_v51, 7  ;;  %s3562_s7 = sld [smem:[#allocation4 + $0x2e]] }
  0xc4   : > { %v691_v5 = vpop.permute.xlu1 %690  ;;  %v660_v55 = vpop.permute.xlu0 %659  ;;  %4991 = vst [vmem:[#allocation49_spill] sm:$0xff] %v3475_v3  ;;  %v649_v24 = vmul.f32 %v3373_v26, %v628_v10  ;;  %v653_v53 = vrot.slane %v650_v29, 7  ;;  %v3505_v30 = vstv %s3450_s11  ;;  %v614_v54 = vadd.f32 %v612_v4, %v582_v28  ;;  %s3600_s8 = sld [smem:[#allocation4 + $0x49]] }
  0xc5   : > { %4992 = vst [vmem:[#allocation50_spill] sm:$0xff] %v3478_v15  ;;  %v695_v58 = vsel %vm409_vm4, %v3329_v56, %v691_v5  ;;  %v662_v48 = vsel %vm375_vm0, %v660_v55, %v3257_v25  ;;  %v694_v17 = vsel %vm409_vm4, %v691_v5, %v3329_v56  ;;  %v661_v9 = vsel %vm375_vm0, %v3257_v25, %v660_v55  ;;  %s3619_s9 = sld [smem:[#allocation4 + $0x15]] }
  0xc6   : > { %4993 = vst [vmem:[#allocation51_spill] sm:$0xff] %v3481_v62  ;;  %v665_v31 = vmul.f32 %v3442_v52, %v662_v48  ;;  %v674_v2 = vmul.f32 %v3445_v16, %v662_v48  ;;  %v683_v38 = vmul.f32 %v3448_v36, %v662_v48  ;;  %v698_v10 = vmul.f32 %v3399_v57, %v695_v58  ;;  %s3629_s10 = sld [smem:[#allocation4 + $0x30]] }
  0xc7   : > { %4994 = vst [vmem:[#allocation52_spill] sm:$0xff] %v3487_v18  ;;  %v623_v51 = vadd.f32 %v621_v21, %v585_v59  ;;  %v636_v48 = vsel %vm315_vm1, %v631_v63, %v635_v1  ;;  %v3520_v26 = vstv %s3463_s14  ;;  %v707_v4 = vmul.f32 %v3419_v27, %v695_v58  ;;  %s3636_s11 = sld [smem:[#allocation4 + $0x4b]] }
  0xc8   : > { %4995 = vst [vmem:[#allocation53_spill] sm:$0xff] %v3505_v30  ;;  %v668_v29 = vrot.slane %v665_v31, 7  ;;  %v716_v56 = vmul.f32 %v3422_v22, %v695_v58  ;;  %v677_v5 = vrot.slane %v674_v2, 7  ;;  %v686_v28 = vrot.slane %v683_v38, 7  ;;  %v3543_v2 = vpop.permute.xlu2 %871  ;;  %s3640_s14 = sld [smem:[#allocation4 + $0x17]] }
  0xc9   : > { %4996 = vst [vmem:[#allocation54_spill] sm:$0xff] %v3520_v26  ;;  %v645_v25 = vsel %vm315_vm1, %v640_v7, %v644_v8  ;;  %v654_v21 = vsel %vm315_vm1, %v649_v24, %v653_v53  ;;  %v697_v31 = vmul.f32 %v3399_v57, %v694_v17  ;;  %v664_v55 = vmul.f32 %v3442_v52, %v661_v9 }
  0xca   : > { %v701_v63 = vrot.slane %v698_v10, 7  ;;  %v673_v59 = vmul.f32 %v3445_v16, %v661_v9  ;;  %v682_v1 = vmul.f32 %v3448_v36, %v661_v9  ;;  %v638_v7 = vadd.f32 %v636_v48, %v605_v0 }
  0xcb   : > { %v706_v24 = vmul.f32 %v3419_v27, %v694_v17  ;;  %v715_v8 = vmul.f32 %v3422_v22, %v694_v17  ;;  %v669_v53 = vsel %vm315_vm1, %v664_v55, %v668_v29  ;;  %v710_v38 = vrot.slane %v707_v4, 7 }
  0xcc   : > { %v726_v19 = vpop.permute.xlu1 %725  ;;  %v724_v37 = vpop.permute.xlu0 %723  ;;  %v719_v10 = vrot.slane %v716_v56, 7  ;;  %v678_v9 = vsel %vm315_vm1, %v673_v59, %v677_v5  ;;  %v687_v57 = vsel %vm315_vm1, %v682_v1, %v686_v28  ;;  %v647_v36 = vadd.f32 %v645_v25, %v614_v54 }
  0xcd   : > { %v728_v58 = vsel %vm443_vm5, %v726_v19, %v724_v37  ;;  %v656_v0 = vadd.f32 %v654_v21, %v623_v51  ;;  %v3551_v27 = vstv %s3496_s15  ;;  %v702_v17 = vsel %vm315_vm1, %v697_v31, %v701_v63  ;;  %s3647_s15 = sld [smem:[#allocation4 + $0x32]] }
  0xce   : > { %v731_v48 = vmul.f32 %v3454_v60, %v728_v58  ;;  %4997 = vst [vmem:[#allocation55_spill] sm:$0xff] %v3551_v27  ;;  %v671_v29 = vadd.f32 %v669_v53, %v638_v7  ;;  %v3557_v4 = vstv %s3500_s16  ;;  %v3560_v56 = vstv %s3507_s17  ;;  %s3652_s16 = sld [smem:[#allocation4 + $0x4d]] }
  0xcf   : > { %4998 = vst [vmem:[#allocation56_spill] sm:$0xff] %v3557_v4  ;;  %v680_v54 = vadd.f32 %v678_v9, %v647_v36  ;;  %v689_v51 = vadd.f32 %v687_v57, %v656_v0  ;;  %v727_v5 = vsel %vm443_vm5, %v724_v37, %v726_v19  ;;  %v740_v28 = vmul.f32 %v3457_v20, %v728_v58  ;;  %s3660_s17 = sld [smem:[#allocation4 + $0x16]] }
  0xd0   : > { %4999 = vst [vmem:[#allocation57_spill] sm:$0xff] %v3560_v56  ;;  %v711_v25 = vsel %vm315_vm1, %v706_v24, %v710_v38  ;;  %v720_v21 = vsel %vm315_vm1, %v715_v8, %v719_v10  ;;  %v749_v31 = vmul.f32 %v3469_v23, %v728_v58  ;;  %v3571_v59 = vstv %s3522_s19  ;;  %s3712_s19 = sld [smem:[#allocation4 + $0x4c]] }
  0xd1   : > { %5000 = vst [vmem:[#allocation58_spill] sm:$0xff] %v3571_v59  ;;  %v734_v1 = vrot.slane %v731_v48, 7  ;;  %v3574_v7 = vstv %s3526_s20  ;;  %v3577_v57 = vstv %s3532_s21  ;;  %v3580_v36 = vstv %s3516_s18  ;;  %s3667_s18 = sld [smem:[#allocation4 + $0x31]] }
  0xd2   : > { %5001 = vst [vmem:[#allocation59_spill] sm:$0xff] %v3574_v7  ;;  %v704_v37 = vadd.f32 %v702_v17, %v671_v29  ;;  %v730_v19 = vmul.f32 %v3454_v60, %v727_v5  ;;  %v739_v24 = vmul.f32 %v3457_v20, %v727_v5  ;;  %v3585_v8 = vstv %s3538_s23  ;;  %s3721_s20 = sld [smem:[#allocation4 + $0x18]] }
  0xd3   : > { %5002 = vst [vmem:[#allocation60_spill] sm:$0xff] %v3577_v57  ;;  %v713_v58 = vadd.f32 %v711_v25, %v680_v54  ;;  %v722_v53 = vadd.f32 %v720_v21, %v689_v51  ;;  %v743_v38 = vrot.slane %v740_v28, 7  ;;  %v748_v9 = vmul.f32 %v3469_v23, %v727_v5  ;;  %v3598_v28 = vpop.permute.xlu2 %906  ;;  %s3725_s21 = sld [smem:[#allocation4 + $0x33]] }
  0xd4   : > { %v790_v55 = vpop.permute.xlu1 %789  ;;  %v759_v63 = vpop.permute.xlu0 %758  ;;  %5003 = vst [vmem:[#allocation61_spill] sm:$0xff] %v3580_v36  ;;  %v752_v0 = vrot.slane %v749_v31, 7  ;;  %v735_v29 = vsel %vm315_vm1, %v730_v19, %v734_v1  ;;  %v3603_v25 = vstv %s3547_s24  ;;  %v3607_v5 = vmul.f32 %v3029_v6, %v3580_v36  ;;  %s3731_s23 = sld [smem:[#allocation4 + $0x4e]] }
  0xd5   : > { %5004 = vst [vmem:[#allocation62_spill] sm:$0xff] %v3585_v8  ;;  %v761_v10 = vsel %vm477_vm6, %v759_v63, %v3413_v50  ;;  %v794_v48 = vsel %vm511_vm7, %v3472_v39, %v790_v55  ;;  %v3611_v21 = vmul.f32 %v3029_v6, %v3585_v8  ;;  %v3614_v31 = vstv %s3553_s25  ;;  %s3737_s24 = sld [smem:[#allocation4 + $0x1a]] }
  0xd6   : > { %v764_v17 = vmul.f32 %v3487_v18, %v761_v10  ;;  %v773_v54 = vmul.f32 %v3505_v30, %v761_v10  ;;  %v782_v51 = vmul.f32 %v3520_v26, %v761_v10  ;;  %5005 = vst [vmem:[#allocation63_spill] sm:$0xff] %v3603_v25  ;;  %v3617_v1 = vstv %s3562_s7  ;;  %s3770_s25 = sld [smem:[#allocation4 + $0x35]] }
  0xd7   : > { %5006 = vst [vmem:[#allocation64_spill] sm:$0xff] %v3614_v31  ;;  %v744_v19 = vsel %vm315_vm1, %v739_v24, %v743_v38  ;;  %v793_v10 = vsel %vm511_vm7, %v790_v55, %v3472_v39  ;;  %v797_v23 = vmul.f32 %v3475_v3, %v794_v48  ;;  %v760_v36 = vsel %vm477_vm6, %v3413_v50, %v759_v63  ;;  %s3780_s7 = sld [smem:[#allocation4 + $0x50]] }
  0xd8   : > { %5007 = vst [vmem:[#allocation65_spill] sm:$0xff] %v3617_v1  ;;  %v737_v8 = vadd.f32 %v735_v29, %v704_v37  ;;  %v806_v20 = vmul.f32 %v3478_v15, %v794_v48  ;;  %v767_v60 = vrot.slane %v764_v17, 7  ;;  %v3634_v24 = vmul.f32 %v3029_v6, %v3603_v25 }
  0xd9   : > { %v753_v39 = vsel %vm315_vm1, %v748_v9, %v752_v0  ;;  %v815_v55 = vmul.f32 %v3481_v62, %v794_v48  ;;  %v776_v38 = vrot.slane %v773_v54, 7  ;;  %v785_v50 = vrot.slane %v782_v51, 7 }
  0xda   : > { %v796_v63 = vmul.f32 %v3475_v3, %v793_v10  ;;  %v805_v37 = vmul.f32 %v3478_v15, %v793_v10  ;;  %v763_v17 = vmul.f32 %v3487_v18, %v760_v36  ;;  %v800_v29 = vrot.slane %v797_v23, 7 }
  0xdb   : > { %v772_v9 = vmul.f32 %v3505_v30, %v760_v36  ;;  %v781_v0 = vmul.f32 %v3520_v26, %v760_v36  ;;  %v809_v54 = vrot.slane %v806_v20, 7  ;;  %v814_v51 = vmul.f32 %v3481_v62, %v793_v10 }
  0xdc   : > { %v825_v22 = vpop.permute.xlu1 %824  ;;  %v823_v16 = vpop.permute.xlu0 %822  ;;  %v768_v25 = vsel %vm315_vm1, %v763_v17, %v767_v60  ;;  %v818_v15 = vrot.slane %v815_v55, 7  ;;  %v746_v36 = vadd.f32 %v744_v19, %v713_v58  ;;  %v755_v26 = vadd.f32 %v753_v39, %v722_v53 }
  0xdd   : > { %v827_v6 = vsel %vm545_vm8, %v825_v22, %v823_v16  ;;  %v777_v23 = vsel %vm315_vm1, %v772_v9, %v776_v38  ;;  %v786_v30 = vsel %vm315_vm1, %v781_v0, %v785_v50  ;;  %v826_v20 = vsel %vm545_vm8, %v823_v16, %v825_v22  ;;  %v3670_v50 = vpop.permute.xlu2 %970 }
  0xde   : > { %v830_v48 = vmul.f32 %v3551_v27, %v827_v6  ;;  %v839_v18 = vmul.f32 %v3557_v4, %v827_v6  ;;  %v848_v3 = vmul.f32 %v3560_v56, %v827_v6  ;;  %v3665_v10 = vstv %s3600_s8  ;;  %s3789_s8 = sld [smem:[#allocation4 + $0x19]] }
  0xdf   : > { %5008 = vst [vmem:[#allocation66_spill] sm:$0xff] %v3665_v10  ;;  %v801_v60 = vsel %vm315_vm1, %v796_v63, %v800_v29  ;;  %v770_v55 = vadd.f32 %v768_v25, %v737_v8  ;;  %v3673_v17 = vstv %s3619_s9  ;;  %v810_v58 = vsel %vm315_vm1, %v805_v37, %v809_v54  ;;  %s3794_s9 = sld [smem:[#allocation4 + $0x34]] }
  0xe0   : > { %v833_v38 = vrot.slane %v830_v48, 7  ;;  %v779_v53 = vadd.f32 %v777_v23, %v746_v36  ;;  %v788_v22 = vadd.f32 %v786_v30, %v755_v26  ;;  %v842_v16 = vrot.slane %v839_v18, 7 }
  0xe1   : > { %v819_v6 = vsel %vm315_vm1, %v814_v51, %v818_v15  ;;  %v829_v63 = vmul.f32 %v3551_v27, %v826_v20  ;;  %v851_v8 = vrot.slane %v848_v3, 7  ;;  %v3679_v25 = vstv %s3629_s10  ;;  %s3799_s10 = sld [smem:[#allocation4 + $0x4f]] }
  0xe2   : > { %v838_v29 = vmul.f32 %v3557_v4, %v826_v20  ;;  %v3683_v9 = vstv %s3636_s11  ;;  %v3686_v0 = vstv %s3640_s14  ;;  %v3689_v37 = vstv %s3647_s15 }
  0xe3   : > { %5009 = vst [vmem:[#allocation67_spill] sm:$0xff] %v3686_v0  ;;  %v803_v26 = vadd.f32 %v801_v60, %v770_v55  ;;  %v834_v30 = vsel %vm315_vm1, %v829_v63, %v833_v38  ;;  %v847_v15 = vmul.f32 %v3560_v56, %v826_v20  ;;  %v3694_v18 = vstv %s3652_s16 }
  0xe4   : > { %v905_v19 = vpop.permute.xlu1 %904  ;;  %v874_v39 = vpop.permute.xlu0 %873  ;;  %5010 = vst [vmem:[#allocation68_spill] sm:$0xff] %v3689_v37  ;;  %v812_v3 = vadd.f32 %v810_v58, %v779_v53  ;;  %v821_v48 = vadd.f32 %v819_v6, %v788_v22  ;;  %v843_v54 = vsel %vm315_vm1, %v838_v29, %v842_v16  ;;  %v3706_v55 = vstv %s3660_s17 }
  0xe5   : > { %5011 = vst [vmem:[#allocation69_spill] sm:$0xff] %v3694_v18  ;;  %v876_v51 = vsel %vm306_vm3, %v874_v39, %v3543_v2  ;;  %v852_v23 = vsel %vm315_vm1, %v847_v15, %v851_v8  ;;  %v909_v36 = vsel %vm341_vm2, %v3598_v28, %v905_v19  ;;  %v836_v20 = vadd.f32 %v834_v30, %v803_v26 }
  0xe6   : > { %v879_v60 = vmul.f32 %v3614_v31, %v876_v51  ;;  %v875_v38 = vsel %vm306_vm3, %v3543_v2, %v874_v39  ;;  %v888_v58 = vmul.f32 %v3617_v1, %v876_v51  ;;  %v3715_v53 = vstv %s3667_s18 }
  0xe7   : > { %5012 = vst [vmem:[#allocation70_spill] sm:$0xff] %v3715_v53  ;;  %v845_v22 = vadd.f32 %v843_v54, %v812_v3  ;;  %v908_v16 = vsel %vm341_vm2, %v905_v19, %v3598_v28  ;;  %v897_v63 = vmul.f32 %v3665_v10, %v876_v51  ;;  %v854_v8 = vadd.f32 %v852_v23, %v821_v48 }
  0xe8   : > { %v882_v6 = vrot.slane %v879_v60, 7  ;;  %v912_v29 = vmul.f32 %v3571_v59, %v909_v36  ;;  %v921_v2 = vmul.f32 %v3574_v7, %v909_v36  ;;  %v891_v39 = vrot.slane %v888_v58, 7  ;;  %v1006_v60 = vpop.permute.xlu2 %1005 }
  0xe9   : > { %v930_v15 = vmul.f32 %v3577_v57, %v909_v36  ;;  %v878_v3 = vmul.f32 %v3614_v31, %v875_v38  ;;  %v900_v28 = vrot.slane %v897_v63, 7  ;;  %v911_v48 = vmul.f32 %v3571_v59, %v908_v16 }
  0xea   : > { %v920_v54 = vmul.f32 %v3574_v7, %v908_v16  ;;  %v887_v51 = vmul.f32 %v3617_v1, %v875_v38  ;;  %v929_v36 = vmul.f32 %v3577_v57, %v908_v16  ;;  %v896_v63 = vmul.f32 %v3665_v10, %v875_v38 }
  0xeb   : > { %v883_v58 = vsel %vm315_vm1, %v878_v3, %v882_v6  ;;  %v915_v59 = vrot.slane %v912_v29, 7  ;;  %v859_v7 = vadd.f32 %v3607_v5, %v836_v20  ;;  %v862_v1 = vadd.f32 %v3611_v21, %v845_v22 }
  0xec   : > { %v940_v26 = vpop.permute.xlu1 %939  ;;  %v938_v30 = vpop.permute.xlu0 %937  ;;  %v892_v56 = vsel %vm315_vm1, %v887_v51, %v891_v39  ;;  %v924_v4 = vrot.slane %v921_v2, 7  ;;  %v933_v27 = vrot.slane %v930_v15, 7  ;;  %v901_v16 = vsel %vm315_vm1, %v896_v63, %v900_v28 }
  0xed   : > { %v942_v19 = vsel %vm375_vm0, %v940_v26, %v938_v30  ;;  %v941_v6 = vsel %vm375_vm0, %v938_v30, %v940_v26  ;;  %v865_v38 = vadd.f32 %v3634_v24, %v854_v8  ;;  %v885_v3 = vadd.f32 %v883_v58, %v859_v7 }
  0xee   : > { %v945_v23 = vmul.f32 %v3673_v17, %v942_v19  ;;  %v954_v31 = vmul.f32 %v3679_v25, %v942_v19  ;;  %v894_v10 = vadd.f32 %v892_v56, %v862_v1  ;;  %v963_v5 = vmul.f32 %v3683_v9, %v942_v19 }
  0xef   : > { %v3752_v21 = vstv %s3712_s19  ;;  %v3755_v20 = vstv %s3721_s20  ;;  %v903_v22 = vadd.f32 %v901_v16, %v865_v38  ;;  %v944_v2 = vmul.f32 %v3673_v17, %v941_v6 }
  0xf0   : > { %v948_v57 = vrot.slane %v945_v23, 7  ;;  %v957_v29 = vrot.slane %v954_v31, 7  ;;  %5013 = vst [vmem:[#allocation71_spill] sm:$0xff] %v3752_v21  ;;  %v953_v39 = vmul.f32 %v3679_v25, %v941_v6  ;;  %v3760_v24 = vstv %s3725_s21 }
  0xf1   : > { %5014 = vst [vmem:[#allocation72_spill] sm:$0xff] %v3755_v20  ;;  %v916_v7 = vsel %vm315_vm1, %v911_v48, %v915_v59  ;;  %v925_v56 = vsel %vm315_vm1, %v920_v54, %v924_v4  ;;  %v934_v31 = vsel %vm315_vm1, %v929_v36, %v933_v27  ;;  %v3766_v1 = vstv %s3731_s23 }
  0xf2   : > { %v918_v8 = vadd.f32 %v916_v7, %v885_v3  ;;  %v949_v15 = vsel %vm315_vm1, %v944_v2, %v948_v57  ;;  %v958_v28 = vsel %vm315_vm1, %v953_v39, %v957_v29  ;;  %v3773_v19 = vstv %s3737_s24 }
  0xf3   : > { %v927_v51 = vadd.f32 %v925_v56, %v894_v10  ;;  %v966_v23 = vrot.slane %v963_v5, 7  ;;  %v936_v4 = vadd.f32 %v934_v31, %v903_v22  ;;  %v962_v57 = vmul.f32 %v3683_v9, %v941_v6  ;;  %v3787_v10 = vpop.permute.xlu2 %1069 }
  0xf4   : > { %v1004_v26 = vpop.permute.xlu1 %1003  ;;  %v973_v30 = vpop.permute.xlu0 %972  ;;  %v951_v36 = vadd.f32 %v949_v15, %v918_v8 }
  0xf5   : > { %v1008_v59 = vsel %vm443_vm5, %v1006_v60, %v1004_v26  ;;  %v975_v27 = vsel %vm409_vm4, %v973_v30, %v3670_v50  ;;  %v974_v48 = vsel %vm409_vm4, %v3670_v50, %v973_v30  ;;  %v960_v58 = vadd.f32 %v958_v28, %v927_v51 }
  0xf6   : > { %v978_v54 = vmul.f32 %v3706_v55, %v975_v27  ;;  %v1007_v63 = vsel %vm443_vm5, %v1004_v26, %v1006_v60  ;;  %v987_v16 = vmul.f32 %v3715_v53, %v975_v27  ;;  %v1011_v6 = vmul.f32 %v3686_v0, %v1008_v59 }
  0xf7   : > { %v1020_v38 = vmul.f32 %v3689_v37, %v1008_v59  ;;  %v996_v3 = vmul.f32 %v3752_v21, %v975_v27  ;;  %v967_v29 = vsel %vm315_vm1, %v962_v57, %v966_v23  ;;  %v1029_v5 = vmul.f32 %v3694_v18, %v1008_v59 }
  0xf8   : > { %v981_v50 = vrot.slane %v978_v54, 7  ;;  %v977_v22 = vmul.f32 %v3706_v55, %v974_v48  ;;  %v990_v60 = vrot.slane %v987_v16, 7  ;;  %v1010_v2 = vmul.f32 %v3686_v0, %v1007_v63 }
  0xf9   : > { %v1019_v39 = vmul.f32 %v3689_v37, %v1007_v63  ;;  %v986_v26 = vmul.f32 %v3715_v53, %v974_v48  ;;  %v999_v30 = vrot.slane %v996_v3, 7  ;;  %v1028_v31 = vmul.f32 %v3694_v18, %v1007_v63 }
  0xfa   : > { %v982_v8 = vsel %vm315_vm1, %v977_v22, %v981_v50  ;;  %v995_v15 = vmul.f32 %v3752_v21, %v974_v48  ;;  %v1014_v51 = vrot.slane %v1011_v6, 7  ;;  %v1023_v23 = vrot.slane %v1020_v38, 7 }
  0xfb   : > { %v991_v59 = vsel %vm315_vm1, %v986_v26, %v990_v60  ;;  %v1032_v57 = vrot.slane %v1029_v5, 7  ;;  %v969_v16 = vadd.f32 %v967_v29, %v936_v4  ;;  %v984_v50 = vadd.f32 %v982_v8, %v951_v36 }
  0xfc   : > { %v1039_v7 = vpop.permute.xlu1 %1038  ;;  %v1037_v56 = vpop.permute.xlu0 %1036  ;;  %v1000_v54 = vsel %vm315_vm1, %v995_v15, %v999_v30  ;;  %v993_v38 = vadd.f32 %v991_v59, %v960_v58  ;;  %v3820_v22 = vstv %s3770_s25  ;;  %v3823_v60 = vstv %s3780_s7 }
  0xfd   : > { %v1041_v28 = vsel %vm477_vm6, %v1039_v7, %v1037_v56  ;;  %v1040_v63 = vsel %vm477_vm6, %v1037_v56, %v1039_v7  ;;  %5015 = vst [vmem:[#allocation73_spill] sm:$0xff] %v3823_v60  ;;  %v3826_v26 = vstv %s3789_s8  ;;  %v1002_v5 = vadd.f32 %v1000_v54, %v969_v16  ;;  %v1105_v15 = vpop.permute.xlu2 %1104 }
  0xfe   : > { %v1044_v27 = vmul.f32 %v3755_v20, %v1041_v28  ;;  %v1053_v48 = vmul.f32 %v3760_v24, %v1041_v28  ;;  %v1062_v6 = vmul.f32 %v3766_v1, %v1041_v28  ;;  %5016 = vst [vmem:[#allocation74_spill] sm:$0xff] %v3826_v26  ;;  %v1043_v30 = vmul.f32 %v3755_v20, %v1040_v63 }
  0xff   : > { %v3830_v18 = vstv %s3794_s9  ;;  %v3833_v7 = vstv %s3799_s10  ;;  %v1015_v4 = vsel %vm315_vm1, %v1010_v2, %v1014_v51  ;;  %v1024_v36 = vsel %vm315_vm1, %v1019_v39, %v1023_v23 }
 0x100   : > { %v1047_v3 = vrot.slane %v1044_v27, 7  ;;  %v1033_v58 = vsel %vm315_vm1, %v1028_v31, %v1032_v57  ;;  %v1056_v29 = vrot.slane %v1053_v48, 7  ;;  %v1017_v56 = vadd.f32 %v1015_v4, %v984_v50 }
 0x101   : > { %v1052_v28 = vmul.f32 %v3760_v24, %v1040_v63  ;;  %v1065_v59 = vrot.slane %v1062_v6, 7  ;;  %v1026_v16 = vadd.f32 %v1024_v36, %v993_v38  ;;  %v1061_v20 = vmul.f32 %v3766_v1, %v1040_v63 }
 0x102   : > { %v1048_v8 = vsel %vm315_vm1, %v1043_v30, %v1047_v3  ;;  %v1035_v39 = vadd.f32 %v1033_v58, %v1002_v5 }
 0x103   : > { %v1050_v57 = vadd.f32 %v1048_v8, %v1017_v56  ;;  %v1057_v48 = vsel %vm315_vm1, %v1052_v28, %v1056_v29  ;;  %v1066_v3 = vsel %vm315_vm1, %v1061_v20, %v1065_v59 }
 0x104   : > { %v1103_v27 = vpop.permute.xlu1 %1102  ;;  %v1072_v54 = vpop.permute.xlu0 %1071 }
 0x105   : > { %v1106_v37 = vsel %vm545_vm8, %v1103_v27, %v1105_v15  ;;  %v1107_v2 = vsel %vm545_vm8, %v1105_v15, %v1103_v27  ;;  %v1073_v23 = vsel %vm511_vm7, %v3787_v10, %v1072_v54  ;;  %v1074_v50 = vsel %vm511_vm7, %v1072_v54, %v3787_v10 }
 0x106   : > { %v1110_v31 = vmul.f32 %v3773_v19, %v1107_v2  ;;  %v1119_v51 = vmul.f32 %v3820_v22, %v1107_v2  ;;  %v1128_v63 = vmul.f32 %v3823_v60, %v1107_v2  ;;  %v1109_v6 = vmul.f32 %v3773_v19, %v1106_v37 }
 0x107   : > { %v1118_v38 = vmul.f32 %v3820_v22, %v1106_v37  ;;  %v1077_v5 = vmul.f32 %v3826_v26, %v1074_v50  ;;  %v1127_v30 = vmul.f32 %v3823_v60, %v1106_v37  ;;  %v1076_v15 = vmul.f32 %v3826_v26, %v1073_v23 }
 0x108   : > { %v1086_v4 = vmul.f32 %v3830_v18, %v1074_v50  ;;  %v1095_v36 = vmul.f32 %v3833_v7, %v1074_v50  ;;  %v1113_v58 = vrot.slane %v1110_v31, 7  ;;  %v1122_v29 = vrot.slane %v1119_v51, 7 }
 0x109   : > { %v1080_v56 = vrot.slane %v1077_v5, 7  ;;  %v1085_v10 = vmul.f32 %v3830_v18, %v1073_v23  ;;  %v1131_v20 = vrot.slane %v1128_v63, 7  ;;  %v1094_v28 = vmul.f32 %v3833_v7, %v1073_v23 }
 0x10a   : > { %v1089_v8 = vrot.slane %v1086_v4, 7  ;;  %v1098_v59 = vrot.slane %v1095_v36, 7  ;;  %v1059_v27 = vadd.f32 %v1057_v48, %v1026_v16  ;;  %v1068_v54 = vadd.f32 %v1066_v3, %v1035_v39 }
 0x10b   : > { %v1081_v37 = vsel %vm315_vm1, %v1076_v15, %v1080_v56  ;;  %v1114_v31 = vsel %vm315_vm1, %v1109_v6, %v1113_v58  ;;  %v5017_v51 = vlaneseq  ;;  %v1123_v23 = vsel %vm315_vm1, %v1118_v38, %v1122_v29 }
 0x10c   : > { %v1083_v2 = vadd.f32 %v1081_v37, %v1050_v57  ;;  %v1090_v26 = vsel %vm315_vm1, %v1085_v10, %v1089_v8  ;;  %v1099_v60 = vsel %vm315_vm1, %v1094_v28, %v1098_v59  ;;  %v1132_v16 = vsel %vm315_vm1, %v1127_v30, %v1131_v20 }
 0x10d   : > { %vm3870_vm9 = vcmp.lt.s32.totalorder %v5017_v51, 256  ;;  %v1092_v63 = vadd.f32 %v1090_v26, %v1059_v27  ;;  %v1101_v5 = vadd.f32 %v1099_v60, %v1068_v54 }
 0x10e   : > { %v1116_v39 = vadd.f32 %v1114_v31, %v1083_v2 }
 0x10f   : > { %v1125_v48 = vadd.f32 %v1123_v23, %v1092_v63  ;;  %v1134_v57 = vadd.f32 %v1132_v16, %v1101_v5 }
 0x110   : > { %1139 = vst.msk [vmem:[#allocation2] ss:$4 sm:$0x3] %vm3870_vm9, %v1116_v39 }
 0x111   : > { %1141 = vst.msk [vmem:[#allocation2 + $0x1] ss:$4 sm:$0x3] %vm3870_vm9, %v1125_v48 }
 0x112   : > { %1143 = vst.msk [vmem:[#allocation2 + $0x2] ss:$4 sm:$0x3] %vm3870_vm9, %v1134_v57 }
 0x117   : > { %v3882_v3 = vld [vmem:[#allocation2] ss:$4 sm:$0x3] }
 0x118   : > { %v1153_v60 = vperm.slane %v3882_v3, 1  ;;  %v1152_v26 = vperm.slane %v3882_v3, 0  ;;  %v3901_v6 = vld [vmem:[#allocation2 + $0x1] ss:$4 sm:$0x3]  ;;  %v1145_v28 = vmul.f32 %v3882_v3, %v3100_v33  ;;  %v1147_v59 = vmul.f32 %v3882_v3, %v3102_v34 }
 0x119   : > { %v1404_v38 = vperm.slane %v3901_v6, 0  ;;  %v1405_v30 = vperm.slane %v3901_v6, 1  ;;  %v3920_v15 = vld [vmem:[#allocation2 + $0x2] ss:$4 sm:$0x3]  ;;  %v1149_v37 = vmul.f32 %v3882_v3, %v3104_v35 }
 0x11a   : > { %1158 = vrot.lane.b32.xlu1 %v1153_v60, %s2932_s27  ;;  %1186 = vrot.lane.b32.xlu2 %v1152_v26, %s2931_s26  ;;  %v1656_v4 = vperm.slane %v3920_v15, 0  ;;  %v1657_v36 = vperm.slane %v3920_v15, 1  ;;  %v1146_v39 = vadd.f32 %v1145_v28, %v3116_v40  ;;  %v1148_v48 = vadd.f32 %v1147_v59, %v3118_v41 }
 0x11b   : > { %1156 = vrot.lane.b32.xlu0 %v1152_v26, %s2932_s27  ;;  %v1150_v3 = vadd.f32 %v1149_v37, %v3120_v42 }
 0x122   : > { %1216 = vrot.lane.b32.xlu1 %v1152_v26, %s2933_s28  ;;  %1218 = vrot.lane.b32.xlu2 %v1153_v60, %s2933_s28 }
 0x123   : > { %1188 = vrot.lane.b32.xlu0 %v1153_v60, %s2931_s26 }
 0x12a   : > { %1248 = vrot.lane.b32.xlu1 %v1153_v60, %s2934_s29  ;;  %1276 = vrot.lane.b32.xlu2 %v1152_v26, %s2935_s30 }
 0x12b   : > { %1246 = vrot.lane.b32.xlu0 %v1152_v26, %s2934_s29 }
 0x132   : > { %1306 = vrot.lane.b32.xlu1 %v1152_v26, %s2936_s4  ;;  %1308 = vrot.lane.b32.xlu2 %v1153_v60, %s2936_s4 }
 0x133   : > { %1278 = vrot.lane.b32.xlu0 %v1153_v60, %s2935_s30 }
 0x13a   : > { %1338 = vrot.lane.b32.xlu1 %v1153_v60, %s2937_s5  ;;  %1366 = vrot.lane.b32.xlu2 %v1152_v26, %s2938_s6 }
 0x13b   : > { %1336 = vrot.lane.b32.xlu0 %v1152_v26, %s2937_s5 }
 0x142   : > { %1408 = vrot.lane.b32.xlu1 %v1404_v38, %s2932_s27  ;;  %1410 = vrot.lane.b32.xlu2 %v1405_v30, %s2932_s27 }
 0x143   : > { %1368 = vrot.lane.b32.xlu0 %v1153_v60, %s2938_s6 }
 0x14a   : > { %1440 = vrot.lane.b32.xlu1 %v1405_v30, %s2931_s26  ;;  %1468 = vrot.lane.b32.xlu2 %v1404_v38, %s2933_s28 }
 0x14b   : > { %1438 = vrot.lane.b32.xlu0 %v1404_v38, %s2931_s26 }
 0x152   : > { %1498 = vrot.lane.b32.xlu1 %v1404_v38, %s2934_s29  ;;  %1500 = vrot.lane.b32.xlu2 %v1405_v30, %s2934_s29 }
 0x153   : > { %1470 = vrot.lane.b32.xlu0 %v1405_v30, %s2933_s28 }
 0x15a   : > { %1530 = vrot.lane.b32.xlu1 %v1405_v30, %s2935_s30  ;;  %1558 = vrot.lane.b32.xlu2 %v1404_v38, %s2936_s4 }
 0x15b   : > { %1528 = vrot.lane.b32.xlu0 %v1404_v38, %s2935_s30 }
 0x162   : > { %1588 = vrot.lane.b32.xlu1 %v1404_v38, %s2937_s5  ;;  %1590 = vrot.lane.b32.xlu2 %v1405_v30, %s2937_s5 }
 0x163   : > { %1560 = vrot.lane.b32.xlu0 %v1405_v30, %s2936_s4 }
 0x16a   : > { %1620 = vrot.lane.b32.xlu1 %v1405_v30, %s2938_s6  ;;  %1660 = vrot.lane.b32.xlu2 %v1656_v4, %s2932_s27 }
 0x16b   : > { %1618 = vrot.lane.b32.xlu0 %v1404_v38, %s2938_s6 }
 0x172   : > { %1690 = vrot.lane.b32.xlu1 %v1656_v4, %s2931_s26  ;;  %1692 = vrot.lane.b32.xlu2 %v1657_v36, %s2931_s26 }
 0x173   : > { %1662 = vrot.lane.b32.xlu0 %v1657_v36, %s2932_s27 }
 0x174   : > { %v1187_v58 = vpop.permute.xlu2 %1186 }
 0x17a   : > { %1722 = vrot.lane.b32.xlu1 %v1657_v36, %s2933_s28  ;;  %1750 = vrot.lane.b32.xlu2 %v1656_v4, %s2934_s29 }
 0x17b   : > { %1720 = vrot.lane.b32.xlu0 %v1656_v4, %s2933_s28 }
 0x17c   : > { %v1219_v29 = vpop.permute.xlu2 %1218 }
 0x182   : > { %1780 = vrot.lane.b32.xlu1 %v1656_v4, %s2935_s30  ;;  %1782 = vrot.lane.b32.xlu2 %v1657_v36, %s2935_s30 }
 0x183   : > { %1752 = vrot.lane.b32.xlu0 %v1657_v36, %s2934_s29 }
 0x184   : > { %v3936_v56 = vpop.permute.xlu2 %1276 }
 0x18a   : > { %1812 = vrot.lane.b32.xlu1 %v1657_v36, %s2936_s4  ;;  %1840 = vrot.lane.b32.xlu2 %v1656_v4, %s2937_s5 }
 0x18b   : > { %1810 = vrot.lane.b32.xlu0 %v1656_v4, %s2936_s4 }
 0x18c   : > { %v1159_v10 = vpop.permute.xlu1 %1158  ;;  %v3941_v20 = vpop.permute.xlu2 %1308 }
 0x18d   : > { %v1157_v8 = vpop.permute.xlu0 %1156 }
 0x18e   : > { %v1160_v27 = vsel %vm306_vm3, %v1157_v8, %v1159_v10  ;;  %v1161_v54 = vsel %vm306_vm3, %v1159_v10, %v1157_v8 }
 0x18f   : > { %v1163_v2 = vmul.f32 %v1161_v54, %v3136_v46  ;;  %v1171_v31 = vmul.f32 %v1161_v54, %v3138_v47  ;;  %v1179_v51 = vmul.f32 %v1161_v54, %v3144_v49  ;;  %v1162_v63 = vmul.f32 %v1160_v27, %v3136_v46 }
 0x190   : > { %v1170_v23 = vmul.f32 %v1160_v27, %v3138_v47  ;;  %v1178_v57 = vmul.f32 %v1160_v27, %v3144_v49 }
 0x191   : > { %v1166_v5 = vrot.slane %v1163_v2, 7  ;;  %v1174_v16 = vrot.slane %v1171_v31, 7  ;;  %v1182_v60 = vrot.slane %v1179_v51, 7 }
 0x192   : > { %1870 = vrot.lane.b32.xlu1 %v1656_v4, %s2938_s6  ;;  %1872 = vrot.lane.b32.xlu2 %v1657_v36, %s2938_s6 }
 0x193   : > { %v1167_v26 = vsel %vm315_vm1, %v1162_v63, %v1166_v5  ;;  %v1175_v38 = vsel %vm315_vm1, %v1170_v23, %v1174_v16  ;;  %1842 = vrot.lane.b32.xlu0 %v1657_v36, %s2937_s5  ;;  %v1183_v8 = vsel %vm315_vm1, %v1178_v57, %v1182_v60 }
 0x194   : > { %v1169_v30 = vadd.f32 %v1167_v26, %v1146_v39  ;;  %v1177_v10 = vadd.f32 %v1175_v38, %v1148_v48  ;;  %v1217_v28 = vpop.permute.xlu1 %1216  ;;  %v1185_v59 = vadd.f32 %v1183_v8, %v1150_v3  ;;  %v3974_v31 = vpop.permute.xlu2 %1366 }
 0x195   : > { %v1220_v27 = vsel %vm375_vm0, %v1217_v28, %v1219_v29  ;;  %v1221_v4 = vsel %vm375_vm0, %v1219_v29, %v1217_v28  ;;  %v1189_v54 = vpop.permute.xlu0 %1188 }
 0x196   : > { %v1223_v37 = vmul.f32 %v1221_v4, %v3057_v12  ;;  %v1231_v2 = vmul.f32 %v1221_v4, %v3059_v13  ;;  %v1222_v36 = vmul.f32 %v1220_v27, %v3057_v12  ;;  %v1239_v51 = vmul.f32 %v1221_v4, %v3061_v14  ;;  %v5031_v12 = vld [vmem:[#allocation30_spill] sm:$0xff] }
 0x197   : > { %v1190_v63 = vsel %vm341_vm2, %v1187_v58, %v1189_v54  ;;  %v1191_v5 = vsel %vm341_vm2, %v1189_v54, %v1187_v58  ;;  %v1230_v29 = vmul.f32 %v1220_v27, %v3059_v13  ;;  %v1238_v48 = vmul.f32 %v1220_v27, %v3061_v14 }
 0x198   : > { %v1226_v23 = vrot.slane %v1223_v37, 7  ;;  %v1234_v16 = vrot.slane %v1231_v2, 7  ;;  %v1193_v39 = vmul.f32 %v1191_v5, %v3128_v43  ;;  %v1242_v57 = vrot.slane %v1239_v51, 7 }
 0x199   : > { %v1192_v60 = vmul.f32 %v1190_v63, %v3128_v43  ;;  %v1201_v3 = vmul.f32 %v1191_v5, %v3131_v44  ;;  %v1209_v58 = vmul.f32 %v1191_v5, %v3134_v45  ;;  %v1200_v4 = vmul.f32 %v1190_v63, %v3131_v44 }
 0x19a   : > { %v1227_v26 = vsel %vm315_vm1, %v1222_v36, %v1226_v23  ;;  %v1235_v38 = vsel %vm315_vm1, %v1230_v29, %v1234_v16  ;;  %v1196_v8 = vrot.slane %v1193_v39, 7  ;;  %v1243_v28 = vsel %vm315_vm1, %v1238_v48, %v1242_v57 }
 0x19b   : > { %v1204_v54 = vrot.slane %v1201_v3, 7  ;;  %v1208_v27 = vmul.f32 %v1190_v63, %v3134_v45  ;;  %v1212_v2 = vrot.slane %v1209_v58, 7 }
 0x19c   : > { %v1197_v37 = vsel %vm315_vm1, %v1192_v60, %v1196_v8  ;;  %v1249_v51 = vpop.permute.xlu1 %1248  ;;  %v4001_v63 = vpop.permute.xlu2 %1410  ;;  %v5020_v8 = vld [vmem:[#allocation18_spill] sm:$0xff] }
 0x19d   : > { %v1199_v43 = vadd.f32 %v1197_v37, %v1169_v30  ;;  %v1205_v14 = vsel %vm315_vm1, %v1200_v4, %v1204_v54  ;;  %v1247_v36 = vpop.permute.xlu0 %1246  ;;  %v1213_v29 = vsel %vm315_vm1, %v1208_v27, %v1212_v2 }
 0x19e   : > { %v1207_v23 = vadd.f32 %v1205_v14, %v1177_v10  ;;  %v1250_v5 = vsel %vm409_vm4, %v1247_v36, %v1249_v51  ;;  %v1251_v16 = vsel %vm409_vm4, %v1249_v51, %v1247_v36  ;;  %v1215_v39 = vadd.f32 %v1213_v29, %v1185_v59 }
 0x19f   : > { %v1229_v48 = vadd.f32 %v1227_v26, %v1199_v43  ;;  %v1253_v57 = vmul.f32 %v1251_v16, %v3165_v61  ;;  %v1261_v30 = vmul.f32 %v1251_v16, %v3189_v32  ;;  %v1252_v14 = vmul.f32 %v1250_v5, %v3165_v61 }
 0x1a0   : > { %v1237_v60 = vadd.f32 %v1235_v38, %v1207_v23  ;;  %v1245_v3 = vadd.f32 %v1243_v28, %v1215_v39  ;;  %v1269_v58 = vmul.f32 %v1251_v16, %v5020_v8  ;;  %v1260_v4 = vmul.f32 %v1250_v5, %v3189_v32  ;;  %v5021_v16 = vld [vmem:[#allocation19_spill] sm:$0xff]  ;;  %v5022_v39 = vld [vmem:[#allocation20_spill] sm:$0xff] }
 0x1a1   : > { %v1256_v10 = vrot.slane %v1253_v57, 7  ;;  %v1264_v54 = vrot.slane %v1261_v30, 7  ;;  %v1268_v43 = vmul.f32 %v1250_v5, %v5020_v8  ;;  %v5023_v30 = vld [vmem:[#allocation21_spill] sm:$0xff] }
 0x1a2   : > { %v1272_v59 = vrot.slane %v1269_v58, 7 }
 0x1a3   : > { %v1257_v37 = vsel %vm315_vm1, %v1252_v14, %v1256_v10  ;;  %v1265_v27 = vsel %vm315_vm1, %v1260_v4, %v1264_v54 }
 0x1a4   : > { %v1259_v26 = vadd.f32 %v1257_v37, %v1229_v48  ;;  %v1307_v38 = vpop.permute.xlu1 %1306  ;;  %v1267_v2 = vadd.f32 %v1265_v27, %v1237_v60  ;;  %v1273_v28 = vsel %vm315_vm1, %v1268_v43, %v1272_v59  ;;  %v4019_v57 = vpop.permute.xlu2 %1468 }
 0x1a5   : > { %v1279_v51 = vpop.permute.xlu0 %1278  ;;  %v1275_v36 = vadd.f32 %v1273_v28, %v1245_v3  ;;  %v1311_v4 = vsel %vm477_vm6, %v3941_v20, %v1307_v38 }
 0x1a6   : > { %v1280_v23 = vsel %vm443_vm5, %v3936_v56, %v1279_v51  ;;  %v1281_v29 = vsel %vm443_vm5, %v1279_v51, %v3936_v56 }
 0x1a7   : > { %v1283_v5 = vmul.f32 %v1281_v29, %v5021_v16  ;;  %v1291_v48 = vmul.f32 %v1281_v29, %v5022_v39  ;;  %v1299_v60 = vmul.f32 %v1281_v29, %v5023_v30  ;;  %v1282_v14 = vmul.f32 %v1280_v23, %v5021_v16 }
 0x1a8   : > { %v1290_v3 = vmul.f32 %v1280_v23, %v5022_v39  ;;  %v1298_v56 = vmul.f32 %v1280_v23, %v5023_v30  ;;  %v5026_v23 = vld [vmem:[#allocation24_spill] sm:$0xff] }
 0x1a9   : > { %v1286_v10 = vrot.slane %v1283_v5, 7  ;;  %v1294_v58 = vrot.slane %v1291_v48, 7  ;;  %v1302_v54 = vrot.slane %v1299_v60, 7  ;;  %v5024_v5 = vld [vmem:[#allocation22_spill] sm:$0xff]  ;;  %v5025_v48 = vld [vmem:[#allocation23_spill] sm:$0xff]  ;;  %v1329_v60 = vmul.f32 %v1311_v4, %v5026_v23 }
 0x1aa   : > { %v1313_v39 = vmul.f32 %v1311_v4, %v5024_v5  ;;  %v1321_v16 = vmul.f32 %v1311_v4, %v5025_v48 }
 0x1ab   : > { %v1287_v43 = vsel %vm315_vm1, %v1282_v14, %v1286_v10  ;;  %v1295_v59 = vsel %vm315_vm1, %v1290_v3, %v1294_v58  ;;  %v1303_v29 = vsel %vm315_vm1, %v1298_v56, %v1302_v54  ;;  %v1310_v14 = vsel %vm477_vm6, %v1307_v38, %v3941_v20  ;;  %v5027_v10 = vld [vmem:[#allocation25_spill] sm:$0xff]  ;;  %v5029_v54 = vld [vmem:[#allocation27_spill] sm:$0xff] }
 0x1ac   : > { %v1339_v37 = vpop.permute.xlu1 %1338  ;;  %v1289_v28 = vadd.f32 %v1287_v43, %v1259_v26  ;;  %v1297_v51 = vadd.f32 %v1295_v59, %v1267_v2  ;;  %v1305_v8 = vadd.f32 %v1303_v29, %v1275_v36  ;;  %v5028_v26 = vld [vmem:[#allocation26_spill] sm:$0xff]  ;;  %v1316_v58 = vrot.slane %v1313_v39, 7  ;;  %v4042_v30 = vpop.permute.xlu2 %1500  ;;  %v5030_v39 = vld [vmem:[#allocation29_spill] sm:$0xff] }
 0x1ad   : > { %v1337_v27 = vpop.permute.xlu0 %1336  ;;  %v1324_v56 = vrot.slane %v1321_v16, 7  ;;  %v1332_v59 = vrot.slane %v1329_v60, 7  ;;  %v1312_v29 = vmul.f32 %v1310_v14, %v5024_v5  ;;  %v1320_v4 = vmul.f32 %v1310_v14, %v5025_v48 }
 0x1ae   : > { %v1341_v32 = vsel %vm511_vm7, %v1339_v37, %v1337_v27  ;;  %v1340_v61 = vsel %vm511_vm7, %v1337_v27, %v1339_v37  ;;  %v1328_v38 = vmul.f32 %v1310_v14, %v5026_v23  ;;  %v1397_v16 = vmul.f32 %v3901_v6, %v5030_v39 }
 0x1af   : > { %v1343_v3 = vmul.f32 %v1341_v32, %v5027_v10  ;;  %v1351_v2 = vmul.f32 %v1341_v32, %v5028_v26  ;;  %v1359_v43 = vmul.f32 %v1341_v32, %v5029_v54  ;;  %v1317_v32 = vsel %vm315_vm1, %v1312_v29, %v1316_v58  ;;  %v5032_v29 = vld [vmem:[#allocation34_spill] sm:$0xff] }
 0x1b0   : > { %v1325_v60 = vsel %vm315_vm1, %v1320_v4, %v1324_v56  ;;  %v1399_v5 = vmul.f32 %v3901_v6, %v5031_v12  ;;  %v1333_v48 = vsel %vm315_vm1, %v1328_v38, %v1332_v59  ;;  %v1342_v37 = vmul.f32 %v1340_v61, %v5027_v10  ;;  %v5033_v38 = vld [vmem:[#allocation35_spill] sm:$0xff] }
 0x1b1   : > { %v1346_v45 = vrot.slane %v1343_v3, 7  ;;  %v1354_v44 = vrot.slane %v1351_v2, 7  ;;  %v1362_v13 = vrot.slane %v1359_v43, 7  ;;  %v1350_v27 = vmul.f32 %v1340_v61, %v5028_v26 }
 0x1b2   : > { %v1319_v3 = vadd.f32 %v1317_v32, %v1289_v28  ;;  %v1327_v2 = vadd.f32 %v1325_v60, %v1297_v51  ;;  %v1358_v58 = vmul.f32 %v1340_v61, %v5029_v54  ;;  %v1335_v39 = vadd.f32 %v1333_v48, %v1305_v8  ;;  %v5034_v61 = vld [vmem:[#allocation36_spill] sm:$0xff] }
 0x1b3   : > { %v1347_v43 = vsel %vm315_vm1, %v1342_v37, %v1346_v45  ;;  %v1355_v59 = vsel %vm315_vm1, %v1350_v27, %v1354_v44 }
 0x1b4   : > { %v1409_v36 = vpop.permute.xlu1 %1408  ;;  %v1363_v26 = vsel %vm315_vm1, %v1358_v58, %v1362_v13  ;;  %v1349_v60 = vadd.f32 %v1347_v43, %v1319_v3  ;;  %v1357_v37 = vadd.f32 %v1355_v59, %v1327_v2  ;;  %v5035_v58 = vld [vmem:[#allocation28_spill] sm:$0xff]  ;;  %v4078_v10 = vpop.permute.xlu2 %1558  ;;  %v5036_v2 = vld [vmem:[#allocation33_spill] sm:$0xff] }
 0x1b5   : > { %v1369_v20 = vpop.permute.xlu0 %1368  ;;  %v1413_v28 = vsel %vm306_vm3, %v4001_v63, %v1409_v36  ;;  %v1365_v13 = vadd.f32 %v1363_v26, %v1335_v39  ;;  %v5037_v26 = vld [vmem:[#allocation31_spill] sm:$0xff]  ;;  %v5038_v59 = vld [vmem:[#allocation32_spill] sm:$0xff] }
 0x1b6   : > { %v1371_v14 = vsel %vm545_vm8, %v1369_v20, %v3974_v31  ;;  %v1370_v56 = vsel %vm545_vm8, %v3974_v31, %v1369_v20  ;;  %v1415_v54 = vmul.f32 %v1413_v28, %v5035_v58  ;;  %v1423_v39 = vmul.f32 %v1413_v28, %v5037_v26 }
 0x1b7   : > { %v1373_v4 = vmul.f32 %v1371_v14, %v5032_v29  ;;  %v1381_v12 = vmul.f32 %v1371_v14, %v5033_v38  ;;  %v1389_v51 = vmul.f32 %v1371_v14, %v5034_v61  ;;  %v1372_v32 = vmul.f32 %v1370_v56, %v5032_v29 }
 0x1b8   : > { %v1380_v45 = vmul.f32 %v1370_v56, %v5033_v38  ;;  %v1388_v27 = vmul.f32 %v1370_v56, %v5034_v61  ;;  %v1401_v56 = vmul.f32 %v3901_v6, %v5036_v2 }
 0x1b9   : > { %v1376_v31 = vrot.slane %v1373_v4, 7  ;;  %v1384_v20 = vrot.slane %v1381_v12, 7  ;;  %v1392_v8 = vrot.slane %v1389_v51, 7  ;;  %v1431_v51 = vmul.f32 %v1413_v28, %v5038_v59 }
 0x1bb   : > { %v1377_v14 = vsel %vm315_vm1, %v1372_v32, %v1376_v31  ;;  %v1385_v29 = vsel %vm315_vm1, %v1380_v45, %v1384_v20  ;;  %v1393_v12 = vsel %vm315_vm1, %v1388_v27, %v1392_v8  ;;  %v1412_v32 = vsel %vm306_vm3, %v1409_v36, %v4001_v63  ;;  %v5039_v31 = vld [vmem:[#allocation37_spill] sm:$0xff]  ;;  %v5040_v20 = vld [vmem:[#allocation38_spill] sm:$0xff]  ;;  %v5041_v27 = vld [vmem:[#allocation39_spill] sm:$0xff] }
 0x1bc   : > { %v1441_v44 = vpop.permute.xlu1 %1440  ;;  %v1379_v4 = vadd.f32 %v1377_v14, %v1349_v60  ;;  %v1387_v23 = vadd.f32 %v1385_v29, %v1357_v37  ;;  %v1395_v43 = vadd.f32 %v1393_v12, %v1365_v13  ;;  %v1418_v37 = vrot.slane %v1415_v54, 7  ;;  %v4101_v54 = vpop.permute.xlu2 %1590 }
 0x1bd   : > { %v1439_v48 = vpop.permute.xlu0 %1438  ;;  %v1414_v13 = vmul.f32 %v1412_v32, %v5035_v58  ;;  %v1426_v14 = vrot.slane %v1423_v39, 7  ;;  %v1434_v12 = vrot.slane %v1431_v51, 7  ;;  %v1422_v36 = vmul.f32 %v1412_v32, %v5037_v26 }
 0x1be   : > { %v1443_v3 = vsel %vm341_vm2, %v1441_v44, %v1439_v48  ;;  %v1398_v61 = vadd.f32 %v1397_v16, %v1379_v4  ;;  %v1400_v38 = vadd.f32 %v1399_v5, %v1387_v23  ;;  %v1402_v29 = vadd.f32 %v1401_v56, %v1395_v43 }
 0x1bf   : > { %v1445_v45 = vmul.f32 %v1443_v3, %v5039_v31  ;;  %v1453_v60 = vmul.f32 %v1443_v3, %v5040_v20  ;;  %v1461_v8 = vmul.f32 %v1443_v3, %v5041_v27  ;;  %v1442_v5 = vsel %vm341_vm2, %v1439_v48, %v1441_v44 }
 0x1c0   : > { %v1419_v63 = vsel %vm315_vm1, %v1414_v13, %v1418_v37  ;;  %v1430_v4 = vmul.f32 %v1412_v32, %v5038_v59  ;;  %v1444_v3 = vmul.f32 %v1442_v5, %v5039_v31  ;;  %v1452_v56 = vmul.f32 %v1442_v5, %v5040_v20 }
 0x1c1   : > { %v1448_v16 = vrot.slane %v1445_v45, 7  ;;  %v1456_v28 = vrot.slane %v1453_v60, 7  ;;  %v1464_v43 = vrot.slane %v1461_v8, 7  ;;  %v1427_v48 = vsel %vm315_vm1, %v1422_v36, %v1426_v14  ;;  %v5042_v8 = vld [vmem:[#allocation44_spill] sm:$0xff] }
 0x1c2   : > { %v1435_v39 = vsel %vm315_vm1, %v1430_v4, %v1434_v12  ;;  %v1460_v51 = vmul.f32 %v1442_v5, %v5041_v27  ;;  %v1421_v20 = vadd.f32 %v1419_v63, %v1398_v61  ;;  %v1429_v31 = vadd.f32 %v1427_v48, %v1400_v38  ;;  %v5043_v12 = vld [vmem:[#allocation45_spill] sm:$0xff]  ;;  %v5044_v27 = vld [vmem:[#allocation40_spill] sm:$0xff]  ;;  %v5046_v63 = vld [vmem:[#allocation42_spill] sm:$0xff] }
 0x1c3   : > { %v1449_v45 = vsel %vm315_vm1, %v1444_v3, %v1448_v16  ;;  %v1457_v60 = vsel %vm315_vm1, %v1452_v56, %v1456_v28  ;;  %v1437_v36 = vadd.f32 %v1435_v39, %v1402_v29  ;;  %v5045_v61 = vld [vmem:[#allocation41_spill] sm:$0xff] }
 0x1c4   : > { %v1499_v6 = vpop.permute.xlu1 %1498  ;;  %v1465_v4 = vsel %vm315_vm1, %v1460_v51, %v1464_v43  ;;  %v1451_v28 = vadd.f32 %v1449_v45, %v1421_v20  ;;  %v1459_v56 = vadd.f32 %v1457_v60, %v1429_v31  ;;  %v5047_v51 = vld [vmem:[#allocation46_spill] sm:$0xff] }
 0x1c5   : > { %v1471_v23 = vpop.permute.xlu0 %1470  ;;  %v1503_v32 = vsel %vm409_vm4, %v4042_v30, %v1499_v6  ;;  %v1502_v43 = vsel %vm409_vm4, %v1499_v6, %v4042_v30 }
 0x1c6   : > { %v1473_v44 = vsel %vm375_vm0, %v1471_v23, %v4019_v57  ;;  %v1472_v14 = vsel %vm375_vm0, %v4019_v57, %v1471_v23  ;;  %v1505_v59 = vmul.f32 %v1503_v32, %v5044_v27  ;;  %v1513_v38 = vmul.f32 %v1503_v32, %v5045_v61 }
 0x1c7   : > { %v1475_v37 = vmul.f32 %v1473_v44, %v3442_v52  ;;  %v1483_v13 = vmul.f32 %v1473_v44, %v5042_v8  ;;  %v1491_v5 = vmul.f32 %v1473_v44, %v5043_v12  ;;  %v1521_v48 = vmul.f32 %v1503_v32, %v5046_v63  ;;  %v5048_v32 = vld [vmem:[#allocation47_spill] sm:$0xff] }
 0x1c8   : > { %v1474_v57 = vmul.f32 %v1472_v14, %v3442_v52  ;;  %v1467_v23 = vadd.f32 %v1465_v4, %v1437_v36  ;;  %v1482_v20 = vmul.f32 %v1472_v14, %v5042_v8  ;;  %v1490_v31 = vmul.f32 %v1472_v14, %v5043_v12  ;;  %v5049_v36 = vld [vmem:[#allocation48_spill] sm:$0xff] }
 0x1c9   : > { %v1478_v16 = vrot.slane %v1475_v37, 7  ;;  %v1486_v26 = vrot.slane %v1483_v13, 7  ;;  %v1494_v2 = vrot.slane %v1491_v5, 7  ;;  %v1508_v44 = vrot.slane %v1505_v59, 7  ;;  %v4143_v59 = vpop.permute.xlu2 %1660 }
 0x1ca   : > { %v1504_v6 = vmul.f32 %v1502_v43, %v5044_v27  ;;  %v1516_v4 = vrot.slane %v1513_v38, 7  ;;  %v1524_v14 = vrot.slane %v1521_v48, 7 }
 0x1cb   : > { %v1479_v39 = vsel %vm315_vm1, %v1474_v57, %v1478_v16  ;;  %v1487_v37 = vsel %vm315_vm1, %v1482_v20, %v1486_v26  ;;  %v1495_v13 = vsel %vm315_vm1, %v1490_v31, %v1494_v2  ;;  %v1512_v57 = vmul.f32 %v1502_v43, %v5045_v61 }
 0x1cc   : > { %v1531_v3 = vpop.permute.xlu1 %1530  ;;  %v1481_v12 = vadd.f32 %v1479_v39, %v1451_v28  ;;  %v1520_v26 = vmul.f32 %v1502_v43, %v5046_v63  ;;  %v1489_v2 = vadd.f32 %v1487_v37, %v1459_v56  ;;  %v1497_v20 = vadd.f32 %v1495_v13, %v1467_v23 }
 0x1cd   : > { %v1529_v58 = vpop.permute.xlu0 %1528 }
 0x1ce   : > { %v1533_v29 = vsel %vm443_vm5, %v1531_v3, %v1529_v58  ;;  %v1532_v5 = vsel %vm443_vm5, %v1529_v58, %v1531_v3  ;;  %v1525_v28 = vsel %vm315_vm1, %v1520_v26, %v1524_v14  ;;  %v5051_v14 = vld [vmem:[#allocation50_spill] sm:$0xff]  ;;  %v5052_v26 = vld [vmem:[#allocation52_spill] sm:$0xff] }
 0x1cf   : > { %v1535_v45 = vmul.f32 %v1533_v29, %v5047_v51  ;;  %v1543_v60 = vmul.f32 %v1533_v29, %v5048_v32  ;;  %v1551_v30 = vmul.f32 %v1533_v29, %v5049_v36  ;;  %v1534_v58 = vmul.f32 %v1532_v5, %v5047_v51 }
 0x1d0   : > { %v1509_v29 = vsel %vm315_vm1, %v1504_v6, %v1508_v44  ;;  %v1542_v38 = vmul.f32 %v1532_v5, %v5048_v32  ;;  %v1550_v48 = vmul.f32 %v1532_v5, %v5049_v36  ;;  %v1527_v5 = vadd.f32 %v1525_v28, %v1497_v20  ;;  %v5053_v20 = vld [vmem:[#allocation53_spill] sm:$0xff] }
 0x1d1   : > { %v1538_v16 = vrot.slane %v1535_v45, 7  ;;  %v1546_v8 = vrot.slane %v1543_v60, 7  ;;  %v1554_v52 = vrot.slane %v1551_v30, 7  ;;  %v1517_v45 = vsel %vm315_vm1, %v1512_v57, %v1516_v4  ;;  %v5050_v60 = vld [vmem:[#allocation49_spill] sm:$0xff] }
 0x1d2   : > { %v1511_v23 = vadd.f32 %v1509_v29, %v1481_v12  ;;  %v1519_v13 = vadd.f32 %v1517_v45, %v1489_v2  ;;  %v4176_v45 = vpop.permute.xlu2 %1692 }
 0x1d3   : > { %v1539_v39 = vsel %vm315_vm1, %v1534_v58, %v1538_v16  ;;  %v1547_v43 = vsel %vm315_vm1, %v1542_v38, %v1546_v8  ;;  %v1555_v44 = vsel %vm315_vm1, %v1550_v48, %v1554_v52  ;;  %v5054_v38 = vld [vmem:[#allocation54_spill] sm:$0xff] }
 0x1d4   : > { %v1589_v3 = vpop.permute.xlu1 %1588  ;;  %v1541_v4 = vadd.f32 %v1539_v39, %v1511_v23  ;;  %v1549_v8 = vadd.f32 %v1547_v43, %v1519_v13  ;;  %v1557_v57 = vadd.f32 %v1555_v44, %v1527_v5 }
 0x1d5   : > { %v1561_v31 = vpop.permute.xlu0 %1560  ;;  %v1593_v56 = vsel %vm511_vm7, %v4101_v54, %v1589_v3  ;;  %v1592_v30 = vsel %vm511_vm7, %v1589_v3, %v4101_v54 }
 0x1d6   : > { %v1595_v37 = vmul.f32 %v1593_v56, %v5050_v60  ;;  %v1563_v6 = vsel %vm477_vm6, %v1561_v31, %v4078_v10  ;;  %v1603_v16 = vmul.f32 %v1593_v56, %v5051_v14  ;;  %v1611_v12 = vmul.f32 %v1593_v56, %v3481_v62 }
 0x1d7   : > { %v1562_v52 = vsel %vm477_vm6, %v4078_v10, %v1561_v31  ;;  %v1565_v2 = vmul.f32 %v1563_v6, %v5052_v26  ;;  %v1573_v58 = vmul.f32 %v1563_v6, %v5053_v20  ;;  %v1594_v54 = vmul.f32 %v1592_v30, %v5050_v60 }
 0x1d8   : > { %v1598_v3 = vrot.slane %v1595_v37, 7  ;;  %v1602_v29 = vmul.f32 %v1592_v30, %v5051_v14  ;;  %v1581_v48 = vmul.f32 %v1563_v6, %v5054_v38  ;;  %v1564_v28 = vmul.f32 %v1562_v52, %v5052_v26 }
 0x1d9   : > { %v1568_v39 = vrot.slane %v1565_v2, 7  ;;  %v1572_v10 = vmul.f32 %v1562_v52, %v5053_v20  ;;  %v1576_v31 = vrot.slane %v1573_v58, 7  ;;  %v1606_v23 = vrot.slane %v1603_v16, 7 }
 0x1da   : > { %v1614_v43 = vrot.slane %v1611_v12, 7  ;;  %v1580_v44 = vmul.f32 %v1562_v52, %v5054_v38  ;;  %v1584_v13 = vrot.slane %v1581_v48, 7  ;;  %v1610_v37 = vmul.f32 %v1592_v30, %v3481_v62  ;;  %v5055_v52 = vld [vmem:[#allocation55_spill] sm:$0xff]  ;;  %v5056_v38 = vld [vmem:[#allocation56_spill] sm:$0xff] }
 0x1db   : > { %v1569_v14 = vsel %vm315_vm1, %v1564_v28, %v1568_v39  ;;  %v1577_v6 = vsel %vm315_vm1, %v1572_v10, %v1576_v31  ;;  %v1599_v30 = vsel %vm315_vm1, %v1594_v54, %v1598_v3  ;;  %v1607_v28 = vsel %vm315_vm1, %v1602_v29, %v1606_v23  ;;  %v5057_v10 = vld [vmem:[#allocation57_spill] sm:$0xff] }
 0x1dc   : > { %v1621_v56 = vpop.permute.xlu1 %1620  ;;  %v1571_v2 = vadd.f32 %v1569_v14, %v1541_v4  ;;  %v1579_v60 = vadd.f32 %v1577_v6, %v1549_v8  ;;  %v1585_v58 = vsel %vm315_vm1, %v1580_v44, %v1584_v13  ;;  %v1615_v39 = vsel %vm315_vm1, %v1610_v37, %v1614_v43 }
 0x1dd   : > { %v1619_v5 = vpop.permute.xlu0 %1618  ;;  %v1587_v12 = vadd.f32 %v1585_v58, %v1557_v57  ;;  %v4201_v58 = vpop.permute.xlu2 %1750 }
 0x1de   : > { %v1623_v26 = vsel %vm545_vm8, %v1621_v56, %v1619_v5  ;;  %v1622_v16 = vsel %vm545_vm8, %v1619_v5, %v1621_v56  ;;  %v1601_v56 = vadd.f32 %v1599_v30, %v1571_v2  ;;  %v1609_v57 = vadd.f32 %v1607_v28, %v1579_v60  ;;  %v5059_v2 = vld [vmem:[#allocation62_spill] sm:$0xff] }
 0x1df   : > { %v1625_v48 = vmul.f32 %v1623_v26, %v5055_v52  ;;  %v1633_v20 = vmul.f32 %v1623_v26, %v5056_v38  ;;  %v1641_v31 = vmul.f32 %v1623_v26, %v5057_v10  ;;  %v1624_v4 = vmul.f32 %v1622_v16, %v5055_v52 }
 0x1e0   : > { %v1632_v8 = vmul.f32 %v1622_v16, %v5056_v38  ;;  %v1640_v13 = vmul.f32 %v1622_v16, %v5057_v10  ;;  %v1617_v6 = vadd.f32 %v1615_v39, %v1587_v12  ;;  %v1651_v16 = vmul.f32 %v3920_v15, %v5059_v2  ;;  %v5060_v12 = vld [vmem:[#allocation63_spill] sm:$0xff]  ;;  %v5066_v2 = vld [vmem:[#allocation60_spill] sm:$0xff] }
 0x1e1   : > { %v1628_v14 = vrot.slane %v1625_v48, 7  ;;  %v1636_v44 = vrot.slane %v1633_v20, 7  ;;  %v1644_v5 = vrot.slane %v1641_v31, 7  ;;  %v5058_v20 = vld [vmem:[#allocation61_spill] sm:$0xff]  ;;  %v1653_v30 = vmul.f32 %v3920_v15, %v5060_v12 }
 0x1e2   : > { %v1649_v60 = vmul.f32 %v3920_v15, %v5058_v20  ;;  %v5063_v15 = vld [vmem:[#allocation66_spill] sm:$0xff] }
 0x1e3   : > { %v1629_v54 = vsel %vm315_vm1, %v1624_v4, %v1628_v14  ;;  %v1637_v3 = vsel %vm315_vm1, %v1632_v8, %v1636_v44  ;;  %v1645_v26 = vsel %vm315_vm1, %v1640_v13, %v1644_v5  ;;  %v5061_v14 = vld [vmem:[#allocation64_spill] sm:$0xff]  ;;  %v5062_v44 = vld [vmem:[#allocation65_spill] sm:$0xff] }
 0x1e4   : > { %v1691_v29 = vpop.permute.xlu1 %1690  ;;  %v1631_v23 = vadd.f32 %v1629_v54, %v1601_v56  ;;  %v1639_v43 = vadd.f32 %v1637_v3, %v1609_v57  ;;  %v1647_v48 = vadd.f32 %v1645_v26, %v1617_v6 }
 0x1e5   : > { %v1663_v37 = vpop.permute.xlu0 %1662  ;;  %v1695_v57 = vsel %vm341_vm2, %v4176_v45, %v1691_v29  ;;  %v1783_v12 = vpop.permute.xlu2 %1782 }
 0x1e6   : > { %v1650_v28 = vadd.f32 %v1649_v60, %v1631_v23  ;;  %v1652_v39 = vadd.f32 %v1651_v16, %v1639_v43  ;;  %v1654_v31 = vadd.f32 %v1653_v30, %v1647_v48  ;;  %v1665_v4 = vsel %vm306_vm3, %v1663_v37, %v4143_v59  ;;  %v5064_v43 = vld [vmem:[#allocation58_spill] sm:$0xff]  ;;  %v5065_v48 = vld [vmem:[#allocation59_spill] sm:$0xff] }
 0x1e7   : > { %v1667_v8 = vmul.f32 %v1665_v4, %v5061_v14  ;;  %v1675_v56 = vmul.f32 %v1665_v4, %v5062_v44  ;;  %v1664_v13 = vsel %vm306_vm3, %v4143_v59, %v1663_v37  ;;  %v1683_v5 = vmul.f32 %v1665_v4, %v5063_v15 }
 0x1e8   : > { %v1697_v26 = vmul.f32 %v1695_v57, %v5064_v43  ;;  %v1705_v60 = vmul.f32 %v1695_v57, %v5065_v48  ;;  %v1666_v16 = vmul.f32 %v1664_v13, %v5061_v14  ;;  %v1713_v20 = vmul.f32 %v1695_v57, %v5066_v2 }
 0x1e9   : > { %v1670_v54 = vrot.slane %v1667_v8, 7  ;;  %v1678_v23 = vrot.slane %v1675_v56, 7  ;;  %v1674_v59 = vmul.f32 %v1664_v13, %v5062_v44  ;;  %v1686_v37 = vrot.slane %v1683_v5, 7 }
 0x1ea   : > { %v1694_v56 = vsel %vm341_vm2, %v1691_v29, %v4176_v45  ;;  %v1682_v14 = vmul.f32 %v1664_v13, %v5063_v15  ;;  %v1700_v52 = vrot.slane %v1697_v26, 7  ;;  %v1708_v62 = vrot.slane %v1705_v60, 7 }
 0x1eb   : > { %v1671_v4 = vsel %vm315_vm1, %v1666_v16, %v1670_v54  ;;  %v1679_v10 = vsel %vm315_vm1, %v1674_v59, %v1678_v23  ;;  %v1716_v57 = vrot.slane %v1713_v20, 7  ;;  %v1696_v44 = vmul.f32 %v1694_v56, %v5064_v43 }
 0x1ec   : > { %v1723_v6 = vpop.permute.xlu1 %1722  ;;  %v1673_v36 = vadd.f32 %v1671_v4, %v1650_v28  ;;  %v1687_v5 = vsel %vm315_vm1, %v1682_v14, %v1686_v37  ;;  %v1704_v45 = vmul.f32 %v1694_v56, %v5065_v48  ;;  %v1681_v29 = vadd.f32 %v1679_v10, %v1652_v39 }
 0x1ed   : > { %v1721_v3 = vpop.permute.xlu0 %1720  ;;  %v1712_v13 = vmul.f32 %v1694_v56, %v5066_v2  ;;  %v1701_v20 = vsel %vm315_vm1, %v1696_v44, %v1700_v52  ;;  %v1689_v14 = vadd.f32 %v1687_v5, %v1654_v31  ;;  %v4255_v31 = vpop.permute.xlu2 %1840 }
 0x1ee   : > { %v1725_v30 = vsel %vm375_vm0, %v1723_v6, %v1721_v3  ;;  %v1724_v54 = vsel %vm375_vm0, %v1721_v3, %v1723_v6  ;;  %v1709_v28 = vsel %vm315_vm1, %v1704_v45, %v1708_v62  ;;  %v1703_v60 = vadd.f32 %v1701_v20, %v1673_v36  ;;  %v5067_v20 = vld [vmem:[#allocation68_spill] sm:$0xff] }
 0x1ef   : > { %v1727_v8 = vmul.f32 %v1725_v30, %v3673_v17  ;;  %v1735_v38 = vmul.f32 %v1725_v30, %v3679_v25  ;;  %v1743_v26 = vmul.f32 %v1725_v30, %v3683_v9  ;;  %v1726_v6 = vmul.f32 %v1724_v54, %v3673_v17 }
 0x1f0   : > { %v1717_v3 = vsel %vm315_vm1, %v1712_v13, %v1716_v57  ;;  %v1734_v37 = vmul.f32 %v1724_v54, %v3679_v25  ;;  %v1711_v39 = vadd.f32 %v1709_v28, %v1681_v29  ;;  %v1742_v56 = vmul.f32 %v1724_v54, %v3683_v9 }
 0x1f1   : > { %v1730_v23 = vrot.slane %v1727_v8, 7  ;;  %v1738_v15 = vrot.slane %v1735_v38, 7  ;;  %v1746_v30 = vrot.slane %v1743_v26, 7  ;;  %v1719_v8 = vadd.f32 %v1717_v3, %v1689_v14 }
 0x1f3   : > { %v1731_v38 = vsel %vm315_vm1, %v1726_v6, %v1730_v23  ;;  %v1739_v44 = vsel %vm315_vm1, %v1734_v37, %v1738_v15  ;;  %v1747_v54 = vsel %vm315_vm1, %v1742_v56, %v1746_v30  ;;  %v5068_v6 = vld [vmem:[#allocation69_spill] sm:$0xff] }
 0x1f4   : > { %v1781_v16 = vpop.permute.xlu1 %1780  ;;  %v1733_v45 = vadd.f32 %v1731_v38, %v1703_v60  ;;  %v1741_v26 = vadd.f32 %v1739_v44, %v1711_v39  ;;  %v5069_v39 = vld [vmem:[#allocation72_spill] sm:$0xff] }
 0x1f5   : > { %v1753_v59 = vpop.permute.xlu0 %1752  ;;  %v1785_v52 = vsel %vm443_vm5, %v1783_v12, %v1781_v16  ;;  %v1784_v29 = vsel %vm443_vm5, %v1781_v16, %v1783_v12 }
 0x1f6   : > { %v1755_v10 = vsel %vm409_vm4, %v1753_v59, %v4201_v58  ;;  %v1754_v36 = vsel %vm409_vm4, %v4201_v58, %v1753_v59  ;;  %v1787_v23 = vmul.f32 %v1785_v52, %v3686_v0  ;;  %v1795_v28 = vmul.f32 %v1785_v52, %v5067_v20 }
 0x1f7   : > { %v1757_v62 = vmul.f32 %v1755_v10, %v3706_v55  ;;  %v1765_v4 = vmul.f32 %v1755_v10, %v3715_v53  ;;  %v1773_v5 = vmul.f32 %v1755_v10, %v3752_v21  ;;  %v1756_v58 = vmul.f32 %v1754_v36, %v3706_v55 }
 0x1f8   : > { %v1803_v3 = vmul.f32 %v1785_v52, %v5068_v6  ;;  %v1764_v60 = vmul.f32 %v1754_v36, %v3715_v53  ;;  %v1786_v16 = vmul.f32 %v1784_v29, %v3686_v0  ;;  %v1772_v10 = vmul.f32 %v1754_v36, %v3752_v21 }
 0x1f9   : > { %v1760_v57 = vrot.slane %v1757_v62, 7  ;;  %v1768_v15 = vrot.slane %v1765_v4, 7  ;;  %v1776_v59 = vrot.slane %v1773_v5, 7  ;;  %v1790_v62 = vrot.slane %v1787_v23, 7 }
 0x1fa   : > { %v1798_v4 = vrot.slane %v1795_v28, 7  ;;  %v1749_v53 = vadd.f32 %v1747_v54, %v1719_v8  ;;  %v1794_v21 = vmul.f32 %v1784_v29, %v5067_v20 }
 0x1fb   : > { %v1761_v37 = vsel %vm315_vm1, %v1756_v58, %v1760_v57  ;;  %v1769_v44 = vsel %vm315_vm1, %v1764_v60, %v1768_v15  ;;  %v1777_v56 = vsel %vm315_vm1, %v1772_v10, %v1776_v59  ;;  %v1806_v57 = vrot.slane %v1803_v3, 7  ;;  %v1873_v60 = vpop.permute.xlu2 %1872 }
 0x1fc   : > { %v1813_v13 = vpop.permute.xlu1 %1812  ;;  %v1763_v58 = vadd.f32 %v1761_v37, %v1733_v45  ;;  %v1771_v23 = vadd.f32 %v1769_v44, %v1741_v26  ;;  %v1779_v28 = vadd.f32 %v1777_v56, %v1749_v53 }
 0x1fd   : > { %v1811_v14 = vpop.permute.xlu0 %1810 }
 0x1fe   : > { %v1815_v12 = vsel %vm477_vm6, %v1813_v13, %v1811_v14  ;;  %v1814_v30 = vsel %vm477_vm6, %v1811_v14, %v1813_v13  ;;  %v1791_v13 = vsel %vm315_vm1, %v1786_v16, %v1790_v62  ;;  %v1802_v14 = vmul.f32 %v1784_v29, %v5068_v6 }
 0x1ff   : > { %v1817_v38 = vmul.f32 %v1815_v12, %v5069_v39  ;;  %v1825_v52 = vmul.f32 %v1815_v12, %v3760_v24  ;;  %v1833_v0 = vmul.f32 %v1815_v12, %v3766_v1  ;;  %v1816_v15 = vmul.f32 %v1814_v30, %v5069_v39 }
 0x200   : > { %v1824_v59 = vmul.f32 %v1814_v30, %v3760_v24  ;;  %v1799_v12 = vsel %vm315_vm1, %v1794_v21, %v1798_v4  ;;  %v1807_v3 = vsel %vm315_vm1, %v1802_v14, %v1806_v57  ;;  %v1793_v37 = vadd.f32 %v1791_v13, %v1763_v58  ;;  %v5071_v58 = vld [vmem:[#allocation74_spill] sm:$0xff] }
 0x201   : > { %v1820_v5 = vrot.slane %v1817_v38, 7  ;;  %v1828_v36 = vrot.slane %v1825_v52, 7  ;;  %v1836_v45 = vrot.slane %v1833_v0, 7  ;;  %v1801_v53 = vadd.f32 %v1799_v12, %v1771_v23  ;;  %v5070_v52 = vld [vmem:[#allocation73_spill] sm:$0xff] }
 0x202   : > { %v1832_v38 = vmul.f32 %v1814_v30, %v3766_v1  ;;  %v1809_v21 = vadd.f32 %v1807_v3, %v1779_v28 }
 0x203   : > { %v1821_v8 = vsel %vm315_vm1, %v1816_v15, %v1820_v5  ;;  %v1829_v16 = vsel %vm315_vm1, %v1824_v59, %v1828_v36 }
 0x204   : > { %v1871_v10 = vpop.permute.xlu1 %1870  ;;  %v1823_v44 = vadd.f32 %v1821_v8, %v1793_v37  ;;  %v1831_v5 = vadd.f32 %v1829_v16, %v1801_v53  ;;  %v1837_v57 = vsel %vm315_vm1, %v1832_v38, %v1836_v45 }
 0x205   : > { %v1875_v54 = vsel %vm545_vm8, %v1873_v60, %v1871_v10  ;;  %v1843_v26 = vpop.permute.xlu0 %1842  ;;  %v1874_v23 = vsel %vm545_vm8, %v1871_v10, %v1873_v60  ;;  %v1839_v8 = vadd.f32 %v1837_v57, %v1809_v21 }
 0x206   : > { %v1877_v29 = vmul.f32 %v1875_v54, %v3773_v19  ;;  %v1885_v62 = vmul.f32 %v1875_v54, %v3820_v22  ;;  %v1844_v0 = vsel %vm511_vm7, %v4255_v31, %v1843_v26  ;;  %v1893_v4 = vmul.f32 %v1875_v54, %v5070_v52 }
 0x207   : > { %v1845_v56 = vsel %vm511_vm7, %v1843_v26, %v4255_v31  ;;  %v1846_v13 = vmul.f32 %v1844_v0, %v5071_v58  ;;  %v1854_v12 = vmul.f32 %v1844_v0, %v3830_v18  ;;  %v1862_v45 = vmul.f32 %v1844_v0, %v3833_v7 }
 0x208   : > { %v1847_v36 = vmul.f32 %v1845_v56, %v5071_v58  ;;  %v1855_v30 = vmul.f32 %v1845_v56, %v3830_v18  ;;  %v1880_v15 = vrot.slane %v1877_v29, 7  ;;  %v1863_v14 = vmul.f32 %v1845_v56, %v3833_v7 }
 0x209   : > { %v1888_v28 = vrot.slane %v1885_v62, 7  ;;  %v1896_v54 = vrot.slane %v1893_v4, 7  ;;  %v1876_v3 = vmul.f32 %v1874_v23, %v3773_v19  ;;  %v1884_v37 = vmul.f32 %v1874_v23, %v3820_v22 }
 0x20a   : > { %v1850_v59 = vrot.slane %v1847_v36, 7  ;;  %v1858_v31 = vrot.slane %v1855_v30, 7  ;;  %v1866_v26 = vrot.slane %v1863_v14, 7  ;;  %v1892_v16 = vmul.f32 %v1874_v23, %v5070_v52 }
 0x20b   : > { %v1881_v62 = vsel %vm315_vm1, %v1876_v3, %v1880_v15  ;;  %v1889_v21 = vsel %vm315_vm1, %v1884_v37, %v1888_v28 }
 0x20c   : > { %v1851_v60 = vsel %vm315_vm1, %v1846_v13, %v1850_v59  ;;  %v1859_v10 = vsel %vm315_vm1, %v1854_v12, %v1858_v31  ;;  %v1867_v38 = vsel %vm315_vm1, %v1862_v45, %v1866_v26  ;;  %v1897_v4 = vsel %vm315_vm1, %v1892_v16, %v1896_v54 }
 0x20d   : > { %v1853_v29 = vadd.f32 %v1851_v60, %v1823_v44  ;;  %v1861_v53 = vadd.f32 %v1859_v10, %v1831_v5  ;;  %v1869_v0 = vadd.f32 %v1867_v38, %v1839_v8 }
 0x20f   : > { %v1883_v56 = vadd.f32 %v1881_v62, %v1853_v29  ;;  %v1891_v57 = vadd.f32 %v1889_v21, %v1861_v53  ;;  %v1899_v36 = vadd.f32 %v1897_v4, %v1869_v0 }
 0x211   : > { %1900 = vst.msk [vmem:[#allocation3] ss:$4 sm:$0x3] %vm3870_vm9, %v1883_v56 }
 0x212   : > { %1902 = vst.msk [vmem:[#allocation3 + $0x1] ss:$4 sm:$0x3] %vm3870_vm9, %v1891_v57 }
 0x213   : > { %1904 = vst.msk [vmem:[#allocation3 + $0x2] ss:$4 sm:$0x3] %vm3870_vm9, %v1899_v36 }
 0x218   : > { %v4329_v44 = vld [vmem:[#allocation3] ss:$4 sm:$0x3] }
 0x219   : > { %v1914_v5 = vperm.slane %v4329_v44, 1  ;;  %v1913_v30 = vperm.slane %v4329_v44, 0  ;;  %v4348_v23 = vld [vmem:[#allocation3 + $0x1] ss:$4 sm:$0x3]  ;;  %v1906_v3 = vmul.f32 %v4329_v44, %v3100_v33  ;;  %v1908_v37 = vmul.f32 %v4329_v44, %v3102_v34 }
 0x21a   : > { %v2165_v15 = vperm.slane %v4348_v23, 0  ;;  %v2166_v13 = vperm.slane %v4348_v23, 1  ;;  %v4367_v14 = vld [vmem:[#allocation3 + $0x2] ss:$4 sm:$0x3]  ;;  %v1910_v16 = vmul.f32 %v4329_v44, %v3104_v35 }
 0x21b   : > { %1919 = vrot.lane.b32.xlu1 %v1914_v5, %s2932_s27  ;;  %1947 = vrot.lane.b32.xlu2 %v1913_v30, %s2931_s26  ;;  %v2417_v28 = vperm.slane %v4367_v14, 0  ;;  %v2418_v59 = vperm.slane %v4367_v14, 1  ;;  %v1907_v0 = vadd.f32 %v1906_v3, %v3116_v40  ;;  %v1909_v4 = vadd.f32 %v1908_v37, %v3118_v41  ;;  %v5074_v3 = vld [vmem:[#allocation12_spill] sm:$0xff] }
 0x21c   : > { %1917 = vrot.lane.b32.xlu0 %v1913_v30, %s2932_s27  ;;  %v1911_v35 = vadd.f32 %v1910_v16, %v3120_v42  ;;  %v5072_v42 = vld [vmem:[#allocation10_spill] sm:$0xff] }
 0x223   : > { %1977 = vrot.lane.b32.xlu1 %v1913_v30, %s2933_s28  ;;  %1979 = vrot.lane.b32.xlu2 %v1914_v5, %s2933_s28 }
 0x224   : > { %1949 = vrot.lane.b32.xlu0 %v1914_v5, %s2931_s26 }
 0x22b   : > { %2009 = vrot.lane.b32.xlu1 %v1914_v5, %s2934_s29  ;;  %2037 = vrot.lane.b32.xlu2 %v1913_v30, %s2935_s30 }
 0x22c   : > { %2007 = vrot.lane.b32.xlu0 %v1913_v30, %s2934_s29 }
 0x233   : > { %2067 = vrot.lane.b32.xlu1 %v1913_v30, %s2936_s4  ;;  %2069 = vrot.lane.b32.xlu2 %v1914_v5, %s2936_s4 }
 0x234   : > { %2039 = vrot.lane.b32.xlu0 %v1914_v5, %s2935_s30 }
 0x23b   : > { %2099 = vrot.lane.b32.xlu1 %v1914_v5, %s2937_s5  ;;  %2127 = vrot.lane.b32.xlu2 %v1913_v30, %s2938_s6 }
 0x23c   : > { %2097 = vrot.lane.b32.xlu0 %v1913_v30, %s2937_s5 }
 0x243   : > { %2169 = vrot.lane.b32.xlu1 %v2165_v15, %s2932_s27  ;;  %2171 = vrot.lane.b32.xlu2 %v2166_v13, %s2932_s27 }
 0x244   : > { %2129 = vrot.lane.b32.xlu0 %v1914_v5, %s2938_s6 }
 0x24b   : > { %2201 = vrot.lane.b32.xlu1 %v2166_v13, %s2931_s26  ;;  %2229 = vrot.lane.b32.xlu2 %v2165_v15, %s2933_s28 }
 0x24c   : > { %2199 = vrot.lane.b32.xlu0 %v2165_v15, %s2931_s26 }
 0x253   : > { %2259 = vrot.lane.b32.xlu1 %v2165_v15, %s2934_s29  ;;  %2261 = vrot.lane.b32.xlu2 %v2166_v13, %s2934_s29 }
 0x254   : > { %2231 = vrot.lane.b32.xlu0 %v2166_v13, %s2933_s28 }
 0x25b   : > { %2291 = vrot.lane.b32.xlu1 %v2166_v13, %s2935_s30  ;;  %2319 = vrot.lane.b32.xlu2 %v2165_v15, %s2936_s4 }
 0x25c   : > { %2289 = vrot.lane.b32.xlu0 %v2165_v15, %s2935_s30 }
 0x263   : > { %2349 = vrot.lane.b32.xlu1 %v2165_v15, %s2937_s5  ;;  %2351 = vrot.lane.b32.xlu2 %v2166_v13, %s2937_s5 }
 0x264   : > { %2321 = vrot.lane.b32.xlu0 %v2166_v13, %s2936_s4 }
 0x26b   : > { %2381 = vrot.lane.b32.xlu1 %v2166_v13, %s2938_s6  ;;  %2421 = vrot.lane.b32.xlu2 %v2417_v28, %s2932_s27 }
 0x26c   : > { %2379 = vrot.lane.b32.xlu0 %v2165_v15, %s2938_s6 }
 0x273   : > { %2451 = vrot.lane.b32.xlu1 %v2417_v28, %s2931_s26  ;;  %2453 = vrot.lane.b32.xlu2 %v2418_v59, %s2931_s26 }
 0x274   : > { %2423 = vrot.lane.b32.xlu0 %v2418_v59, %s2932_s27 }
 0x275   : > { %v1948_v12 = vpop.permute.xlu2 %1947 }
 0x27b   : > { %2483 = vrot.lane.b32.xlu1 %v2418_v59, %s2933_s28  ;;  %2511 = vrot.lane.b32.xlu2 %v2417_v28, %s2934_s29 }
 0x27c   : > { %2481 = vrot.lane.b32.xlu0 %v2417_v28, %s2933_s28  ;;  %s197_s28 = scalar_lea.vmem %s4787_s3, %s2844_s22 }
 0x27d   : > { %v1980_v31 = vpop.permute.xlu2 %1979 }
 0x283   : > { %2541 = vrot.lane.b32.xlu1 %v2417_v28, %s2935_s30  ;;  %2543 = vrot.lane.b32.xlu2 %v2418_v59, %s2935_s30 }
 0x284   : > { %2513 = vrot.lane.b32.xlu0 %v2418_v59, %s2934_s29 }
 0x285   : > { %v4383_v8 = vpop.permute.xlu2 %2037 }
 0x28b   : > { %2573 = vrot.lane.b32.xlu1 %v2418_v59, %s2936_s4  ;;  %2601 = vrot.lane.b32.xlu2 %v2417_v28, %s2937_s5 }
 0x28c   : > { %2571 = vrot.lane.b32.xlu0 %v2417_v28, %s2936_s4 }
 0x28d   : > { %v1920_v54 = vpop.permute.xlu1 %1919  ;;  %v4388_v45 = vpop.permute.xlu2 %2069 }
 0x28e   : > { %v1918_v26 = vpop.permute.xlu0 %1917 }
 0x28f   : > { %v1921_v60 = vsel %vm306_vm3, %v1918_v26, %v1920_v54  ;;  %v1922_v10 = vsel %vm306_vm3, %v1920_v54, %v1918_v26 }
 0x290   : > { %v1924_v29 = vmul.f32 %v1922_v10, %v3136_v46  ;;  %v1932_v53 = vmul.f32 %v1922_v10, %v3138_v47  ;;  %v1940_v38 = vmul.f32 %v1922_v10, %v3144_v49  ;;  %v1923_v33 = vmul.f32 %v1921_v60, %v3136_v46 }
 0x291   : > { %v1931_v34 = vmul.f32 %v1921_v60, %v3138_v47  ;;  %v1939_v56 = vmul.f32 %v1921_v60, %v3144_v49 }
 0x292   : > { %v1927_v62 = vrot.slane %v1924_v29, 7  ;;  %v1935_v21 = vrot.slane %v1932_v53, 7  ;;  %v1943_v57 = vrot.slane %v1940_v38, 7  ;;  %v5075_v53 = vld [vmem:[#allocation13_spill] sm:$0xff] }
 0x293   : > { %2631 = vrot.lane.b32.xlu1 %v2417_v28, %s2938_s6  ;;  %2633 = vrot.lane.b32.xlu2 %v2418_v59, %s2938_s6  ;;  %v5073_v28 = vld [vmem:[#allocation11_spill] sm:$0xff] }
 0x294   : > { %v1928_v36 = vsel %vm315_vm1, %v1923_v33, %v1927_v62  ;;  %v1936_v46 = vsel %vm315_vm1, %v1931_v34, %v1935_v21  ;;  %2603 = vrot.lane.b32.xlu0 %v2418_v59, %s2937_s5  ;;  %v1944_v40 = vsel %vm315_vm1, %v1939_v56, %v1943_v57  ;;  %v5076_v21 = vld [vmem:[#allocation14_spill] sm:$0xff] }
 0x295   : > { %v1930_v47 = vadd.f32 %v1928_v36, %v1907_v0  ;;  %v1938_v44 = vadd.f32 %v1936_v46, %v1909_v4  ;;  %v1978_v41 = vpop.permute.xlu1 %1977  ;;  %v1946_v5 = vadd.f32 %v1944_v40, %v1911_v35  ;;  %v4421_v26 = vpop.permute.xlu2 %2127  ;;  %v5077_v35 = vld [vmem:[#allocation15_spill] sm:$0xff] }
 0x296   : > { %v1981_v49 = vsel %vm375_vm0, %v1978_v41, %v1980_v31  ;;  %v1982_v30 = vsel %vm375_vm0, %v1980_v31, %v1978_v41  ;;  %v1950_v15 = vpop.permute.xlu0 %1949 }
 0x297   : > { %v1984_v13 = vmul.f32 %v1982_v30, %v5072_v42  ;;  %v1992_v54 = vmul.f32 %v1982_v30, %v5073_v28  ;;  %v1983_v59 = vmul.f32 %v1981_v49, %v5072_v42  ;;  %v2000_v37 = vmul.f32 %v1982_v30, %v5074_v3 }
 0x298   : > { %v1951_v60 = vsel %vm341_vm2, %v1948_v12, %v1950_v15  ;;  %v1952_v10 = vsel %vm341_vm2, %v1950_v15, %v1948_v12  ;;  %v1991_v31 = vmul.f32 %v1981_v49, %v5073_v28  ;;  %v1999_v33 = vmul.f32 %v1981_v49, %v5074_v3 }
 0x299   : > { %v1987_v16 = vrot.slane %v1984_v13, 7  ;;  %v1995_v29 = vrot.slane %v1992_v54, 7  ;;  %v1954_v38 = vmul.f32 %v1952_v10, %v5075_v53  ;;  %v2003_v62 = vrot.slane %v2000_v37, 7 }
 0x29a   : > { %v1953_v34 = vmul.f32 %v1951_v60, %v5075_v53  ;;  %v1962_v0 = vmul.f32 %v1952_v10, %v5076_v21  ;;  %v1970_v12 = vmul.f32 %v1952_v10, %v5077_v35  ;;  %v1961_v46 = vmul.f32 %v1951_v60, %v5076_v21 }
 0x29b   : > { %v1988_v4 = vsel %vm315_vm1, %v1983_v59, %v1987_v16  ;;  %v1996_v56 = vsel %vm315_vm1, %v1991_v31, %v1995_v29  ;;  %v1957_v57 = vrot.slane %v1954_v38, 7  ;;  %v2004_v36 = vsel %vm315_vm1, %v1999_v33, %v2003_v62  ;;  %v5078_v31 = vld [vmem:[#allocation16_spill] sm:$0xff] }
 0x29c   : > { %v1965_v40 = vrot.slane %v1962_v0, 7  ;;  %v1969_v49 = vmul.f32 %v1951_v60, %v5077_v35  ;;  %v1973_v30 = vrot.slane %v1970_v12, 7 }
 0x29d   : > { %v1958_v41 = vsel %vm315_vm1, %v1953_v34, %v1957_v57  ;;  %v2010_v15 = vpop.permute.xlu1 %2009  ;;  %v4448_v60 = vpop.permute.xlu2 %2171  ;;  %v5080_v34 = vld [vmem:[#allocation18_spill] sm:$0xff] }
 0x29e   : > { %v1960_v42 = vadd.f32 %v1958_v41, %v1930_v47  ;;  %v1966_v13 = vsel %vm315_vm1, %v1961_v46, %v1965_v40  ;;  %v2008_v28 = vpop.permute.xlu0 %2007  ;;  %v1974_v59 = vsel %vm315_vm1, %v1969_v49, %v1973_v30  ;;  %v5079_v47 = vld [vmem:[#allocation17_spill] sm:$0xff] }
 0x29f   : > { %v1968_v54 = vadd.f32 %v1966_v13, %v1938_v44  ;;  %v2011_v3 = vsel %vm409_vm4, %v2008_v28, %v2010_v15  ;;  %v2012_v37 = vsel %vm409_vm4, %v2010_v15, %v2008_v28  ;;  %v1976_v10 = vadd.f32 %v1974_v59, %v1946_v5  ;;  %v5082_v28 = vld [vmem:[#allocation20_spill] sm:$0xff] }
 0x2a0   : > { %v1990_v16 = vadd.f32 %v1988_v4, %v1960_v42  ;;  %v2014_v29 = vmul.f32 %v2012_v37, %v5078_v31  ;;  %v2022_v38 = vmul.f32 %v2012_v37, %v5079_v47  ;;  %v2013_v44 = vmul.f32 %v2011_v3, %v5078_v31  ;;  %v5081_v42 = vld [vmem:[#allocation19_spill] sm:$0xff] }
 0x2a1   : > { %v1998_v53 = vadd.f32 %v1996_v56, %v1968_v54  ;;  %v2006_v33 = vadd.f32 %v2004_v36, %v1976_v10  ;;  %v2030_v21 = vmul.f32 %v2012_v37, %v5080_v34  ;;  %v2021_v0 = vmul.f32 %v2011_v3, %v5079_v47 }
 0x2a2   : > { %v2017_v62 = vrot.slane %v2014_v29, 7  ;;  %v2025_v57 = vrot.slane %v2022_v38, 7  ;;  %v2029_v5 = vmul.f32 %v2011_v3, %v5080_v34  ;;  %v5083_v3 = vld [vmem:[#allocation21_spill] sm:$0xff] }
 0x2a3   : > { %v2033_v4 = vrot.slane %v2030_v21, 7 }
 0x2a4   : > { %v2018_v35 = vsel %vm315_vm1, %v2013_v44, %v2017_v62  ;;  %v2026_v46 = vsel %vm315_vm1, %v2021_v0, %v2025_v57  ;;  %v5084_v57 = vld [vmem:[#allocation22_spill] sm:$0xff] }
 0x2a5   : > { %v2020_v12 = vadd.f32 %v2018_v35, %v1990_v16  ;;  %v2068_v56 = vpop.permute.xlu1 %2067  ;;  %v2028_v40 = vadd.f32 %v2026_v46, %v1998_v53  ;;  %v2034_v36 = vsel %vm315_vm1, %v2029_v5, %v2033_v4  ;;  %v4466_v59 = vpop.permute.xlu2 %2229  ;;  %v5085_v5 = vld [vmem:[#allocation23_spill] sm:$0xff] }
 0x2a6   : > { %v2040_v41 = vpop.permute.xlu0 %2039  ;;  %v2036_v49 = vadd.f32 %v2034_v36, %v2006_v33  ;;  %v2072_v53 = vsel %vm477_vm6, %v4388_v45, %v2068_v56 }
 0x2a7   : > { %v2041_v30 = vsel %vm443_vm5, %v4383_v8, %v2040_v41  ;;  %v2042_v15 = vsel %vm443_vm5, %v2040_v41, %v4383_v8  ;;  %v2074_v35 = vmul.f32 %v2072_v53, %v5084_v57  ;;  %v2082_v4 = vmul.f32 %v2072_v53, %v5085_v5  ;;  %v5086_v41 = vld [vmem:[#allocation24_spill] sm:$0xff] }
 0x2a8   : > { %v2044_v13 = vmul.f32 %v2042_v15, %v5081_v42  ;;  %v2052_v54 = vmul.f32 %v2042_v15, %v5082_v28  ;;  %v2060_v37 = vmul.f32 %v2042_v15, %v5083_v3  ;;  %v2043_v10 = vmul.f32 %v2041_v30, %v5081_v42  ;;  %v5087_v42 = vld [vmem:[#allocation25_spill] sm:$0xff] }
 0x2a9   : > { %v2051_v31 = vmul.f32 %v2041_v30, %v5082_v28  ;;  %v2059_v8 = vmul.f32 %v2041_v30, %v5083_v3  ;;  %v2090_v30 = vmul.f32 %v2072_v53, %v5086_v41  ;;  %v2071_v15 = vsel %vm477_vm6, %v2068_v56, %v4388_v45  ;;  %v5089_v3 = vld [vmem:[#allocation27_spill] sm:$0xff] }
 0x2aa   : > { %v2047_v16 = vrot.slane %v2044_v13, 7  ;;  %v2055_v29 = vrot.slane %v2052_v54, 7  ;;  %v2063_v47 = vrot.slane %v2060_v37, 7  ;;  %v2077_v28 = vrot.slane %v2074_v35, 7 }
 0x2ab   : > { %v2085_v54 = vrot.slane %v2082_v4, 7  ;;  %v2089_v56 = vmul.f32 %v2071_v15, %v5086_v41 }
 0x2ac   : > { %v2048_v33 = vsel %vm315_vm1, %v2043_v10, %v2047_v16  ;;  %v2056_v44 = vsel %vm315_vm1, %v2051_v31, %v2055_v29  ;;  %v2064_v0 = vsel %vm315_vm1, %v2059_v8, %v2063_v47  ;;  %v2093_v10 = vrot.slane %v2090_v30, 7 }
 0x2ad   : > { %v2100_v38 = vpop.permute.xlu1 %2099  ;;  %v2050_v34 = vadd.f32 %v2048_v33, %v2020_v12  ;;  %v2058_v21 = vadd.f32 %v2056_v44, %v2028_v40  ;;  %v2066_v46 = vadd.f32 %v2064_v0, %v2036_v49  ;;  %v5088_v12 = vld [vmem:[#allocation26_spill] sm:$0xff]  ;;  %v4489_v16 = vpop.permute.xlu2 %2261  ;;  %v2073_v31 = vmul.f32 %v2071_v15, %v5084_v57  ;;  %v5090_v33 = vld [vmem:[#allocation29_spill] sm:$0xff] }
 0x2ae   : > { %v2098_v62 = vpop.permute.xlu0 %2097  ;;  %v2081_v29 = vmul.f32 %v2071_v15, %v5085_v5  ;;  %v2158_v44 = vmul.f32 %v4348_v23, %v5090_v33  ;;  %v2094_v5 = vsel %vm315_vm1, %v2089_v56, %v2093_v10  ;;  %v5093_v10 = vld [vmem:[#allocation35_spill] sm:$0xff] }
 0x2af   : > { %v2102_v36 = vsel %vm511_vm7, %v2100_v38, %v2098_v62  ;;  %v2101_v53 = vsel %vm511_vm7, %v2098_v62, %v2100_v38  ;;  %v2078_v0 = vsel %vm315_vm1, %v2073_v31, %v2077_v28  ;;  %v2096_v31 = vadd.f32 %v2094_v5, %v2066_v46 }
 0x2b0   : > { %v2104_v13 = vmul.f32 %v2102_v36, %v5087_v42  ;;  %v2112_v40 = vmul.f32 %v2102_v36, %v5088_v12  ;;  %v2120_v37 = vmul.f32 %v2102_v36, %v5089_v3  ;;  %v2086_v35 = vsel %vm315_vm1, %v2081_v29, %v2085_v54  ;;  %v5091_v36 = vld [vmem:[#allocation30_spill] sm:$0xff] }
 0x2b1   : > { %v2160_v57 = vmul.f32 %v4348_v23, %v5091_v36  ;;  %v2103_v38 = vmul.f32 %v2101_v53, %v5087_v42  ;;  %v2111_v62 = vmul.f32 %v2101_v53, %v5088_v12  ;;  %v2080_v30 = vadd.f32 %v2078_v0, %v2050_v34  ;;  %v5095_v36 = vld [vmem:[#allocation28_spill] sm:$0xff] }
 0x2b2   : > { %v2107_v8 = vrot.slane %v2104_v13, 7  ;;  %v2115_v47 = vrot.slane %v2112_v40, 7  ;;  %v2123_v4 = vrot.slane %v2120_v37, 7  ;;  %v2088_v15 = vadd.f32 %v2086_v35, %v2058_v21  ;;  %v5092_v37 = vld [vmem:[#allocation34_spill] sm:$0xff]  ;;  %v5094_v21 = vld [vmem:[#allocation36_spill] sm:$0xff] }
 0x2b3   : > { %v2119_v13 = vmul.f32 %v2101_v53, %v5089_v3 }
 0x2b4   : > { %v2108_v28 = vsel %vm315_vm1, %v2103_v38, %v2107_v8  ;;  %v2116_v54 = vsel %vm315_vm1, %v2111_v62, %v2115_v47 }
 0x2b5   : > { %v2170_v49 = vpop.permute.xlu1 %2169  ;;  %v2124_v29 = vsel %vm315_vm1, %v2119_v13, %v2123_v4  ;;  %v2110_v47 = vadd.f32 %v2108_v28, %v2080_v30  ;;  %v2118_v33 = vadd.f32 %v2116_v54, %v2088_v15  ;;  %v4525_v38 = vpop.permute.xlu2 %2319  ;;  %v5096_v15 = vld [vmem:[#allocation33_spill] sm:$0xff]  ;;  %v5097_v54 = vld [vmem:[#allocation31_spill] sm:$0xff] }
 0x2b6   : > { %v2130_v45 = vpop.permute.xlu0 %2129  ;;  %v2174_v34 = vsel %vm306_vm3, %v4448_v60, %v2170_v49  ;;  %v2126_v4 = vadd.f32 %v2124_v29, %v2096_v31 }
 0x2b7   : > { %v2132_v41 = vsel %vm545_vm8, %v2130_v45, %v4421_v26  ;;  %v2131_v40 = vsel %vm545_vm8, %v4421_v26, %v2130_v45  ;;  %v2176_v5 = vmul.f32 %v2174_v34, %v5095_v36 }
 0x2b8   : > { %v2134_v42 = vmul.f32 %v2132_v41, %v5092_v37  ;;  %v2142_v12 = vmul.f32 %v2132_v41, %v5093_v10  ;;  %v2150_v3 = vmul.f32 %v2132_v41, %v5094_v21  ;;  %v2133_v53 = vmul.f32 %v2131_v40, %v5092_v37 }
 0x2b9   : > { %v2141_v45 = vmul.f32 %v2131_v40, %v5093_v10  ;;  %v2149_v0 = vmul.f32 %v2131_v40, %v5094_v21  ;;  %v2162_v40 = vmul.f32 %v4348_v23, %v5096_v15  ;;  %v2184_v10 = vmul.f32 %v2174_v34, %v5097_v54 }
 0x2ba   : > { %v2137_v26 = vrot.slane %v2134_v42, 7  ;;  %v2145_v56 = vrot.slane %v2142_v12, 7  ;;  %v2153_v46 = vrot.slane %v2150_v3, 7  ;;  %v5098_v12 = vld [vmem:[#allocation32_spill] sm:$0xff]  ;;  %v2173_v3 = vsel %vm306_vm3, %v2170_v49, %v4448_v60 }
 0x2bb   : > { %v2192_v31 = vmul.f32 %v2174_v34, %v5098_v12  ;;  %v2183_v49 = vmul.f32 %v2173_v3, %v5097_v54 }
 0x2bc   : > { %v2138_v62 = vsel %vm315_vm1, %v2133_v53, %v2137_v26  ;;  %v2146_v41 = vsel %vm315_vm1, %v2141_v45, %v2145_v56  ;;  %v2154_v42 = vsel %vm315_vm1, %v2149_v0, %v2153_v46  ;;  %v5099_v26 = vld [vmem:[#allocation37_spill] sm:$0xff]  ;;  %v5100_v56 = vld [vmem:[#allocation38_spill] sm:$0xff]  ;;  %v5101_v0 = vld [vmem:[#allocation39_spill] sm:$0xff] }
 0x2bd   : > { %v2202_v8 = vpop.permute.xlu1 %2201  ;;  %v2140_v13 = vadd.f32 %v2138_v62, %v2110_v47  ;;  %v2148_v37 = vadd.f32 %v2146_v41, %v2118_v33  ;;  %v2156_v28 = vadd.f32 %v2154_v42, %v2126_v4  ;;  %v2179_v33 = vrot.slane %v2176_v5, 7  ;;  %v4548_v5 = vpop.permute.xlu2 %2351 }
 0x2be   : > { %v2200_v35 = vpop.permute.xlu0 %2199  ;;  %v2175_v4 = vmul.f32 %v2173_v3, %v5095_v36  ;;  %v2187_v62 = vrot.slane %v2184_v10, 7  ;;  %v2195_v41 = vrot.slane %v2192_v31, 7 }
 0x2bf   : > { %v2204_v30 = vsel %vm341_vm2, %v2202_v8, %v2200_v35  ;;  %v2159_v29 = vadd.f32 %v2158_v44, %v2140_v13  ;;  %v2161_v21 = vadd.f32 %v2160_v57, %v2148_v37  ;;  %v2163_v53 = vadd.f32 %v2162_v40, %v2156_v28 }
 0x2c0   : > { %v2206_v45 = vmul.f32 %v2204_v30, %v5099_v26  ;;  %v2214_v47 = vmul.f32 %v2204_v30, %v5100_v56  ;;  %v2222_v46 = vmul.f32 %v2204_v30, %v5101_v0  ;;  %v2203_v44 = vsel %vm341_vm2, %v2200_v35, %v2202_v8 }
 0x2c1   : > { %v2180_v60 = vsel %vm315_vm1, %v2175_v4, %v2179_v33  ;;  %v2191_v37 = vmul.f32 %v2173_v3, %v5098_v12  ;;  %v2205_v42 = vmul.f32 %v2203_v44, %v5099_v26  ;;  %v2213_v36 = vmul.f32 %v2203_v44, %v5100_v56  ;;  %v5102_v12 = vld [vmem:[#allocation43_spill] sm:$0xff]  ;;  %v5103_v3 = vld [vmem:[#allocation44_spill] sm:$0xff]  ;;  %v5104_v33 = vld [vmem:[#allocation45_spill] sm:$0xff] }
 0x2c2   : > { %v2209_v34 = vrot.slane %v2206_v45, 7  ;;  %v2217_v13 = vrot.slane %v2214_v47, 7  ;;  %v2225_v30 = vrot.slane %v2222_v46, 7  ;;  %v2188_v35 = vsel %vm315_vm1, %v2183_v49, %v2187_v62 }
 0x2c3   : > { %v2196_v15 = vsel %vm315_vm1, %v2191_v37, %v2195_v41  ;;  %v2221_v40 = vmul.f32 %v2203_v44, %v5101_v0  ;;  %v2182_v45 = vadd.f32 %v2180_v60, %v2159_v29  ;;  %v2190_v56 = vadd.f32 %v2188_v35, %v2161_v21 }
 0x2c4   : > { %v2210_v54 = vsel %vm315_vm1, %v2205_v42, %v2209_v34  ;;  %v2218_v10 = vsel %vm315_vm1, %v2213_v36, %v2217_v13  ;;  %v2198_v46 = vadd.f32 %v2196_v15, %v2163_v53 }
 0x2c5   : > { %v2260_v23 = vpop.permute.xlu1 %2259  ;;  %v2226_v4 = vsel %vm315_vm1, %v2221_v40, %v2225_v30  ;;  %v2212_v34 = vadd.f32 %v2210_v54, %v2182_v45  ;;  %v2220_v13 = vadd.f32 %v2218_v10, %v2190_v56 }
 0x2c6   : > { %v2232_v57 = vpop.permute.xlu0 %2231  ;;  %v2264_v28 = vsel %vm409_vm4, %v4489_v16, %v2260_v23  ;;  %v2263_v60 = vsel %vm409_vm4, %v2260_v23, %v4489_v16 }
 0x2c7   : > { %v2234_v8 = vsel %vm375_vm0, %v2232_v57, %v4466_v59  ;;  %v2233_v47 = vsel %vm375_vm0, %v4466_v59, %v2232_v57  ;;  %v2266_v62 = vmul.f32 %v2264_v28, %v5044_v27  ;;  %v2274_v29 = vmul.f32 %v2264_v28, %v5045_v61 }
 0x2c8   : > { %v2236_v31 = vmul.f32 %v2234_v8, %v5102_v12  ;;  %v2244_v26 = vmul.f32 %v2234_v8, %v5103_v3  ;;  %v2252_v0 = vmul.f32 %v2234_v8, %v5104_v33  ;;  %v2282_v21 = vmul.f32 %v2264_v28, %v5046_v63 }
 0x2c9   : > { %v2235_v59 = vmul.f32 %v2233_v47, %v5102_v12  ;;  %v2228_v57 = vadd.f32 %v2226_v4, %v2198_v46  ;;  %v2243_v36 = vmul.f32 %v2233_v47, %v5103_v3  ;;  %v2251_v30 = vmul.f32 %v2233_v47, %v5104_v33  ;;  %v5105_v12 = vld [vmem:[#allocation48_spill] sm:$0xff] }
 0x2ca   : > { %v2239_v41 = vrot.slane %v2236_v31, 7  ;;  %v2247_v49 = vrot.slane %v2244_v26, 7  ;;  %v2255_v37 = vrot.slane %v2252_v0, 7  ;;  %v2269_v8 = vrot.slane %v2266_v62, 7  ;;  %v4590_v26 = vpop.permute.xlu2 %2421 }
 0x2cb   : > { %v2265_v23 = vmul.f32 %v2263_v60, %v5044_v27  ;;  %v2277_v31 = vrot.slane %v2274_v29, 7  ;;  %v2285_v3 = vrot.slane %v2282_v21, 7  ;;  %v2273_v56 = vmul.f32 %v2263_v60, %v5045_v61 }
 0x2cc   : > { %v2240_v35 = vsel %vm315_vm1, %v2235_v59, %v2239_v41  ;;  %v2248_v28 = vsel %vm315_vm1, %v2243_v36, %v2247_v49  ;;  %v2256_v54 = vsel %vm315_vm1, %v2251_v30, %v2255_v37  ;;  %v2281_v46 = vmul.f32 %v2263_v60, %v5046_v63  ;;  %v5106_v59 = vld [vmem:[#allocation49_spill] sm:$0xff] }
 0x2cd   : > { %v2292_v44 = vpop.permute.xlu1 %2291  ;;  %v2242_v47 = vadd.f32 %v2240_v35, %v2212_v34  ;;  %v2250_v4 = vadd.f32 %v2248_v28, %v2220_v13  ;;  %v2258_v62 = vadd.f32 %v2256_v54, %v2228_v57  ;;  %v2270_v49 = vsel %vm315_vm1, %v2265_v23, %v2269_v8  ;;  %v5107_v8 = vld [vmem:[#allocation50_spill] sm:$0xff]  ;;  %v5110_v23 = vld [vmem:[#allocation53_spill] sm:$0xff] }
 0x2ce   : > { %v2290_v42 = vpop.permute.xlu0 %2289  ;;  %v2278_v29 = vsel %vm315_vm1, %v2273_v56, %v2277_v31  ;;  %v2286_v61 = vsel %vm315_vm1, %v2281_v46, %v2285_v3  ;;  %v5111_v56 = vld [vmem:[#allocation54_spill] sm:$0xff] }
 0x2cf   : > { %v2294_v53 = vsel %vm443_vm5, %v2292_v44, %v2290_v42  ;;  %v2293_v10 = vsel %vm443_vm5, %v2290_v42, %v2292_v44  ;;  %v2272_v13 = vadd.f32 %v2270_v49, %v2242_v47  ;;  %v2288_v57 = vadd.f32 %v2286_v61, %v2258_v62 }
 0x2d0   : > { %v2296_v15 = vmul.f32 %v2294_v53, %v5047_v51  ;;  %v2304_v40 = vmul.f32 %v2294_v53, %v5048_v32  ;;  %v2312_v16 = vmul.f32 %v2294_v53, %v5105_v12  ;;  %v2295_v41 = vmul.f32 %v2293_v10, %v5047_v51 }
 0x2d1   : > { %v2303_v27 = vmul.f32 %v2293_v10, %v5048_v32  ;;  %v2311_v37 = vmul.f32 %v2293_v10, %v5105_v12  ;;  %v2280_v53 = vadd.f32 %v2278_v29, %v2250_v4  ;;  %v5109_v12 = vld [vmem:[#allocation52_spill] sm:$0xff] }
 0x2d2   : > { %v2299_v45 = vrot.slane %v2296_v15, 7  ;;  %v2307_v33 = vrot.slane %v2304_v40, 7  ;;  %v2315_v0 = vrot.slane %v2312_v16, 7  ;;  %v5108_v15 = vld [vmem:[#allocation51_spill] sm:$0xff] }
 0x2d4   : > { %v2300_v34 = vsel %vm315_vm1, %v2295_v41, %v2299_v45  ;;  %v2308_v51 = vsel %vm315_vm1, %v2303_v27, %v2307_v33  ;;  %v2316_v21 = vsel %vm315_vm1, %v2311_v37, %v2315_v0  ;;  %v4623_v33 = vpop.permute.xlu2 %2453 }
 0x2d5   : > { %v2350_v44 = vpop.permute.xlu1 %2349  ;;  %v2302_v30 = vadd.f32 %v2300_v34, %v2272_v13  ;;  %v2310_v54 = vadd.f32 %v2308_v51, %v2280_v53  ;;  %v2318_v10 = vadd.f32 %v2316_v21, %v2288_v57  ;;  %v5113_v57 = vld [vmem:[#allocation56_spill] sm:$0xff] }
 0x2d6   : > { %v2322_v42 = vpop.permute.xlu0 %2321  ;;  %v2354_v63 = vsel %vm511_vm7, %v4548_v5, %v2350_v44  ;;  %v2353_v60 = vsel %vm511_vm7, %v2350_v44, %v4548_v5 }
 0x2d7   : > { %v2356_v32 = vmul.f32 %v2354_v63, %v5106_v59  ;;  %v2324_v36 = vsel %vm477_vm6, %v2322_v42, %v4525_v38  ;;  %v2364_v35 = vmul.f32 %v2354_v63, %v5107_v8  ;;  %v2372_v40 = vmul.f32 %v2354_v63, %v5108_v15 }
 0x2d8   : > { %v2323_v28 = vsel %vm477_vm6, %v4525_v38, %v2322_v42  ;;  %v2326_v16 = vmul.f32 %v2324_v36, %v5109_v12  ;;  %v2334_v31 = vmul.f32 %v2324_v36, %v5110_v23  ;;  %v2355_v5 = vmul.f32 %v2353_v60, %v5106_v59 }
 0x2d9   : > { %v2359_v3 = vrot.slane %v2356_v32, 7  ;;  %v2363_v45 = vmul.f32 %v2353_v60, %v5107_v8  ;;  %v2342_v47 = vmul.f32 %v2324_v36, %v5111_v56  ;;  %v2325_v0 = vmul.f32 %v2323_v28, %v5109_v12  ;;  %v5112_v32 = vld [vmem:[#allocation55_spill] sm:$0xff] }
 0x2da   : > { %v2329_v46 = vrot.slane %v2326_v16, 7  ;;  %v2333_v38 = vmul.f32 %v2323_v28, %v5110_v23  ;;  %v2337_v4 = vrot.slane %v2334_v31, 7  ;;  %v2367_v41 = vrot.slane %v2364_v35, 7 }
 0x2db   : > { %v2375_v44 = vrot.slane %v2372_v40, 7  ;;  %v2341_v49 = vmul.f32 %v2323_v28, %v5111_v56  ;;  %v2345_v27 = vrot.slane %v2342_v47, 7  ;;  %v2371_v42 = vmul.f32 %v2353_v60, %v5108_v15  ;;  %v5114_v15 = vld [vmem:[#allocation57_spill] sm:$0xff] }
 0x2dc   : > { %v2330_v29 = vsel %vm315_vm1, %v2325_v0, %v2329_v46  ;;  %v2338_v61 = vsel %vm315_vm1, %v2333_v38, %v2337_v4  ;;  %v2360_v60 = vsel %vm315_vm1, %v2355_v5, %v2359_v3  ;;  %v2368_v8 = vsel %vm315_vm1, %v2363_v45, %v2367_v41  ;;  %v4648_v4 = vpop.permute.xlu2 %2511  ;;  %v5115_v41 = vld [vmem:[#allocation61_spill] sm:$0xff] }
 0x2dd   : > { %v2382_v62 = vpop.permute.xlu1 %2381  ;;  %v2332_v63 = vadd.f32 %v2330_v29, %v2302_v30  ;;  %v2340_v13 = vadd.f32 %v2338_v61, %v2310_v54  ;;  %v2346_v51 = vsel %vm315_vm1, %v2341_v49, %v2345_v27  ;;  %v2376_v35 = vsel %vm315_vm1, %v2371_v42, %v2375_v44  ;;  %v5116_v49 = vld [vmem:[#allocation62_spill] sm:$0xff] }
 0x2de   : > { %v2380_v37 = vpop.permute.xlu0 %2379  ;;  %v2348_v59 = vadd.f32 %v2346_v51, %v2318_v10  ;;  %v2410_v44 = vmul.f32 %v4367_v14, %v5115_v41  ;;  %v2412_v27 = vmul.f32 %v4367_v14, %v5116_v49 }
 0x2df   : > { %v2384_v34 = vsel %vm545_vm8, %v2382_v62, %v2380_v37  ;;  %v2383_v21 = vsel %vm545_vm8, %v2380_v37, %v2382_v62  ;;  %v2362_v16 = vadd.f32 %v2360_v60, %v2332_v63  ;;  %v2370_v10 = vadd.f32 %v2368_v8, %v2340_v13  ;;  %v5117_v37 = vld [vmem:[#allocation63_spill] sm:$0xff]  ;;  %v5118_v13 = vld [vmem:[#allocation64_spill] sm:$0xff] }
 0x2e0   : > { %v2386_v53 = vmul.f32 %v2384_v34, %v5112_v32  ;;  %v2394_v36 = vmul.f32 %v2384_v34, %v5113_v57  ;;  %v2402_v40 = vmul.f32 %v2384_v34, %v5114_v15  ;;  %v2385_v30 = vmul.f32 %v2383_v21, %v5112_v32 }
 0x2e1   : > { %v2393_v54 = vmul.f32 %v2383_v21, %v5113_v57  ;;  %v2401_v23 = vmul.f32 %v2383_v21, %v5114_v15  ;;  %v2378_v56 = vadd.f32 %v2376_v35, %v2348_v59  ;;  %v2414_v42 = vmul.f32 %v4367_v14, %v5117_v37  ;;  %v5119_v21 = vld [vmem:[#allocation65_spill] sm:$0xff]  ;;  %v5120_v14 = vld [vmem:[#allocation66_spill] sm:$0xff] }
 0x2e2   : > { %v2389_v28 = vrot.slane %v2386_v53, 7  ;;  %v2397_v12 = vrot.slane %v2394_v36, 7  ;;  %v2405_v31 = vrot.slane %v2402_v40, 7 }
 0x2e4   : > { %v2390_v5 = vsel %vm315_vm1, %v2385_v30, %v2389_v28  ;;  %v2398_v3 = vsel %vm315_vm1, %v2393_v54, %v2397_v12  ;;  %v2406_v46 = vsel %vm315_vm1, %v2401_v23, %v2405_v31  ;;  %v2544_v54 = vpop.permute.xlu2 %2543 }
 0x2e5   : > { %v2452_v45 = vpop.permute.xlu1 %2451  ;;  %v2392_v47 = vadd.f32 %v2390_v5, %v2362_v16  ;;  %v2400_v0 = vadd.f32 %v2398_v3, %v2370_v10  ;;  %v2408_v62 = vadd.f32 %v2406_v46, %v2378_v56 }
 0x2e6   : > { %v2424_v38 = vpop.permute.xlu0 %2423  ;;  %v2456_v32 = vsel %vm341_vm2, %v4623_v33, %v2452_v45  ;;  %v2455_v31 = vsel %vm341_vm2, %v2452_v45, %v4623_v33 }
 0x2e7   : > { %v2411_v29 = vadd.f32 %v2410_v44, %v2392_v47  ;;  %v2413_v61 = vadd.f32 %v2412_v27, %v2400_v0  ;;  %v2415_v34 = vadd.f32 %v2414_v42, %v2408_v62  ;;  %v2426_v63 = vsel %vm306_vm3, %v2424_v38, %v4590_v26 }
 0x2e8   : > { %v2428_v51 = vmul.f32 %v2426_v63, %v5118_v13  ;;  %v2436_v59 = vmul.f32 %v2426_v63, %v5119_v21  ;;  %v2425_v53 = vsel %vm306_vm3, %v4590_v26, %v2424_v38  ;;  %v2444_v57 = vmul.f32 %v2426_v63, %v5120_v14 }
 0x2e9   : > { %v2458_v15 = vmul.f32 %v2456_v32, %v5064_v43  ;;  %v2466_v40 = vmul.f32 %v2456_v32, %v5065_v48  ;;  %v2427_v30 = vmul.f32 %v2425_v53, %v5118_v13  ;;  %v2474_v12 = vmul.f32 %v2456_v32, %v5066_v2 }
 0x2ea   : > { %v2431_v60 = vrot.slane %v2428_v51, 7  ;;  %v2439_v35 = vrot.slane %v2436_v59, 7  ;;  %v2435_v26 = vmul.f32 %v2425_v53, %v5119_v21  ;;  %v2447_v16 = vrot.slane %v2444_v57, 7 }
 0x2eb   : > { %v2443_v5 = vmul.f32 %v2425_v53, %v5120_v14  ;;  %v2461_v47 = vrot.slane %v2458_v15, 7  ;;  %v2469_v0 = vrot.slane %v2466_v40, 7  ;;  %v2477_v46 = vrot.slane %v2474_v12, 7 }
 0x2ec   : > { %v2432_v10 = vsel %vm315_vm1, %v2427_v30, %v2431_v60  ;;  %v2440_v56 = vsel %vm315_vm1, %v2435_v26, %v2439_v35  ;;  %v2457_v49 = vmul.f32 %v2455_v31, %v5064_v43  ;;  %v2465_v33 = vmul.f32 %v2455_v31, %v5065_v48  ;;  %v5121_v60 = vld [vmem:[#allocation70_spill] sm:$0xff]  ;;  %v5122_v30 = vld [vmem:[#allocation71_spill] sm:$0xff] }
 0x2ed   : > { %v2484_v36 = vpop.permute.xlu1 %2483  ;;  %v2434_v38 = vadd.f32 %v2432_v10, %v2411_v29  ;;  %v2448_v62 = vsel %vm315_vm1, %v2443_v5, %v2447_v16  ;;  %v2442_v45 = vadd.f32 %v2440_v56, %v2413_v61  ;;  %v2473_v42 = vmul.f32 %v2455_v31, %v5066_v2  ;;  %v5123_v16 = vld [vmem:[#allocation67_spill] sm:$0xff] }
 0x2ee   : > { %v2482_v8 = vpop.permute.xlu0 %2481  ;;  %v2462_v29 = vsel %vm315_vm1, %v2457_v49, %v2461_v47  ;;  %v2470_v51 = vsel %vm315_vm1, %v2465_v33, %v2469_v0  ;;  %v2450_v21 = vadd.f32 %v2448_v62, %v2415_v34  ;;  %v4702_v34 = vpop.permute.xlu2 %2601 }
 0x2ef   : > { %v2486_v28 = vsel %vm375_vm0, %v2484_v36, %v2482_v8  ;;  %v2485_v41 = vsel %vm375_vm0, %v2482_v8, %v2484_v36  ;;  %v2478_v32 = vsel %vm315_vm1, %v2473_v42, %v2477_v46  ;;  %v2464_v43 = vadd.f32 %v2462_v29, %v2434_v38 }
 0x2f0   : > { %v2488_v23 = vmul.f32 %v2486_v28, %v3673_v17  ;;  %v2496_v3 = vmul.f32 %v2486_v28, %v3679_v25  ;;  %v2504_v13 = vmul.f32 %v2486_v28, %v3683_v9  ;;  %v2487_v59 = vmul.f32 %v2485_v41, %v3673_v17 }
 0x2f1   : > { %v2495_v48 = vmul.f32 %v2485_v41, %v3679_v25  ;;  %v2472_v2 = vadd.f32 %v2470_v51, %v2442_v45  ;;  %v2480_v35 = vadd.f32 %v2478_v32, %v2450_v21  ;;  %v2503_v15 = vmul.f32 %v2485_v41, %v3683_v9 }
 0x2f2   : > { %v2491_v27 = vrot.slane %v2488_v23, 7  ;;  %v2499_v63 = vrot.slane %v2496_v3, 7  ;;  %v2507_v36 = vrot.slane %v2504_v13, 7 }
 0x2f4   : > { %v2492_v53 = vsel %vm315_vm1, %v2487_v59, %v2491_v27  ;;  %v2500_v17 = vsel %vm315_vm1, %v2495_v48, %v2499_v63  ;;  %v2508_v9 = vsel %vm315_vm1, %v2503_v15, %v2507_v36 }
 0x2f5   : > { %v2542_v44 = vpop.permute.xlu1 %2541  ;;  %v2494_v12 = vadd.f32 %v2492_v53, %v2464_v43  ;;  %v2502_v56 = vadd.f32 %v2500_v17, %v2472_v2  ;;  %v2510_v13 = vadd.f32 %v2508_v9, %v2480_v35 }
 0x2f6   : > { %v2514_v37 = vpop.permute.xlu0 %2513  ;;  %v2546_v14 = vsel %vm443_vm5, %v2544_v54, %v2542_v44  ;;  %v2545_v26 = vsel %vm443_vm5, %v2542_v44, %v2544_v54  ;;  %v2634_v48 = vpop.permute.xlu2 %2633 }
 0x2f7   : > { %v2516_v61 = vsel %vm409_vm4, %v2514_v37, %v4648_v4  ;;  %v2515_v25 = vsel %vm409_vm4, %v4648_v4, %v2514_v37  ;;  %v2548_v10 = vmul.f32 %v2546_v14, %v5123_v16  ;;  %v2556_v5 = vmul.f32 %v2546_v14, %v5067_v20 }
 0x2f8   : > { %v2518_v57 = vmul.f32 %v2516_v61, %v3706_v55  ;;  %v2526_v8 = vmul.f32 %v2516_v61, %v5121_v60  ;;  %v2534_v28 = vmul.f32 %v2516_v61, %v5122_v30  ;;  %v2517_v4 = vmul.f32 %v2515_v25, %v3706_v55 }
 0x2f9   : > { %v2564_v0 = vmul.f32 %v2546_v14, %v5068_v6  ;;  %v2525_v46 = vmul.f32 %v2515_v25, %v5121_v60  ;;  %v2547_v38 = vmul.f32 %v2545_v26, %v5123_v16  ;;  %v2533_v41 = vmul.f32 %v2515_v25, %v5122_v30 }
 0x2fa   : > { %v2521_v40 = vrot.slane %v2518_v57, 7  ;;  %v2529_v23 = vrot.slane %v2526_v8, 7  ;;  %v2537_v3 = vrot.slane %v2534_v28, 7  ;;  %v2551_v55 = vrot.slane %v2548_v10, 7 }
 0x2fb   : > { %v2559_v27 = vrot.slane %v2556_v5, 7  ;;  %v2567_v29 = vrot.slane %v2564_v0, 7  ;;  %v2555_v59 = vmul.f32 %v2545_v26, %v5067_v20  ;;  %v2563_v2 = vmul.f32 %v2545_v26, %v5068_v6 }
 0x2fc   : > { %v2522_v62 = vsel %vm315_vm1, %v2517_v4, %v2521_v40  ;;  %v2530_v49 = vsel %vm315_vm1, %v2525_v46, %v2529_v23  ;;  %v2538_v37 = vsel %vm315_vm1, %v2533_v41, %v2537_v3  ;;  %v2552_v61 = vsel %vm315_vm1, %v2547_v38, %v2551_v55 }
 0x2fd   : > { %v2574_v31 = vpop.permute.xlu1 %2573  ;;  %v2524_v51 = vadd.f32 %v2522_v62, %v2494_v12  ;;  %v2532_v32 = vadd.f32 %v2530_v49, %v2502_v56  ;;  %v2540_v53 = vadd.f32 %v2538_v37, %v2510_v13  ;;  %v2560_v17 = vsel %vm315_vm1, %v2555_v59, %v2559_v27 }
 0x2fe   : > { %v2572_v47 = vpop.permute.xlu0 %2571 }
 0x2ff   : > { %v2576_v54 = vsel %vm477_vm6, %v2574_v31, %v2572_v47  ;;  %v2575_v33 = vsel %vm477_vm6, %v2572_v47, %v2574_v31  ;;  %v2554_v8 = vadd.f32 %v2552_v61, %v2524_v51  ;;  %v2562_v15 = vadd.f32 %v2560_v17, %v2532_v32 }
 0x300   : > { %v2578_v44 = vmul.f32 %v2576_v54, %v5069_v39  ;;  %v2586_v45 = vmul.f32 %v2576_v54, %v3760_v24  ;;  %v2594_v63 = vmul.f32 %v2576_v54, %v3766_v1  ;;  %v2577_v43 = vmul.f32 %v2575_v33, %v5069_v39 }
 0x301   : > { %v2585_v14 = vmul.f32 %v2575_v33, %v3760_v24  ;;  %v2568_v39 = vsel %vm315_vm1, %v2563_v2, %v2567_v29  ;;  %v2593_v24 = vmul.f32 %v2575_v33, %v3766_v1 }
 0x302   : > { %v2581_v42 = vrot.slane %v2578_v44, 7  ;;  %v2589_v21 = vrot.slane %v2586_v45, 7  ;;  %v2597_v25 = vrot.slane %v2594_v63, 7  ;;  %v2570_v28 = vadd.f32 %v2568_v39, %v2540_v53 }
 0x304   : > { %v2582_v36 = vsel %vm315_vm1, %v2577_v43, %v2581_v42  ;;  %v2590_v35 = vsel %vm315_vm1, %v2585_v14, %v2589_v21  ;;  %v2598_v23 = vsel %vm315_vm1, %v2593_v24, %v2597_v25 }
 0x305   : > { %v2632_v57 = vpop.permute.xlu1 %2631  ;;  %v2584_v12 = vadd.f32 %v2582_v36, %v2554_v8  ;;  %v2592_v10 = vadd.f32 %v2590_v35, %v2562_v15  ;;  %v2600_v46 = vadd.f32 %v2598_v23, %v2570_v28 }
 0x306   : > { %v2636_v20 = vsel %vm545_vm8, %v2634_v48, %v2632_v57  ;;  %v2604_v60 = vpop.permute.xlu0 %2603  ;;  %v2635_v56 = vsel %vm545_vm8, %v2632_v57, %v2634_v48 }
 0x307   : > { %v2638_v6 = vmul.f32 %v2636_v20, %v3773_v19  ;;  %v2646_v40 = vmul.f32 %v2636_v20, %v3820_v22  ;;  %v2605_v30 = vsel %vm511_vm7, %v4702_v34, %v2604_v60  ;;  %v2654_v26 = vmul.f32 %v2636_v20, %v5070_v52 }
 0x308   : > { %v2606_v16 = vsel %vm511_vm7, %v2604_v60, %v4702_v34  ;;  %v2607_v4 = vmul.f32 %v2605_v30, %v5071_v58  ;;  %v2615_v0 = vmul.f32 %v2605_v30, %v3830_v18  ;;  %v2623_v38 = vmul.f32 %v2605_v30, %v3833_v7 }
 0x309   : > { %v2608_v31 = vmul.f32 %v2606_v16, %v5071_v58  ;;  %v2616_v1 = vmul.f32 %v2606_v16, %v3830_v18  ;;  %v2641_v5 = vrot.slane %v2638_v6, 7  ;;  %v2624_v3 = vmul.f32 %v2606_v16, %v3833_v7 }
 0x30a   : > { %v2649_v47 = vrot.slane %v2646_v40, 7  ;;  %v2657_v54 = vrot.slane %v2654_v26, 7  ;;  %v2637_v41 = vmul.f32 %v2635_v56, %v3773_v19  ;;  %v2645_v11 = vmul.f32 %v2635_v56, %v3820_v22 }
 0x30b   : > { %v2611_v9 = vrot.slane %v2608_v31, 7  ;;  %v2619_v34 = vrot.slane %v2616_v1, 7  ;;  %v2627_v62 = vrot.slane %v2624_v3, 7  ;;  %v2653_v55 = vmul.f32 %v2635_v56, %v5070_v52 }
 0x30c   : > { %v2642_v45 = vsel %vm315_vm1, %v2637_v41, %v2641_v5  ;;  %v2650_v27 = vsel %vm315_vm1, %v2645_v11, %v2649_v47 }
 0x30d   : > { %v2612_v44 = vsel %vm315_vm1, %v2607_v4, %v2611_v9  ;;  %v2620_v58 = vsel %vm315_vm1, %v2615_v0, %v2619_v34  ;;  %v2628_v18 = vsel %vm315_vm1, %v2623_v38, %v2627_v62  ;;  %v2658_v22 = vsel %vm315_vm1, %v2653_v55, %v2657_v54 }
 0x30e   : > { %v2614_v49 = vadd.f32 %v2612_v44, %v2584_v12  ;;  %v2622_v33 = vadd.f32 %v2620_v58, %v2592_v10  ;;  %v2630_v19 = vadd.f32 %v2628_v18, %v2600_v46 }
 0x310   : > { %v2644_v7 = vadd.f32 %v2642_v45, %v2614_v49  ;;  %v2652_v37 = vadd.f32 %v2650_v27, %v2622_v33  ;;  %v2660_v42 = vadd.f32 %v2658_v22, %v2630_v19 }
 0x312   : > { %2661 = vst.msk [vmem:[%s197_s28] ss:$4 sm:$0x3] %vm3870_vm9, %v2644_v7 }
 0x313   : > { %2840 = vst.msk [vmem:[%s197_s28 + $0x1] ss:$4 sm:$0x3] %vm3870_vm9, %v2652_v37 }
 0x314   : > { %2841 = vst.msk [vmem:[%s197_s28 + $0x2] ss:$4 sm:$0x3] %vm3870_vm9, %v2660_v42 }
 0x315 PF: > { %s15_s12 = sadd.s32 1, %s2927_s12  }
 0x316   : > { %p12_p7 = scmp.ge.s32.totalorder %s15_s12, 4  }
 0x318   :  { %14 = sbr.rel (!%p12_p7) target bundleno = 2 (0x2), region = 79 }
 0x31d   :  { %2687 = vsyncpa [#allocation5], 1 }
 0x31e   :  { %2689 = vsyncpa [#allocation5 + $0x1], 1 }
 0x31f   :  { %2690 = vsyncpa [#allocation7], 1 }

</bundles_post_ra>
